<compile_context>
chip_gen: v7x
topology: tpu7x:2x2x1
jax: 0.10.0
libtpu: 0.0.40
codegen_flags: <defaults>
</compile_context>

<pallas_src>
import jax
import jax.numpy as jnp
from jax import lax
from jax.experimental import pallas as pl
from jax.experimental.pallas import tpu as pltpu


# -----------------------------------------------------------------------------
# Fused kernel: 6-group shared LSTM (fused, lane-aligned gates) + MLP head.
# -----------------------------------------------------------------------------
def _fused_kernel(x_ref, len_ref, wih_ref, whh_ref, bg_ref,
                  w1_ref, b1_ref, w2_ref, b2_ref, w3_ref, b3_ref,
                  out_ref, pre_scr):
    B, L, FIN = x_ref.shape              # FIN = 6*H = 18 (group-major features)
    NL = wih_ref.shape[1]                # 128 lanes = 4 gate blocks of 32
    GATE = whh_ref.shape[0]              # 32 = padded per-gate / state width

    # Hoist all weight / bias / length loads out of the time loop.
    wih = wih_ref[...]                   # (18, 128)  block-diag input weights (pre-scaled)
    whh = whh_ref[...]                   # (32, 128)  block-diag recurrent weights (rows 18..31 zero)
    bg = bg_ref[...]                     # (1, 128)   fused bias (b_ih + b_hh, pre-scaled)
    lens = len_ref[...]                  # (B, 1)     int32 sequence lengths

    # Hoisted input projection: one (B*L, 18) @ (18, 128) matmul + bias, done
    # once, entirely off the recurrence's serial h-dependency chain.
    x2 = x_ref[...].reshape(B * L, FIN)
    pre_scr[...] = (jnp.dot(x2, wih, preferred_element_type=jnp.float32)
                    + bg).reshape(B, L, NL)

    # Packed-sequence validity masks, precomputed (t is static under unroll).
    valid = [lens > t for t in range(L)]                       # list of (B, 1) bool

    h = jnp.zeros((B, GATE), jnp.float32)                      # lanes 18..31 stay 0
    c = jnp.zeros((B, GATE), jnp.float32)

    for t in range(L):                                         # static unrolled time loop
        pre = pre_scr[:, t, :] + jnp.dot(h, whh, preferred_element_type=jnp.float32)
        # One EUP op for all four gates: weights were pre-scaled so
        #   tanh(pre) = tanh(z/2) for i/f/o (-> sigmoid = 0.5*t+0.5)
        #   tanh(pre) = tanh(z_g) for the cell gate.
        tg = jnp.tanh(pre)                                     # (B, 128)
        t_i = tg[:, 0 * GATE:1 * GATE]                         # 32-lane aligned slices
        t_f = tg[:, 1 * GATE:2 * GATE]
        g_g = tg[:, 2 * GATE:3 * GATE]
        t_o = tg[:, 3 * GATE:4 * GATE]
        c_new = 0.5 * ((t_f + 1.0) * c + (t_i + 1.0) * g_g)
        h_new = (0.5 * (t_o + 1.0)) * jnp.tanh(c_new)
        # Freeze state once past each sequence's length (packed-sequence semantics).
        h = jnp.where(valid[t], h_new, h)
        c = jnp.where(valid[t], c_new, c)

    # est == torch.cat(hds, 1) lives in lanes [0, 18) of h; w1's rows are
    # zero-padded to GATE so no slice is needed before the MLP head.
    y = jnp.maximum(
        jnp.dot(h, w1_ref[...], preferred_element_type=jnp.float32) + b1_ref[...], 0.0)
    y = jnp.maximum(
        jnp.dot(y, w2_ref[...], preferred_element_type=jnp.float32) + b2_ref[...], 0.0)
    y = jnp.dot(y, w3_ref[...], preferred_element_type=jnp.float32) + b3_ref[...]
    out_ref[...] = jax.nn.sigmoid(y)


def combonn_fused_call(x, lens, packed):
    B, L, _ = x.shape
    NL = packed["wih"].shape[1]
    out_nch = packed["b3"].shape[-1]
    # Gridless single invocation: every operand is a full VMEM-resident block
    # (total footprint is a few KB), so there is no pipeline to configure.
    return pl.pallas_call(
        _fused_kernel,
        out_shape=jax.ShapeDtypeStruct((B, out_nch), jnp.float32),
        scratch_shapes=[pltpu.VMEM((B, L, NL), jnp.float32)],   # hoisted input projection
    )(x, lens, packed["wih"], packed["whh"], packed["bg"],
      packed["w1"], packed["b1"], packed["w2"], packed["b2"],
      packed["w3"], packed["b3"])


# -----------------------------------------------------------------------------
# One-time weight packing (done at setup, OUTSIDE the jitted forward):
#   * per-gate (i, f, g, o) LSTM weights -> block-diagonal fused form,
#   * each gate block padded to a 32-lane boundary (4 * 32 = 128 lanes = 1 vreg),
#   * gates i/f/o pre-scaled by 0.5 and g by 1.0 so a single tanh(pre) yields
#     both sigmoid(z) (= 0.5*tanh(z/2)+0.5) and tanh(z_g) inside the kernel,
#   * w1 rows zero-padded from 18 to 32 to match the padded state width.
# Column layout inside each gate block is group-major (col 3*g + m), matching
# the (B,) group-major h / c / x lane layout and torch.cat(hds, 1).
# -----------------------------------------------------------------------------
def pack_params(params):
    wih, whh, b = params["wih"], params["whh"], params["b"]    # (4,3,3), (4,3,3), (4,1,3)
    G = 6
    H = whh.shape[-1]
    F = G * H                      # 18
    GATE = 32                      # lane-aligned gate block / padded state width
    NL = 4 * GATE                  # 128
    scale = (0.5, 0.5, 1.0, 0.5)   # i, f, g, o  (single-tanh gate trick)
    eyeG = jnp.eye(G, dtype=jnp.float32)

    wih_big = jnp.zeros((F, NL), jnp.float32)
    whh_big = jnp.zeros((GATE, NL), jnp.float32)
    bg = jnp.zeros((1, NL), jnp.float32)
    for k in range(4):
        wih_big = wih_big.at[:, k * GATE:k * GATE + F].set(scale[k] * jnp.kron(eyeG, wih[k]))
        whh_big = whh_big.at[:F, k * GATE:k * GATE + F].set(scale[k] * jnp.kron(eyeG, whh[k]))
        bg = bg.at[:, k * GATE:k * GATE + F].set(scale[k] * jnp.tile(b[k], (1, G)))

    w1_pad = jnp.zeros((GATE, params["w1"].shape[1]), jnp.float32).at[:F, :].set(params["w1"])
    return {"wih": wih_big, "whh": whh_big, "bg": bg,
            "w1": w1_pad, "b1": params["b1"], "w2": params["w2"], "b2": params["b2"],
            "w3": params["w3"], "b3": params["b3"]}


# -----------------------------------------------------------------------------
# Parameters (deterministic synthetic init) and full forward.
# -----------------------------------------------------------------------------
def init_params(key, in_nch=18, hlweights=(32, 16), out_nch=3):
    n_in = in_nch // 6          # LSTM input size  = 3
    H = in_nch // 6             # LSTM hidden size = 3 (forced by module consistency)
    ks = jax.random.split(key, 9)
    s = 0.4
    return {
        "wih": s * jax.random.normal(ks[0], (4, n_in, H), jnp.float32),   # gates i,f,g,o
        "whh": s * jax.random.normal(ks[1], (4, H, H), jnp.float32),
        "b":   s * jax.random.normal(ks[2], (4, 1, H), jnp.float32),      # b_ih + b_hh
        "w1":  s * jax.random.normal(ks[3], (in_nch, hlweights[0]), jnp.float32),
        "b1":  s * jax.random.normal(ks[4], (1, hlweights[0]), jnp.float32),
        "w2":  s * jax.random.normal(ks[5], (hlweights[0], hlweights[1]), jnp.float32),
        "b2":  s * jax.random.normal(ks[6], (1, hlweights[1]), jnp.float32),
        "w3":  s * jax.random.normal(ks[7], (hlweights[1], out_nch), jnp.float32),
        "b3":  s * jax.random.normal(ks[8], (1, out_nch), jnp.float32),
    }


@jax.jit
def combonn_video_pre_forward(packed, inpt, mask, x_lengths):
    del mask  # unused by the PyTorch forward as well
    B = inpt.shape[0]
    # inpt channel c = 3*group + j, so the raw (B, L, 18) layout is already the
    # group-major feature layout the fused kernel wants; no transpose needed.
    x = inpt.astype(jnp.float32)
    lens = x_lengths.astype(jnp.int32).reshape(B, 1)
    # Pad batch to a full sublane group (8) so all vector loads/stores in the
    # unrolled recurrence are unmasked; padded rows have length 0 -> h stays 0.
    Bp = ((B + 7) // 8) * 8
    if Bp != B:
        x = jnp.pad(x, ((0, Bp - B), (0, 0), (0, 0)))
        lens = jnp.pad(lens, ((0, Bp - B), (0, 0)))
    out = combonn_fused_call(x, lens, packed)
    return out[:B]


# -----------------------------------------------------------------------------
# Pure-JAX reference (mirrors the PyTorch per-group loop) for correctness check.
# -----------------------------------------------------------------------------
def _reference_forward(params, inpt, x_lengths):
    bb, L, C = inpt.shape
    H = params["whh"].shape[-1]
    x = inpt.reshape(bb, L, 6, C // 6)
    wih, whh, b = params["wih"], params["whh"], params["b"]

    def lstm_last(seq):  # seq: (B, L, 3)
        def step(carry, t):
            h, c = carry
            xt = seq[:, t, :]
            pre = [xt @ wih[k] + h @ whh[k] + b[k] for k in range(4)]
            i_g = jax.nn.sigmoid(pre[0]); f_g = jax.nn.sigmoid(pre[1])
            g_g = jnp.tanh(pre[2]);       o_g = jax.nn.sigmoid(pre[3])
            c_new = f_g * c + i_g * g_g
            h_new = o_g * jnp.tanh(c_new)
            valid = (t < x_lengths)[:, None]
            return (jnp.where(valid, h_new, h), jnp.where(valid, c_new, c)), None

        init = (jnp.zeros((bb, H), jnp.float32), jnp.zeros((bb, H), jnp.float32))
        (h, _), _ = lax.scan(step, init, jnp.arange(L))
        return h

    est = jnp.concatenate([lstm_last(x[:, :, ii, :]) for ii in range(6)], axis=1)
    y = jnp.maximum(est @ params["w1"] + params["b1"], 0.0)
    y = jnp.maximum(y @ params["w2"] + params["b2"], 0.0)
    y = y @ params["w3"] + params["b3"]
    return jax.nn.sigmoid(y)


if __name__ == "__main__":
    key = jax.random.PRNGKey(0)
    k_inp, k_par = jax.random.split(key)

    bb, L, in_nch, out_nch = 4, 8, 18, 3
    params = init_params(k_par, in_nch=in_nch, hlweights=(32, 16), out_nch=out_nch)
    packed = pack_params(params)   # one-time packing, outside the per-call path

    inpt = jax.random.normal(k_inp, (bb, L, in_nch), jnp.float32)
    mask = jnp.ones((bb, L), jnp.float32)                 # unused (parity with torch signature)
    # TODO(synk): zero-length sequences raise in torch's pack_padded_sequence; here they yield h=0.
    x_lengths = jnp.array([8, 5, 3, 7], dtype=jnp.int32)  # variable sequence lengths

    out = combonn_video_pre_forward(packed, inpt, mask, x_lengths)
    out = jax.block_until_ready(out)

    ref = _reference_forward(params, inpt, x_lengths)
    assert out.shape == (bb, out_nch), out.shape
    assert jnp.allclose(out, ref, rtol=1e-4, atol=1e-4), (out, ref)
    print("KERNEL_OK")
</pallas_src>

<mosaic_0001>
module attributes {stable_mosaic.version = 11 : i64} {
  func.func @_fused_kernel(%arg0: memref<8x8x18xf32, #tpu.memory_space<vmem>>, %arg1: memref<8x1xi32, #tpu.memory_space<vmem>>, %arg2: memref<18x128xf32, #tpu.memory_space<vmem>>, %arg3: memref<32x128xf32, #tpu.memory_space<vmem>>, %arg4: memref<1x128xf32, #tpu.memory_space<vmem>>, %arg5: memref<32x32xf32, #tpu.memory_space<vmem>>, %arg6: memref<1x32xf32, #tpu.memory_space<vmem>>, %arg7: memref<32x16xf32, #tpu.memory_space<vmem>>, %arg8: memref<1x16xf32, #tpu.memory_space<vmem>>, %arg9: memref<16x3xf32, #tpu.memory_space<vmem>>, %arg10: memref<1x3xf32, #tpu.memory_space<vmem>>, %arg11: memref<8x3xf32, #tpu.memory_space<vmem>>, %arg12: memref<8x8x128xf32, #tpu.memory_space<vmem>>) attributes {dimension_semantics = [], scalar_prefetch = 0 : i64, scratch_operands = 1 : i64, tpu.core_type = #tpu.core_type<tc>} {
    %c0 = arith.constant 0 : index
    %c0_0 = arith.constant 0 : index
    %0 = vector.load %arg2[%c0, %c0_0] : memref<18x128xf32, #tpu.memory_space<vmem>>, vector<18x128xf32>
    %c0_1 = arith.constant 0 : index
    %c0_2 = arith.constant 0 : index
    %1 = vector.load %arg3[%c0_1, %c0_2] : memref<32x128xf32, #tpu.memory_space<vmem>>, vector<32x128xf32>
    %c0_3 = arith.constant 0 : index
    %c0_4 = arith.constant 0 : index
    %2 = vector.load %arg4[%c0_3, %c0_4] : memref<1x128xf32, #tpu.memory_space<vmem>>, vector<1x128xf32>
    %c0_5 = arith.constant 0 : index
    %c0_6 = arith.constant 0 : index
    %3 = vector.load %arg1[%c0_5, %c0_6] : memref<8x1xi32, #tpu.memory_space<vmem>>, vector<8x1xi32>
    %c0_7 = arith.constant 0 : index
    %c0_8 = arith.constant 0 : index
    %c0_9 = arith.constant 0 : index
    %4 = vector.load %arg0[%c0_7, %c0_8, %c0_9] : memref<8x8x18xf32, #tpu.memory_space<vmem>>, vector<8x8x18xf32>
    %5 = vector.shape_cast %4 : vector<8x8x18xf32> to vector<64x18xf32>
    %cst = arith.constant dense<0.000000e+00> : vector<64x128xf32>
    %6 = tpu.matmul %5, %0, %cst {dimension_numbers = #tpu.dot_dimension_numbers<[1], [0], [0], [1], [0, 0, 1, 1], [], []>} : vector<64x18xf32>, vector<18x128xf32>, vector<64x128xf32> -> vector<64x128xf32>
    %7 = vector.broadcast %2 : vector<1x128xf32> to vector<64x128xf32>
    %8 = arith.addf %6, %7 : vector<64x128xf32>
    %9 = vector.shape_cast %8 : vector<64x128xf32> to vector<8x8x128xf32>
    %c0_10 = arith.constant 0 : index
    %c0_11 = arith.constant 0 : index
    %c0_12 = arith.constant 0 : index
    %10 = vector.load %arg12[%c0_10, %c0_11, %c0_12] : memref<8x8x128xf32, #tpu.memory_space<vmem>>, vector<8x8x128xf32>
    tpu.vector_store %arg12[%c0_10, %c0_11, %c0_12], %9 {strides = array<i32>} : memref<8x8x128xf32, #tpu.memory_space<vmem>>, vector<8x8x128xf32>,
    %c0_i32 = arith.constant 0 : i32
    %11 = vector.broadcast %c0_i32 : i32 to vector<8x1xi32>
    %12 = arith.cmpi sgt, %3, %11 : vector<8x1xi32>
    %c1_i32 = arith.constant 1 : i32
    %13 = vector.broadcast %c1_i32 : i32 to vector<8x1xi32>
    %14 = arith.cmpi sgt, %3, %13 : vector<8x1xi32>
    %c2_i32 = arith.constant 2 : i32
    %15 = vector.broadcast %c2_i32 : i32 to vector<8x1xi32>
    %16 = arith.cmpi sgt, %3, %15 : vector<8x1xi32>
    %c3_i32 = arith.constant 3 : i32
    %17 = vector.broadcast %c3_i32 : i32 to vector<8x1xi32>
    %18 = arith.cmpi sgt, %3, %17 : vector<8x1xi32>
    %c4_i32 = arith.constant 4 : i32
    %19 = vector.broadcast %c4_i32 : i32 to vector<8x1xi32>
    %20 = arith.cmpi sgt, %3, %19 : vector<8x1xi32>
    %c5_i32 = arith.constant 5 : i32
    %21 = vector.broadcast %c5_i32 : i32 to vector<8x1xi32>
    %22 = arith.cmpi sgt, %3, %21 : vector<8x1xi32>
    %c6_i32 = arith.constant 6 : i32
    %23 = vector.broadcast %c6_i32 : i32 to vector<8x1xi32>
    %24 = arith.cmpi sgt, %3, %23 : vector<8x1xi32>
    %c7_i32 = arith.constant 7 : i32
    %25 = vector.broadcast %c7_i32 : i32 to vector<8x1xi32>
    %26 = arith.cmpi sgt, %3, %25 : vector<8x1xi32>
    %cst_13 = arith.constant 0.000000e+00 : f32
    %27 = vector.broadcast %cst_13 : f32 to vector<8x32xf32>
    %cst_14 = arith.constant 0.000000e+00 : f32
    %28 = vector.broadcast %cst_14 : f32 to vector<8x32xf32>
    %c0_15 = arith.constant 0 : index
    %c0_16 = arith.constant 0 : index
    %c0_17 = arith.constant 0 : index
    %29 = vector.load %arg12[%c0_15, %c0_16, %c0_17] : memref<8x8x128xf32, #tpu.memory_space<vmem>>, vector<8x1x128xf32>
    %30 = vector.shape_cast %29 : vector<8x1x128xf32> to vector<8x128xf32>
    %cst_18 = arith.constant dense<0.000000e+00> : vector<8x128xf32>
    %31 = tpu.matmul %27, %1, %cst_18 {dimension_numbers = #tpu.dot_dimension_numbers<[1], [0], [0], [1], [0, 0, 1, 1], [], []>} : vector<8x32xf32>, vector<32x128xf32>, vector<8x128xf32> -> vector<8x128xf32>
    %32 = arith.addf %30, %31 : vector<8x128xf32>
    %33 = math.tanh %32 : vector<8x128xf32>
    %34 = vector.extract_strided_slice %33 {offsets = [0, 0], sizes = [8, 32], strides = [1, 1]} : vector<8x128xf32> to vector<8x32xf32>
    %35 = vector.extract_strided_slice %33 {offsets = [0, 32], sizes = [8, 32], strides = [1, 1]} : vector<8x128xf32> to vector<8x32xf32>
    %36 = vector.extract_strided_slice %33 {offsets = [0, 64], sizes = [8, 32], strides = [1, 1]} : vector<8x128xf32> to vector<8x32xf32>
    %37 = vector.extract_strided_slice %33 {offsets = [0, 96], sizes = [8, 32], strides = [1, 1]} : vector<8x128xf32> to vector<8x32xf32>
    %cst_19 = arith.constant 1.000000e+00 : f32
    %38 = vector.broadcast %cst_19 : f32 to vector<8x32xf32>
    %39 = arith.addf %35, %38 : vector<8x32xf32>
    %40 = arith.mulf %39, %28 : vector<8x32xf32>
    %cst_20 = arith.constant 1.000000e+00 : f32
    %41 = vector.broadcast %cst_20 : f32 to vector<8x32xf32>
    %42 = arith.addf %34, %41 : vector<8x32xf32>
    %43 = arith.mulf %42, %36 : vector<8x32xf32>
    %44 = arith.addf %40, %43 : vector<8x32xf32>
    %cst_21 = arith.constant 5.000000e-01 : f32
    %45 = vector.broadcast %cst_21 : f32 to vector<8x32xf32>
    %46 = arith.mulf %45, %44 : vector<8x32xf32>
    %cst_22 = arith.constant 1.000000e+00 : f32
    %47 = vector.broadcast %cst_22 : f32 to vector<8x32xf32>
    %48 = arith.addf %37, %47 : vector<8x32xf32>
    %cst_23 = arith.constant 5.000000e-01 : f32
    %49 = vector.broadcast %cst_23 : f32 to vector<8x32xf32>
    %50 = arith.mulf %49, %48 : vector<8x32xf32>
    %51 = math.tanh %46 : vector<8x32xf32>
    %52 = arith.mulf %50, %51 : vector<8x32xf32>
    %53 = vector.shape_cast %12 : vector<8x1xi1> to vector<8x1xi1>
    %54 = vector.broadcast %53 : vector<8x1xi1> to vector<8x32xi1>
    %55 = arith.select %54, %52, %27 : vector<8x32xi1>, vector<8x32xf32>
    %56 = vector.shape_cast %12 : vector<8x1xi1> to vector<8x1xi1>
    %57 = vector.broadcast %56 : vector<8x1xi1> to vector<8x32xi1>
    %58 = arith.select %57, %46, %28 : vector<8x32xi1>, vector<8x32xf32>
    %c0_24 = arith.constant 0 : index
    %c1 = arith.constant 1 : index
    %c0_25 = arith.constant 0 : index
    %59 = vector.load %arg12[%c0_24, %c1, %c0_25] : memref<8x8x128xf32, #tpu.memory_space<vmem>>, vector<8x1x128xf32>
    %60 = vector.shape_cast %59 : vector<8x1x128xf32> to vector<8x128xf32>
    %cst_26 = arith.constant dense<0.000000e+00> : vector<8x128xf32>
    %61 = tpu.matmul %55, %1, %cst_26 {dimension_numbers = #tpu.dot_dimension_numbers<[1], [0], [0], [1], [0, 0, 1, 1], [], []>} : vector<8x32xf32>, vector<32x128xf32>, vector<8x128xf32> -> vector<8x128xf32>
    %62 = arith.addf %60, %61 : vector<8x128xf32>
    %63 = math.tanh %62 : vector<8x128xf32>
    %64 = vector.extract_strided_slice %63 {offsets = [0, 0], sizes = [8, 32], strides = [1, 1]} : vector<8x128xf32> to vector<8x32xf32>
    %65 = vector.extract_strided_slice %63 {offsets = [0, 32], sizes = [8, 32], strides = [1, 1]} : vector<8x128xf32> to vector<8x32xf32>
    %66 = vector.extract_strided_slice %63 {offsets = [0, 64], sizes = [8, 32], strides = [1, 1]} : vector<8x128xf32> to vector<8x32xf32>
    %67 = vector.extract_strided_slice %63 {offsets = [0, 96], sizes = [8, 32], strides = [1, 1]} : vector<8x128xf32> to vector<8x32xf32>
    %cst_27 = arith.constant 1.000000e+00 : f32
    %68 = vector.broadcast %cst_27 : f32 to vector<8x32xf32>
    %69 = arith.addf %65, %68 : vector<8x32xf32>
    %70 = arith.mulf %69, %58 : vector<8x32xf32>
    %cst_28 = arith.constant 1.000000e+00 : f32
    %71 = vector.broadcast %cst_28 : f32 to vector<8x32xf32>
    %72 = arith.addf %64, %71 : vector<8x32xf32>
    %73 = arith.mulf %72, %66 : vector<8x32xf32>
    %74 = arith.addf %70, %73 : vector<8x32xf32>
    %cst_29 = arith.constant 5.000000e-01 : f32
    %75 = vector.broadcast %cst_29 : f32 to vector<8x32xf32>
    %76 = arith.mulf %75, %74 : vector<8x32xf32>
    %cst_30 = arith.constant 1.000000e+00 : f32
    %77 = vector.broadcast %cst_30 : f32 to vector<8x32xf32>
    %78 = arith.addf %67, %77 : vector<8x32xf32>
    %cst_31 = arith.constant 5.000000e-01 : f32
    %79 = vector.broadcast %cst_31 : f32 to vector<8x32xf32>
    %80 = arith.mulf %79, %78 : vector<8x32xf32>
    %81 = math.tanh %76 : vector<8x32xf32>
    %82 = arith.mulf %80, %81 : vector<8x32xf32>
    %83 = vector.shape_cast %14 : vector<8x1xi1> to vector<8x1xi1>
    %84 = vector.broadcast %83 : vector<8x1xi1> to vector<8x32xi1>
    %85 = arith.select %84, %82, %55 : vector<8x32xi1>, vector<8x32xf32>
    %86 = vector.shape_cast %14 : vector<8x1xi1> to vector<8x1xi1>
    %87 = vector.broadcast %86 : vector<8x1xi1> to vector<8x32xi1>
    %88 = arith.select %87, %76, %58 : vector<8x32xi1>, vector<8x32xf32>
    %c0_32 = arith.constant 0 : index
    %c2 = arith.constant 2 : index
    %c0_33 = arith.constant 0 : index
    %89 = vector.load %arg12[%c0_32, %c2, %c0_33] : memref<8x8x128xf32, #tpu.memory_space<vmem>>, vector<8x1x128xf32>
    %90 = vector.shape_cast %89 : vector<8x1x128xf32> to vector<8x128xf32>
    %cst_34 = arith.constant dense<0.000000e+00> : vector<8x128xf32>
    %91 = tpu.matmul %85, %1, %cst_34 {dimension_numbers = #tpu.dot_dimension_numbers<[1], [0], [0], [1], [0, 0, 1, 1], [], []>} : vector<8x32xf32>, vector<32x128xf32>, vector<8x128xf32> -> vector<8x128xf32>
    %92 = arith.addf %90, %91 : vector<8x128xf32>
    %93 = math.tanh %92 : vector<8x128xf32>
    %94 = vector.extract_strided_slice %93 {offsets = [0, 0], sizes = [8, 32], strides = [1, 1]} : vector<8x128xf32> to vector<8x32xf32>
    %95 = vector.extract_strided_slice %93 {offsets = [0, 32], sizes = [8, 32], strides = [1, 1]} : vector<8x128xf32> to vector<8x32xf32>
    %96 = vector.extract_strided_slice %93 {offsets = [0, 64], sizes = [8, 32], strides = [1, 1]} : vector<8x128xf32> to vector<8x32xf32>
    %97 = vector.extract_strided_slice %93 {offsets = [0, 96], sizes = [8, 32], strides = [1, 1]} : vector<8x128xf32> to vector<8x32xf32>
    %cst_35 = arith.constant 1.000000e+00 : f32
    %98 = vector.broadcast %cst_35 : f32 to vector<8x32xf32>
    %99 = arith.addf %95, %98 : vector<8x32xf32>
    %100 = arith.mulf %99, %88 : vector<8x32xf32>
    %cst_36 = arith.constant 1.000000e+00 : f32
    %101 = vector.broadcast %cst_36 : f32 to vector<8x32xf32>
    %102 = arith.addf %94, %101 : vector<8x32xf32>
    %103 = arith.mulf %102, %96 : vector<8x32xf32>
    %104 = arith.addf %100, %103 : vector<8x32xf32>
    %cst_37 = arith.constant 5.000000e-01 : f32
    %105 = vector.broadcast %cst_37 : f32 to vector<8x32xf32>
    %106 = arith.mulf %105, %104 : vector<8x32xf32>
    %cst_38 = arith.constant 1.000000e+00 : f32
    %107 = vector.broadcast %cst_38 : f32 to vector<8x32xf32>
    %108 = arith.addf %97, %107 : vector<8x32xf32>
    %cst_39 = arith.constant 5.000000e-01 : f32
    %109 = vector.broadcast %cst_39 : f32 to vector<8x32xf32>
    %110 = arith.mulf %109, %108 : vector<8x32xf32>
    %111 = math.tanh %106 : vector<8x32xf32>
    %112 = arith.mulf %110, %111 : vector<8x32xf32>
    %113 = vector.shape_cast %16 : vector<8x1xi1> to vector<8x1xi1>
    %114 = vector.broadcast %113 : vector<8x1xi1> to vector<8x32xi1>
    %115 = arith.select %114, %112, %85 : vector<8x32xi1>, vector<8x32xf32>
    %116 = vector.shape_cast %16 : vector<8x1xi1> to vector<8x1xi1>
    %117 = vector.broadcast %116 : vector<8x1xi1> to vector<8x32xi1>
    %118 = arith.select %117, %106, %88 : vector<8x32xi1>, vector<8x32xf32>
    %c0_40 = arith.constant 0 : index
    %c3 = arith.constant 3 : index
    %c0_41 = arith.constant 0 : index
    %119 = vector.load %arg12[%c0_40, %c3, %c0_41] : memref<8x8x128xf32, #tpu.memory_space<vmem>>, vector<8x1x128xf32>
    %120 = vector.shape_cast %119 : vector<8x1x128xf32> to vector<8x128xf32>
    %cst_42 = arith.constant dense<0.000000e+00> : vector<8x128xf32>
    %121 = tpu.matmul %115, %1, %cst_42 {dimension_numbers = #tpu.dot_dimension_numbers<[1], [0], [0], [1], [0, 0, 1, 1], [], []>} : vector<8x32xf32>, vector<32x128xf32>, vector<8x128xf32> -> vector<8x128xf32>
    %122 = arith.addf %120, %121 : vector<8x128xf32>
    %123 = math.tanh %122 : vector<8x128xf32>
    %124 = vector.extract_strided_slice %123 {offsets = [0, 0], sizes = [8, 32], strides = [1, 1]} : vector<8x128xf32> to vector<8x32xf32>
    %125 = vector.extract_strided_slice %123 {offsets = [0, 32], sizes = [8, 32], strides = [1, 1]} : vector<8x128xf32> to vector<8x32xf32>
    %126 = vector.extract_strided_slice %123 {offsets = [0, 64], sizes = [8, 32], strides = [1, 1]} : vector<8x128xf32> to vector<8x32xf32>
    %127 = vector.extract_strided_slice %123 {offsets = [0, 96], sizes = [8, 32], strides = [1, 1]} : vector<8x128xf32> to vector<8x32xf32>
    %cst_43 = arith.constant 1.000000e+00 : f32
    %128 = vector.broadcast %cst_43 : f32 to vector<8x32xf32>
    %129 = arith.addf %125, %128 : vector<8x32xf32>
    %130 = arith.mulf %129, %118 : vector<8x32xf32>
    %cst_44 = arith.constant 1.000000e+00 : f32
    %131 = vector.broadcast %cst_44 : f32 to vector<8x32xf32>
    %132 = arith.addf %124, %131 : vector<8x32xf32>
    %133 = arith.mulf %132, %126 : vector<8x32xf32>
    %134 = arith.addf %130, %133 : vector<8x32xf32>
    %cst_45 = arith.constant 5.000000e-01 : f32
    %135 = vector.broadcast %cst_45 : f32 to vector<8x32xf32>
    %136 = arith.mulf %135, %134 : vector<8x32xf32>
    %cst_46 = arith.constant 1.000000e+00 : f32
    %137 = vector.broadcast %cst_46 : f32 to vector<8x32xf32>
    %138 = arith.addf %127, %137 : vector<8x32xf32>
    %cst_47 = arith.constant 5.000000e-01 : f32
    %139 = vector.broadcast %cst_47 : f32 to vector<8x32xf32>
    %140 = arith.mulf %139, %138 : vector<8x32xf32>
    %141 = math.tanh %136 : vector<8x32xf32>
    %142 = arith.mulf %140, %141 : vector<8x32xf32>
    %143 = vector.shape_cast %18 : vector<8x1xi1> to vector<8x1xi1>
    %144 = vector.broadcast %143 : vector<8x1xi1> to vector<8x32xi1>
    %145 = arith.select %144, %142, %115 : vector<8x32xi1>, vector<8x32xf32>
    %146 = vector.shape_cast %18 : vector<8x1xi1> to vector<8x1xi1>
    %147 = vector.broadcast %146 : vector<8x1xi1> to vector<8x32xi1>
    %148 = arith.select %147, %136, %118 : vector<8x32xi1>, vector<8x32xf32>
    %c0_48 = arith.constant 0 : index
    %c4 = arith.constant 4 : index
    %c0_49 = arith.constant 0 : index
    %149 = vector.load %arg12[%c0_48, %c4, %c0_49] : memref<8x8x128xf32, #tpu.memory_space<vmem>>, vector<8x1x128xf32>
    %150 = vector.shape_cast %149 : vector<8x1x128xf32> to vector<8x128xf32>
    %cst_50 = arith.constant dense<0.000000e+00> : vector<8x128xf32>
    %151 = tpu.matmul %145, %1, %cst_50 {dimension_numbers = #tpu.dot_dimension_numbers<[1], [0], [0], [1], [0, 0, 1, 1], [], []>} : vector<8x32xf32>, vector<32x128xf32>, vector<8x128xf32> -> vector<8x128xf32>
    %152 = arith.addf %150, %151 : vector<8x128xf32>
    %153 = math.tanh %152 : vector<8x128xf32>
    %154 = vector.extract_strided_slice %153 {offsets = [0, 0], sizes = [8, 32], strides = [1, 1]} : vector<8x128xf32> to vector<8x32xf32>
    %155 = vector.extract_strided_slice %153 {offsets = [0, 32], sizes = [8, 32], strides = [1, 1]} : vector<8x128xf32> to vector<8x32xf32>
    %156 = vector.extract_strided_slice %153 {offsets = [0, 64], sizes = [8, 32], strides = [1, 1]} : vector<8x128xf32> to vector<8x32xf32>
    %157 = vector.extract_strided_slice %153 {offsets = [0, 96], sizes = [8, 32], strides = [1, 1]} : vector<8x128xf32> to vector<8x32xf32>
    %cst_51 = arith.constant 1.000000e+00 : f32
    %158 = vector.broadcast %cst_51 : f32 to vector<8x32xf32>
    %159 = arith.addf %155, %158 : vector<8x32xf32>
    %160 = arith.mulf %159, %148 : vector<8x32xf32>
    %cst_52 = arith.constant 1.000000e+00 : f32
    %161 = vector.broadcast %cst_52 : f32 to vector<8x32xf32>
    %162 = arith.addf %154, %161 : vector<8x32xf32>
    %163 = arith.mulf %162, %156 : vector<8x32xf32>
    %164 = arith.addf %160, %163 : vector<8x32xf32>
    %cst_53 = arith.constant 5.000000e-01 : f32
    %165 = vector.broadcast %cst_53 : f32 to vector<8x32xf32>
    %166 = arith.mulf %165, %164 : vector<8x32xf32>
    %cst_54 = arith.constant 1.000000e+00 : f32
    %167 = vector.broadcast %cst_54 : f32 to vector<8x32xf32>
    %168 = arith.addf %157, %167 : vector<8x32xf32>
    %cst_55 = arith.constant 5.000000e-01 : f32
    %169 = vector.broadcast %cst_55 : f32 to vector<8x32xf32>
    %170 = arith.mulf %169, %168 : vector<8x32xf32>
    %171 = math.tanh %166 : vector<8x32xf32>
    %172 = arith.mulf %170, %171 : vector<8x32xf32>
    %173 = vector.shape_cast %20 : vector<8x1xi1> to vector<8x1xi1>
    %174 = vector.broadcast %173 : vector<8x1xi1> to vector<8x32xi1>
    %175 = arith.select %174, %172, %145 : vector<8x32xi1>, vector<8x32xf32>
    %176 = vector.shape_cast %20 : vector<8x1xi1> to vector<8x1xi1>
    %177 = vector.broadcast %176 : vector<8x1xi1> to vector<8x32xi1>
    %178 = arith.select %177, %166, %148 : vector<8x32xi1>, vector<8x32xf32>
    %c0_56 = arith.constant 0 : index
    %c5 = arith.constant 5 : index
    %c0_57 = arith.constant 0 : index
    %179 = vector.load %arg12[%c0_56, %c5, %c0_57] : memref<8x8x128xf32, #tpu.memory_space<vmem>>, vector<8x1x128xf32>
    %180 = vector.shape_cast %179 : vector<8x1x128xf32> to vector<8x128xf32>
    %cst_58 = arith.constant dense<0.000000e+00> : vector<8x128xf32>
    %181 = tpu.matmul %175, %1, %cst_58 {dimension_numbers = #tpu.dot_dimension_numbers<[1], [0], [0], [1], [0, 0, 1, 1], [], []>} : vector<8x32xf32>, vector<32x128xf32>, vector<8x128xf32> -> vector<8x128xf32>
    %182 = arith.addf %180, %181 : vector<8x128xf32>
    %183 = math.tanh %182 : vector<8x128xf32>
    %184 = vector.extract_strided_slice %183 {offsets = [0, 0], sizes = [8, 32], strides = [1, 1]} : vector<8x128xf32> to vector<8x32xf32>
    %185 = vector.extract_strided_slice %183 {offsets = [0, 32], sizes = [8, 32], strides = [1, 1]} : vector<8x128xf32> to vector<8x32xf32>
    %186 = vector.extract_strided_slice %183 {offsets = [0, 64], sizes = [8, 32], strides = [1, 1]} : vector<8x128xf32> to vector<8x32xf32>
    %187 = vector.extract_strided_slice %183 {offsets = [0, 96], sizes = [8, 32], strides = [1, 1]} : vector<8x128xf32> to vector<8x32xf32>
    %cst_59 = arith.constant 1.000000e+00 : f32
    %188 = vector.broadcast %cst_59 : f32 to vector<8x32xf32>
    %189 = arith.addf %185, %188 : vector<8x32xf32>
    %190 = arith.mulf %189, %178 : vector<8x32xf32>
    %cst_60 = arith.constant 1.000000e+00 : f32
    %191 = vector.broadcast %cst_60 : f32 to vector<8x32xf32>
    %192 = arith.addf %184, %191 : vector<8x32xf32>
    %193 = arith.mulf %192, %186 : vector<8x32xf32>
    %194 = arith.addf %190, %193 : vector<8x32xf32>
    %cst_61 = arith.constant 5.000000e-01 : f32
    %195 = vector.broadcast %cst_61 : f32 to vector<8x32xf32>
    %196 = arith.mulf %195, %194 : vector<8x32xf32>
    %cst_62 = arith.constant 1.000000e+00 : f32
    %197 = vector.broadcast %cst_62 : f32 to vector<8x32xf32>
    %198 = arith.addf %187, %197 : vector<8x32xf32>
    %cst_63 = arith.constant 5.000000e-01 : f32
    %199 = vector.broadcast %cst_63 : f32 to vector<8x32xf32>
    %200 = arith.mulf %199, %198 : vector<8x32xf32>
    %201 = math.tanh %196 : vector<8x32xf32>
    %202 = arith.mulf %200, %201 : vector<8x32xf32>
    %203 = vector.shape_cast %22 : vector<8x1xi1> to vector<8x1xi1>
    %204 = vector.broadcast %203 : vector<8x1xi1> to vector<8x32xi1>
    %205 = arith.select %204, %202, %175 : vector<8x32xi1>, vector<8x32xf32>
    %206 = vector.shape_cast %22 : vector<8x1xi1> to vector<8x1xi1>
    %207 = vector.broadcast %206 : vector<8x1xi1> to vector<8x32xi1>
    %208 = arith.select %207, %196, %178 : vector<8x32xi1>, vector<8x32xf32>
    %c0_64 = arith.constant 0 : index
    %c6 = arith.constant 6 : index
    %c0_65 = arith.constant 0 : index
    %209 = vector.load %arg12[%c0_64, %c6, %c0_65] : memref<8x8x128xf32, #tpu.memory_space<vmem>>, vector<8x1x128xf32>
    %210 = vector.shape_cast %209 : vector<8x1x128xf32> to vector<8x128xf32>
    %cst_66 = arith.constant dense<0.000000e+00> : vector<8x128xf32>
    %211 = tpu.matmul %205, %1, %cst_66 {dimension_numbers = #tpu.dot_dimension_numbers<[1], [0], [0], [1], [0, 0, 1, 1], [], []>} : vector<8x32xf32>, vector<32x128xf32>, vector<8x128xf32> -> vector<8x128xf32>
    %212 = arith.addf %210, %211 : vector<8x128xf32>
    %213 = math.tanh %212 : vector<8x128xf32>
    %214 = vector.extract_strided_slice %213 {offsets = [0, 0], sizes = [8, 32], strides = [1, 1]} : vector<8x128xf32> to vector<8x32xf32>
    %215 = vector.extract_strided_slice %213 {offsets = [0, 32], sizes = [8, 32], strides = [1, 1]} : vector<8x128xf32> to vector<8x32xf32>
    %216 = vector.extract_strided_slice %213 {offsets = [0, 64], sizes = [8, 32], strides = [1, 1]} : vector<8x128xf32> to vector<8x32xf32>
    %217 = vector.extract_strided_slice %213 {offsets = [0, 96], sizes = [8, 32], strides = [1, 1]} : vector<8x128xf32> to vector<8x32xf32>
    %cst_67 = arith.constant 1.000000e+00 : f32
    %218 = vector.broadcast %cst_67 : f32 to vector<8x32xf32>
    %219 = arith.addf %215, %218 : vector<8x32xf32>
    %220 = arith.mulf %219, %208 : vector<8x32xf32>
    %cst_68 = arith.constant 1.000000e+00 : f32
    %221 = vector.broadcast %cst_68 : f32 to vector<8x32xf32>
    %222 = arith.addf %214, %221 : vector<8x32xf32>
    %223 = arith.mulf %222, %216 : vector<8x32xf32>
    %224 = arith.addf %220, %223 : vector<8x32xf32>
    %cst_69 = arith.constant 5.000000e-01 : f32
    %225 = vector.broadcast %cst_69 : f32 to vector<8x32xf32>
    %226 = arith.mulf %225, %224 : vector<8x32xf32>
    %cst_70 = arith.constant 1.000000e+00 : f32
    %227 = vector.broadcast %cst_70 : f32 to vector<8x32xf32>
    %228 = arith.addf %217, %227 : vector<8x32xf32>
    %cst_71 = arith.constant 5.000000e-01 : f32
    %229 = vector.broadcast %cst_71 : f32 to vector<8x32xf32>
    %230 = arith.mulf %229, %228 : vector<8x32xf32>
    %231 = math.tanh %226 : vector<8x32xf32>
    %232 = arith.mulf %230, %231 : vector<8x32xf32>
    %233 = vector.shape_cast %24 : vector<8x1xi1> to vector<8x1xi1>
    %234 = vector.broadcast %233 : vector<8x1xi1> to vector<8x32xi1>
    %235 = arith.select %234, %232, %205 : vector<8x32xi1>, vector<8x32xf32>
    %236 = vector.shape_cast %24 : vector<8x1xi1> to vector<8x1xi1>
    %237 = vector.broadcast %236 : vector<8x1xi1> to vector<8x32xi1>
    %238 = arith.select %237, %226, %208 : vector<8x32xi1>, vector<8x32xf32>
    %c0_72 = arith.constant 0 : index
    %c7 = arith.constant 7 : index
    %c0_73 = arith.constant 0 : index
    %239 = vector.load %arg12[%c0_72, %c7, %c0_73] : memref<8x8x128xf32, #tpu.memory_space<vmem>>, vector<8x1x128xf32>
    %240 = vector.shape_cast %239 : vector<8x1x128xf32> to vector<8x128xf32>
    %cst_74 = arith.constant dense<0.000000e+00> : vector<8x128xf32>
    %241 = tpu.matmul %235, %1, %cst_74 {dimension_numbers = #tpu.dot_dimension_numbers<[1], [0], [0], [1], [0, 0, 1, 1], [], []>} : vector<8x32xf32>, vector<32x128xf32>, vector<8x128xf32> -> vector<8x128xf32>
    %242 = arith.addf %240, %241 : vector<8x128xf32>
    %243 = math.tanh %242 : vector<8x128xf32>
    %244 = vector.extract_strided_slice %243 {offsets = [0, 0], sizes = [8, 32], strides = [1, 1]} : vector<8x128xf32> to vector<8x32xf32>
    %245 = vector.extract_strided_slice %243 {offsets = [0, 32], sizes = [8, 32], strides = [1, 1]} : vector<8x128xf32> to vector<8x32xf32>
    %246 = vector.extract_strided_slice %243 {offsets = [0, 64], sizes = [8, 32], strides = [1, 1]} : vector<8x128xf32> to vector<8x32xf32>
    %247 = vector.extract_strided_slice %243 {offsets = [0, 96], sizes = [8, 32], strides = [1, 1]} : vector<8x128xf32> to vector<8x32xf32>
    %cst_75 = arith.constant 1.000000e+00 : f32
    %248 = vector.broadcast %cst_75 : f32 to vector<8x32xf32>
    %249 = arith.addf %245, %248 : vector<8x32xf32>
    %250 = arith.mulf %249, %238 : vector<8x32xf32>
    %cst_76 = arith.constant 1.000000e+00 : f32
    %251 = vector.broadcast %cst_76 : f32 to vector<8x32xf32>
    %252 = arith.addf %244, %251 : vector<8x32xf32>
    %253 = arith.mulf %252, %246 : vector<8x32xf32>
    %254 = arith.addf %250, %253 : vector<8x32xf32>
    %cst_77 = arith.constant 5.000000e-01 : f32
    %255 = vector.broadcast %cst_77 : f32 to vector<8x32xf32>
    %256 = arith.mulf %255, %254 : vector<8x32xf32>
    %cst_78 = arith.constant 1.000000e+00 : f32
    %257 = vector.broadcast %cst_78 : f32 to vector<8x32xf32>
    %258 = arith.addf %247, %257 : vector<8x32xf32>
    %cst_79 = arith.constant 5.000000e-01 : f32
    %259 = vector.broadcast %cst_79 : f32 to vector<8x32xf32>
    %260 = arith.mulf %259, %258 : vector<8x32xf32>
    %261 = math.tanh %256 : vector<8x32xf32>
    %262 = arith.mulf %260, %261 : vector<8x32xf32>
    %263 = vector.shape_cast %26 : vector<8x1xi1> to vector<8x1xi1>
    %264 = vector.broadcast %263 : vector<8x1xi1> to vector<8x32xi1>
    %265 = arith.select %264, %262, %235 : vector<8x32xi1>, vector<8x32xf32>
    %c0_80 = arith.constant 0 : index
    %c0_81 = arith.constant 0 : index
    %266 = vector.load %arg5[%c0_80, %c0_81] : memref<32x32xf32, #tpu.memory_space<vmem>>, vector<32x32xf32>
    %cst_82 = arith.constant dense<0.000000e+00> : vector<8x32xf32>
    %267 = tpu.matmul %265, %266, %cst_82 {dimension_numbers = #tpu.dot_dimension_numbers<[1], [0], [0], [1], [0, 0, 1, 1], [], []>} : vector<8x32xf32>, vector<32x32xf32>, vector<8x32xf32> -> vector<8x32xf32>
    %c0_83 = arith.constant 0 : index
    %c0_84 = arith.constant 0 : index
    %268 = vector.load %arg6[%c0_83, %c0_84] : memref<1x32xf32, #tpu.memory_space<vmem>>, vector<1x32xf32>
    %269 = vector.broadcast %268 : vector<1x32xf32> to vector<8x32xf32>
    %270 = arith.addf %267, %269 : vector<8x32xf32>
    %cst_85 = arith.constant 0.000000e+00 : f32
    %271 = vector.broadcast %cst_85 : f32 to vector<8x32xf32>
    %272 = arith.maximumf %270, %271 : vector<8x32xf32>
    %c0_86 = arith.constant 0 : index
    %c0_87 = arith.constant 0 : index
    %273 = vector.load %arg7[%c0_86, %c0_87] : memref<32x16xf32, #tpu.memory_space<vmem>>, vector<32x16xf32>
    %cst_88 = arith.constant dense<0.000000e+00> : vector<8x16xf32>
    %274 = tpu.matmul %272, %273, %cst_88 {dimension_numbers = #tpu.dot_dimension_numbers<[1], [0], [0], [1], [0, 0, 1, 1], [], []>} : vector<8x32xf32>, vector<32x16xf32>, vector<8x16xf32> -> vector<8x16xf32>
    %c0_89 = arith.constant 0 : index
    %c0_90 = arith.constant 0 : index
    %275 = vector.load %arg8[%c0_89, %c0_90] : memref<1x16xf32, #tpu.memory_space<vmem>>, vector<1x16xf32>
    %276 = vector.broadcast %275 : vector<1x16xf32> to vector<8x16xf32>
    %277 = arith.addf %274, %276 : vector<8x16xf32>
    %cst_91 = arith.constant 0.000000e+00 : f32
    %278 = vector.broadcast %cst_91 : f32 to vector<8x16xf32>
    %279 = arith.maximumf %277, %278 : vector<8x16xf32>
    %c0_92 = arith.constant 0 : index
    %c0_93 = arith.constant 0 : index
    %280 = vector.load %arg9[%c0_92, %c0_93] : memref<16x3xf32, #tpu.memory_space<vmem>>, vector<16x3xf32>
    %cst_94 = arith.constant dense<0.000000e+00> : vector<8x3xf32>
    %281 = tpu.matmul %279, %280, %cst_94 {dimension_numbers = #tpu.dot_dimension_numbers<[1], [0], [0], [1], [0, 0, 1, 1], [], []>} : vector<8x16xf32>, vector<16x3xf32>, vector<8x3xf32> -> vector<8x3xf32>
    %c0_95 = arith.constant 0 : index
    %c0_96 = arith.constant 0 : index
    %282 = vector.load %arg10[%c0_95, %c0_96] : memref<1x3xf32, #tpu.memory_space<vmem>>, vector<1x3xf32>
    %283 = vector.broadcast %282 : vector<1x3xf32> to vector<8x3xf32>
    %284 = arith.addf %281, %283 : vector<8x3xf32>
    %285 = arith.negf %284 : vector<8x3xf32>
    %286 = math.exp %285 : vector<8x3xf32>
    %cst_97 = arith.constant 1.000000e+00 : f32
    %287 = vector.broadcast %cst_97 : f32 to vector<8x3xf32>
    %288 = arith.addf %287, %286 : vector<8x3xf32>
    %289 = arith.divf %287, %288 : vector<8x3xf32>
    %c0_98 = arith.constant 0 : index
    %c0_99 = arith.constant 0 : index
    %290 = vector.load %arg11[%c0_98, %c0_99] : memref<8x3xf32, #tpu.memory_space<vmem>>, vector<8x3xf32>
    tpu.vector_store %arg11[%c0_98, %c0_99], %289 {strides = array<i32>} : memref<8x3xf32, #tpu.memory_space<vmem>>, vector<8x3xf32>,
    return
  }
}

</mosaic_0001>

<bundles_post_ra>
// kernel: combonn_video_pre_forward.1
= control target key start
LH: loop header
LB: loop body
LE: loop exit
PB: predicated region body
PF: predicated region fallthrough
CT: control target
= control target key end

     0   :  { %vm61_vm0 = vcmask 146432   ;;  %v3883_v2 = vmov 0.0|0.0   ;;  %vm3884_vm1 = vmmov 0   ;;  %v3885_v6 = vmov 0.0   ;;  %s3889_s30 = smov 96   ;;  %s4950_s2 = inlined_call_operand.vmem [shape: f32[18,128], index: 2, kind: input, shape index: {}]   ;;  %s4951_s0 = inlined_call_operand.vmem [shape: f32[8,8,18], index: 0, kind: input, shape index: {}]   ;;  %s4952_s3 = inlined_call_operand.vmem [shape: f32[32,128], index: 3, kind: input, shape index: {}]   ;;  %s4953_s4 = inlined_call_operand.vmem [shape: f32[1,128], index: 4, kind: input, shape index: {}]   ;;  %s4954_s1 = inlined_call_operand.vmem [shape: s32[8,1], index: 1, kind: input, shape index: {}]   ;;  %s4955_s5 = inlined_call_operand.vmem [shape: f32[32,32], index: 5, kind: input, shape index: {}]   ;;  %s4956_s7 = inlined_call_operand.vmem [shape: f32[32,16], index: 7, kind: input, shape index: {}]   ;;  %s4957_s6 = inlined_call_operand.vmem [shape: f32[1,32], index: 6, kind: input, shape index: {}]   ;;  %s4958_s9 = inlined_call_operand.vmem [shape: f32[16,3], index: 9, kind: input, shape index: {}]   ;;  %s4959_s8 = inlined_call_operand.vmem [shape: f32[1,16], index: 8, kind: input, shape index: {}]   ;;  %s4960_s10 = inlined_call_operand.vmem [shape: f32[1,3], index: 10, kind: input, shape index: {}]   ;;  %s4961_s11 = inlined_call_operand.vmem [shape: f32[8,3], index: 11, kind: output, shape index: {}]  }
   0x1   :  { %v38_v0 = vld [vmem:[%s4950_s2] sm:$0xff]  ;;  %v39_v1 = vld [vmem:[%s4950_s2 + $0x8] sm:$0xff]  ;;  %3549 = vmatprep.subr.bf16.mxu1 %v3883_v2  ;;  %3436 = vmatprep.mubr.msk.f32.mxu1 %vm3884_vm1, %v3885_v6  ;;  %v40_v7 = vld [vmem:[%s4950_s2 + $0x10] sm:$0x3]  ;;  %vm86_vm2 = vcmask 1041408   ;;  %vm499_vm3 = vcmask 1041409  }
   0x2   :  { %v3545_v3 = vpack.c.bf16 %v39_v1, %v38_v0  ;;  %v47_v4 = vld [vmem:[%s4951_s0] sm:$0xff]  ;;  %v42_v8 = vld [vmem:[%s4952_s3 + $0x8] sm:$0xff]  ;;  %v43_v10 = vld [vmem:[%s4952_s3 + $0x10] sm:$0xff]  ;;  %vm502_vm4 = vcmask 1042434   ;;  %vm505_vm5 = vcmask 1043459   ;;  %vm508_vm6 = vcmask 1044484  }
   0x3   :  { %v41_v5 = vld [vmem:[%s4952_s3] sm:$0xff]  ;;  %3416 = vmatprep.mubr.msk.f32.mxu0 %vm61_vm0, %v47_v4  ;;  %v44_v11 = vld [vmem:[%s4952_s3 + $0x18] sm:$0xff]  ;;  %v48_v13 = vld [vmem:[%s4951_s0 + $0x8] sm:$0xff]  ;;  %vm511_vm7 = vcmask 1045509   ;;  %vm514_vm8 = vcmask 1046534   ;;  %vm517_vm9 = vcmask 1047559  }
   0x4   :  { %3546 = vmatprep.subr.bf16.mxu0 %v3545_v3  ;;  %v3972_v9 = vpack.c.bf16 %v42_v8, %v41_v5  ;;  %v3981_v12 = vpack.c.bf16 %v44_v11, %v43_v10  ;;  %v49_v14 = vld [vmem:[%s4951_s0 + $0x10] sm:$0xff]  ;;  %v50_v15 = vld [vmem:[%s4951_s0 + $0x18] sm:$0xff]  ;;  %v51_v16 = vld [vmem:[%s4951_s0 + $0x20] sm:$0xff]  ;;  %vm219_vm12 = vcmask 261120  }
   0x5   :  { %3548 = vmatpush3.bf16.msra.mxu0 %v3545_v3  ;;  %v52_v17 = vld [vmem:[%s4951_s0 + $0x28] sm:$0xff]  ;;  %v53_v18 = vld [vmem:[%s4951_s0 + $0x30] sm:$0xff]  ;;  %v54_v19 = vld [vmem:[%s4951_s0 + $0x38] sm:$0xff]  ;;  %s3886_s0 = smov 64  }
   0x6   :  { %3414 = vmatprep.subr.msk.mxu0 %vm86_vm2, %v40_v7  ;;  %3551 = vmatpush3.bf16.msra.mxu1 %v3972_v9  ;;  %v3322_v20 = vld [vmem:[%s4953_s4] ss:$0 sm:$0xff]  ;;  %s3887_s4 = smov 32  }
   0x7   :  { %3552 = vmatprep.subr.bf16.mxu1 %v3883_v2 }
   0x9   :  { %3415 = vmatpush3.msk.msra.mxu0 %vm86_vm2, %v40_v7 }
   0xa   :  { %3417 = vmatmul.mubr.msk.f32.vlgmr.msra.gmra.mrb[0].mxu0 %vm61_vm0, %v48_v13  ;;  %3554 = vmatpush3.bf16.msra.mxu1 %v3981_v12 }
   0xb   :  { %3419 = vmatprep.mubr.msk.f32.mxu0 %vm61_vm0, %v49_v14  ;;  %3555 = vmatprep.subr.bf16.mxu1 %v3883_v2 }
   0xc   :  { %3561 = vmatprep.subr.bf16.mxu0 %v3883_v2 }
   0xd   :  { %3437 = vmatmul.mubr.f32.vlgmr.msra.gmra.mrb[0].mxu1 %v3885_v6  ;;  %3563 = vmatpush3.bf16.msra.mxu0 %v3972_v9 }
   0xe   :  { %3420 = vmatmul.mubr.msk.f32.gmra.mrb[2].mxu0 %vm61_vm0, %v50_v15  ;;  %3557 = vmatpush3.bf16.msra.mxu1 %v3972_v9 }
   0xf   :  { %3422 = vmatprep.mubr.msk.f32.mxu0 %vm61_vm0, %v51_v16  ;;  %3558 = vmatprep.subr.bf16.mxu1 %v3883_v2 }
  0x10   :  { %3447 = vmatprep.mubr.msk.f32.mxu1 %vm3884_vm1, %v3885_v6  ;;  %3564 = vmatprep.subr.bf16.mxu0 %v3883_v2 }
  0x11   :  { %3566 = vmatpush3.bf16.msra.mxu0 %v3981_v12 }
  0x12   :  { %3423 = vmatmul.mubr.msk.f32.gmra.mrb[4].mxu0 %vm61_vm0, %v52_v17  ;;  %3560 = vmatpush3.bf16.msra.mxu1 %v3981_v12 }
  0x13   :  { %3425 = vmatprep.mubr.msk.f32.mxu0 %vm61_vm0, %v53_v18  ;;  %3567 = vmatprep.subr.bf16.mxu1 %v3883_v2 }
  0x14   :  { %3573 = vmatprep.subr.bf16.mxu0 %v3883_v2 }
  0x16   :  { %3426 = vmatmul.mubr.msk.f32.gmra.mrb[6].mxu0 %vm61_vm0, %v54_v19 }
  0x17   :  { %3458 = vmatprep.mubr.msk.f32.mxu0 %vm3884_vm1, %v3885_v6 }
  0xdd   :  { %v3418_v21 = vpop.f32.mrb[0].mxu0 }
  0xde   :  { %v162_v22 = vadd.f32 %v3418_v21, %v3322_v20  ;;  %v156_v23 = vpop.f32.mrb[1].mxu0 }
  0xdf   :  { %v157_v24 = vadd.f32 %v3322_v20, %v156_v23 }
  0xe0   :  { %196 = vst [vmem:[#allocation2 + $0x8] sm:$0xff] %v162_v22  ;;  %v289_v25 = vpop.f32.mrb[0].mxu1 }
  0xe1   :  { %195 = vst [vmem:[#allocation2] sm:$0xff] %v157_v24  ;;  %v3421_v26 = vpop.f32.mrb[2].mxu0  ;;  %v3438_v27 = vpop.f32.mrb[1].mxu1  ;;  %v294_v31 = vrot.slane %v289_v25, 1  ;;  %v296_v37 = vrot.slane %v289_v25, 3  ;;  %v295_v45 = vrot.slane %v289_v25, 2 }
  0xe2   :  { %v172_v28 = vadd.f32 %v3421_v26, %v3322_v20  ;;  %v166_v29 = vpop.f32.mrb[3].mxu0  ;;  %v298_v50 = vrot.slane %v289_v25, 5  ;;  %v297_v52 = vrot.slane %v289_v25, 4  ;;  %v300_v56 = vrot.slane %v289_v25, 7 }
  0xe3   :  { %v167_v30 = vadd.f32 %v3322_v20, %v166_v29  ;;  %v299_v57 = vrot.slane %v289_v25, 6 }
  0xe4   :  { %198 = vst [vmem:[#allocation2 + $0x18] sm:$0xff] %v172_v28 }
  0xe5   :  { %197 = vst [vmem:[#allocation2 + $0x10] sm:$0xff] %v167_v30  ;;  %v3424_v32 = vpop.f32.mrb[4].mxu0 }
  0xe6   :  { %v182_v33 = vadd.f32 %v3424_v32, %v3322_v20  ;;  %v176_v34 = vpop.f32.mrb[5].mxu0 }
  0xe7   :  { %v177_v35 = vadd.f32 %v3322_v20, %v176_v34  ;;  %v212_v36 = vld [vmem:[#allocation2 + $0x8] sm:$0x1] }
  0xe8   :  { %200 = vst [vmem:[#allocation2 + $0x28] sm:$0xff] %v182_v33  ;;  %v310_v38 = vadd.f32 %v294_v31, %v212_v36  ;;  %v211_v39 = vld [vmem:[#allocation2] sm:$0x1] }
  0xe9   :  { %199 = vst [vmem:[#allocation2 + $0x20] sm:$0xff] %v177_v35  ;;  %v3427_v40 = vpop.f32.mrb[6].mxu0  ;;  %v309_v41 = vadd.f32 %v289_v25, %v211_v39 }
  0xea   :  { %v192_v42 = vadd.f32 %v3427_v40, %v3322_v20  ;;  %v186_v43 = vpop.f32.mrb[7].mxu0  ;;  %3621 = vtanh.f32 %v310_v38 }
  0xeb   :  { %v214_v44 = vld [vmem:[#allocation2 + $0x18] sm:$0x1]  ;;  %v187_v46 = vadd.f32 %v3322_v20, %v186_v43  ;;  %3623 = vtanh.f32 %v309_v41 }
  0xec   :  { %v213_v47 = vld [vmem:[#allocation2 + $0x10] sm:$0x1]  ;;  %v312_v48 = vadd.f32 %v296_v37, %v214_v44  ;;  %202 = vst [vmem:[#allocation2 + $0x38] sm:$0xff] %v192_v42 }
  0xed   :  { %v311_v49 = vadd.f32 %v295_v45, %v213_v47  ;;  %201 = vst [vmem:[#allocation2 + $0x30] sm:$0xff] %v187_v46 }
  0xee   :  { %3625 = vtanh.f32 %v312_v48 }
  0xef   :  { %v216_v51 = vld [vmem:[#allocation2 + $0x28] sm:$0x1]  ;;  %3627 = vtanh.f32 %v311_v49 }
  0xf0   :  { %v314_v53 = vadd.f32 %v298_v50, %v216_v51  ;;  %v215_v54 = vld [vmem:[#allocation2 + $0x20] sm:$0x1] }
  0xf1   :  { %v313_v55 = vadd.f32 %v297_v52, %v215_v54 }
  0xf2   :  { %3629 = vtanh.f32 %v314_v53 }
  0xf3   :  { %3631 = vtanh.f32 %v313_v55  ;;  %v218_v58 = vld [vmem:[#allocation2 + $0x38] sm:$0x1] }
  0xf4   :  { %v3622_v59 = vpop.eup %3621  ;;  %v217_v60 = vld [vmem:[#allocation2 + $0x30] sm:$0x1]  ;;  %v316_v61 = vadd.f32 %v300_v56, %v218_v58 }
  0xf5   :  { %v3624_v62 = vpop.eup %3623  ;;  %351 = vrot.lane.b32.xlu0 %v3622_v59, %s3886_s0  ;;  %v315_v63 = vadd.f32 %v299_v57, %v217_v60  ;;  %v4039_v8 = vadd.f32 1.0, %v3622_v59  ;;  %v3888_v57 = vmov 0  }
  0xf6   :  { %349 = vrot.lane.b32.xlu1 %v3624_v62, %s3886_s0  ;;  %3633 = vtanh.f32 %v316_v61  ;;  %v4042_v14 = vadd.f32 1.0, %v3624_v62  ;;  %3619 = vset.pattern.permute.xlu0 %v3888_v57 }
  0xf7   :  { %3635 = vtanh.f32 %v315_v63  ;;  %v334_v34 = vmul.f32 0.0, %v4039_v8  ;;  %3620 = vset.pattern.permute.xlu1 %v3888_v57 }
  0xf8   :  { %v3626_v0 = vpop.eup %3625  ;;  %v333_v38 = vmul.f32 0.0, %v4042_v14 }
  0xf9   :  { %v3628_v1 = vpop.eup %3627  ;;  %v4045_v15 = vadd.f32 1.0, %v3626_v0 }
  0xfa   :  { %353 = vrot.lane.b32.xlu0 %v3628_v1, %s3886_s0  ;;  %355 = vrot.lane.b32.xlu1 %v3626_v0, %s3886_s0  ;;  %v4050_v20 = vadd.f32 1.0, %v3628_v1 }
  0xfb   :  { %v336_v40 = vmul.f32 0.0, %v4045_v15 }
  0xfc   :  { %v3630_v3 = vpop.eup %3629  ;;  %v335_v47 = vmul.f32 0.0, %v4050_v20 }
  0xfd   :  { %v3632_v4 = vpop.eup %3631  ;;  %v4057_v26 = vadd.f32 1.0, %v3630_v3 }
  0xfe   :  { %357 = vrot.lane.b32.xlu0 %v3632_v4, %s3886_s0  ;;  %359 = vrot.lane.b32.xlu1 %v3630_v3, %s3886_s0  ;;  %v4053_v21 = vadd.f32 1.0, %v3632_v4 }
  0xff   :  { %v338_v56 = vmul.f32 0.0, %v4057_v26 }
 0x100   :  { %v3634_v5 = vpop.eup %3633  ;;  %v337_v48 = vmul.f32 0.0, %v4053_v21 }
 0x101   :  { %v3636_v7 = vpop.eup %3635  ;;  %v4065_v32 = vadd.f32 1.0, %v3634_v5 }
 0x102   :  { %361 = vrot.lane.b32.xlu0 %v3636_v7, %s3886_s0  ;;  %363 = vrot.lane.b32.xlu1 %v3634_v5, %s3886_s0  ;;  %v4061_v27 = vadd.f32 1.0, %v3636_v7 }
 0x103   :  { %v340_v7 = vmul.f32 0.0, %v4065_v32 }
 0x104   :  { %v339_v59 = vmul.f32 0.0, %v4061_v27 }
 0x167   :  { %v352_v10 = vpop.permute.xlu0 %351 }
 0x168   :  { %v374_v11 = vmul.f32 %v352_v10, %v4039_v8  ;;  %v350_v13 = vpop.permute.xlu1 %349 }
 0x169   :  { %v373_v16 = vmul.f32 %v350_v13, %v4042_v14 }
 0x16a   :  { %391 = vrot.lane.b32.xlu0 %v374_v11, %s3887_s4 }
 0x16c   :  { %v354_v17 = vpop.permute.xlu0 %353  ;;  %v356_v18 = vpop.permute.xlu1 %355 }
 0x16d   :  { %v376_v19 = vmul.f32 %v356_v18, %v4045_v15  ;;  %v375_v24 = vmul.f32 %v354_v17, %v4050_v20 }
 0x16e   :  { %389 = vrot.lane.b32.xlu0 %v373_v16, %s3887_s4 }
 0x16f   :  { %395 = vrot.lane.b32.xlu1 %v376_v19, %s3887_s4 }
 0x170   :  { %v358_v22 = vpop.permute.xlu0 %357  ;;  %v360_v23 = vpop.permute.xlu1 %359 }
 0x171   :  { %v377_v25 = vmul.f32 %v358_v22, %v4053_v21  ;;  %v378_v29 = vmul.f32 %v360_v23, %v4057_v26 }
 0x173   :  { %393 = vrot.lane.b32.xlu1 %v375_v24, %s3887_s4  ;;  %397 = vrot.lane.b32.xlu0 %v377_v25, %s3887_s4 }
 0x174   :  { %v362_v28 = vpop.permute.xlu0 %361  ;;  %v364_v31 = vpop.permute.xlu1 %363 }
 0x175   :  { %v379_v30 = vmul.f32 %v362_v28, %v4061_v27  ;;  %v380_v33 = vmul.f32 %v364_v31, %v4065_v32 }
 0x177   :  { %399 = vrot.lane.b32.xlu1 %v378_v29, %s3887_s4  ;;  %401 = vrot.lane.b32.xlu0 %v379_v30, %s3887_s4 }
 0x17b   :  { %403 = vrot.lane.b32.xlu1 %v380_v33, %s3887_s4 }
 0x1dc   :  { %v392_v35 = vpop.permute.xlu0 %391 }
 0x1dd   :  { %v414_v36 = vadd.f32 %v392_v35, %v334_v34  ;;  %v4095_v34 = vld [vmem:[%s4954_s1] sm:$0xff] }
 0x1de   :  { %vm203_vm10 = vcmp.gt.s32.totalorder %v4095_v34, 0  ;;  %vm204_vm13 = vcmp.gt.s32.totalorder %v4095_v34, 1  ;;  %vm205_vm15 = vcmp.gt.s32.totalorder %v4095_v34, 2 }
 0x1df   :  { %v422_v37 = vmul.f32 0.5, %v414_v36 }
 0x1e0   :  { %v390_v39 = vpop.permute.xlu0 %389 }
 0x1e1   :  { %3637 = vtanh.f32 %v422_v37  ;;  %v413_v41 = vadd.f32 %v390_v39, %v333_v38  ;;  %v396_v42 = vpop.permute.xlu1 %395  ;;  %v531_v44 = vrot.slane %v422_v37, 7  ;;  %v485_v37 = vsel %vm203_vm10, 1, %v3888_v57 }
 0x1e2   :  { %v416_v43 = vadd.f32 %v396_v42, %v336_v40 }
 0x1e3   :  { %v421_v45 = vmul.f32 0.5, %v413_v41  ;;  %v430_v41 = vmul.f32 0.5, %v4039_v8  ;;  %v434_v8 = vmul.f32 0.5, %v4057_v26 }
 0x1e4   :  { %v424_v46 = vmul.f32 0.5, %v416_v43 }
 0x1e5   :  { %3639 = vtanh.f32 %v421_v45  ;;  %v532_v49 = vsel %vm499_vm3, %v531_v44, %v421_v45  ;;  %v394_v50 = vpop.permute.xlu1 %393  ;;  %v398_v51 = vpop.permute.xlu0 %397  ;;  %v429_v44 = vmul.f32 0.5, %v4042_v14  ;;  %v432_v45 = vmul.f32 0.5, %v4045_v15 }
 0x1e6   :  { %3641 = vtanh.f32 %v424_v46  ;;  %v415_v52 = vadd.f32 %v394_v50, %v335_v47  ;;  %v417_v53 = vadd.f32 %v398_v51, %v337_v48  ;;  %v535_v0 = vrot.slane %v424_v46, 5 }
 0x1e7   :  { %v431_v46 = vmul.f32 0.5, %v4050_v20  ;;  %v433_v50 = vmul.f32 0.5, %v4053_v21  ;;  %v435_v15 = vmul.f32 0.5, %v4061_v27 }
 0x1e8   :  { %v423_v54 = vmul.f32 0.5, %v415_v52  ;;  %v425_v55 = vmul.f32 0.5, %v417_v53 }
 0x1e9   :  { %v400_v58 = vpop.permute.xlu1 %399  ;;  %v402_v60 = vpop.permute.xlu0 %401 }
 0x1ea   :  { %3643 = vtanh.f32 %v423_v54  ;;  %v533_v61 = vrot.slane %v423_v54, 6  ;;  %v418_v62 = vadd.f32 %v400_v58, %v338_v56  ;;  %v419_v1 = vadd.f32 %v402_v60, %v339_v59 }
 0x1eb   :  { %v3638_v63 = vpop.eup %3637  ;;  %3645 = vtanh.f32 %v425_v55  ;;  %v537_v4 = vrot.slane %v425_v55, 4 }
 0x1ec   :  { %v534_v3 = vsel %vm502_vm4, %v533_v61, %v532_v49  ;;  %v426_v5 = vmul.f32 0.5, %v418_v62  ;;  %455 = vrot.lane.b32.xlu0 %v3638_v63, %s3886_s0  ;;  %v427_v10 = vmul.f32 0.5, %v419_v1  ;;  %v436_v1 = vmul.f32 0.5, %v4065_v32 }
 0x1ed   :  { %v404_v11 = vpop.permute.xlu1 %403  ;;  %v536_v13 = vsel %vm505_vm5, %v535_v0, %v534_v3 }
 0x1ee   :  { %3647 = vtanh.f32 %v426_v5  ;;  %v539_v16 = vrot.slane %v426_v5, 3  ;;  %v420_v17 = vadd.f32 %v404_v11, %v340_v7  ;;  %v538_v18 = vsel %vm508_vm6, %v537_v4, %v536_v13 }
 0x1ef   :  { %v3640_v19 = vpop.eup %3639  ;;  %3649 = vtanh.f32 %v427_v10  ;;  %v541_v22 = vrot.slane %v427_v10, 2 }
 0x1f0   :  { %v3642_v23 = vpop.eup %3641  ;;  %v428_v24 = vmul.f32 0.5, %v420_v17  ;;  %453 = vrot.lane.b32.xlu0 %v3640_v19, %s3886_s0  ;;  %v540_v25 = vsel %vm511_vm7, %v539_v16, %v538_v18  ;;  %v549_v17 = vld [vmem:[#allocation2 + $0x1] sm:$0x1] }
 0x1f1   :  { %459 = vrot.lane.b32.xlu1 %v3642_v23, %s3886_s0  ;;  %v542_v28 = vsel %vm514_vm8, %v541_v22, %v540_v25  ;;  %v551_v23 = vld [vmem:[#allocation2 + $0x11] sm:$0x1] }
 0x1f2   :  { %3651 = vtanh.f32 %v428_v24  ;;  %v543_v29 = vrot.slane %v428_v24, 1 }
 0x1f4   :  { %v3644_v30 = vpop.eup %3643  ;;  %v544_v31 = vsel %vm517_vm9, %v543_v29, %v542_v28  ;;  %v550_v28 = vld [vmem:[#allocation2 + $0x9] sm:$0x1] }
 0x1f5   :  { %v3646_v33 = vpop.eup %3645  ;;  %457 = vrot.lane.b32.xlu1 %v3644_v30, %s3886_s0 }
 0x1f6   :  { %461 = vrot.lane.b32.xlu0 %v3646_v33, %s3886_s0  ;;  %v552_v33 = vld [vmem:[#allocation2 + $0x19] sm:$0x1] }
 0x1f8   :  { %v3648_v35 = vpop.eup %3647 }
 0x1f9   :  { %v3650_v36 = vpop.eup %3649  ;;  %463 = vrot.lane.b32.xlu1 %v3648_v35, %s3886_s0 }
 0x1fa   :  { %465 = vrot.lane.b32.xlu0 %v3650_v36, %s3886_s0 }
 0x1fc   :  { %v3652_v38 = vpop.eup %3651 }
 0x1fd   :  { %467 = vrot.lane.b32.xlu1 %v3652_v38, %s3886_s0 }
 0x1fe   :  { %487 = vperm.xlu0 %3619, %v485_v37   ;;  %v553_v37 = vld [vmem:[#allocation2 + $0x21] sm:$0x1] }
 0x25e   :  { %v456_v39 = vpop.permute.xlu0 %455 }
 0x25f   :  { %v478_v43 = vmul.f32 %v456_v39, %v430_v41 }
 0x261   :  { %v498_v53 = vrot.slane %v478_v43, 7  ;;  %v555_v43 = vld [vmem:[#allocation2 + $0x31] sm:$0x1] }
 0x262   :  { %v454_v40 = vpop.permute.xlu0 %453 }
 0x263   :  { %v460_v42 = vpop.permute.xlu1 %459  ;;  %v477_v47 = vmul.f32 %v454_v40, %v429_v44  ;;  %v554_v40 = vld [vmem:[#allocation2 + $0x29] sm:$0x1] }
 0x264   :  { %v480_v48 = vmul.f32 %v460_v42, %v432_v45  ;;  %v556_v45 = vld [vmem:[#allocation2 + $0x39] sm:$0x1] }
 0x265   :  { %v500_v56 = vsel %vm499_vm3, %v498_v53, %v477_v47 }
 0x266   :  { %v504_v58 = vrot.slane %v480_v48, 5 }
 0x267   :  { %v458_v49 = vpop.permute.xlu1 %457 }
 0x268   :  { %v479_v51 = vmul.f32 %v458_v49, %v431_v46  ;;  %v462_v52 = vpop.permute.xlu0 %461 }
 0x269   :  { %v481_v54 = vmul.f32 %v462_v52, %v433_v50 }
 0x26a   :  { %v501_v55 = vrot.slane %v479_v51, 6 }
 0x26b   :  { %v464_v14 = vpop.permute.xlu1 %463  ;;  %v507_v59 = vrot.slane %v481_v54, 4 }
 0x26c   :  { %v503_v20 = vsel %vm502_vm4, %v501_v55, %v500_v56  ;;  %v482_v60 = vmul.f32 %v464_v14, %v434_v8  ;;  %v466_v61 = vpop.permute.xlu0 %465 }
 0x26d   :  { %v506_v21 = vsel %vm505_vm5, %v504_v58, %v503_v20  ;;  %v483_v62 = vmul.f32 %v466_v61, %v435_v15 }
 0x26e   :  { %v509_v63 = vsel %vm508_vm6, %v507_v59, %v506_v21  ;;  %v510_v0 = vrot.slane %v482_v60, 3 }
 0x26f   :  { %v513_v26 = vrot.slane %v483_v62, 2  ;;  %v468_v3 = vpop.permute.xlu1 %467 }
 0x270   :  { %v484_v4 = vmul.f32 %v468_v3, %v436_v1  ;;  %v512_v5 = vsel %vm511_vm7, %v510_v0, %v509_v63 }
 0x271   :  { %v515_v27 = vsel %vm514_vm8, %v513_v26, %v512_v5 }
 0x272   :  { %v516_v7 = vrot.slane %v484_v4, 1 }
 0x274   :  { %v518_v10 = vsel %vm517_vm9, %v516_v7, %v515_v27 }
 0x275   :  { %519 = vrot.lane.b32.xlu1 %v518_v10, %s3887_s4 }
 0x279   :  { %545 = vrot.lane.b32.xlu1 %v544_v31, %s3889_s30 }
 0x27d   :  { %v488_v11 = vpop.permute.xlu0 %487 }
 0x27e   :  { %vm489_vm11 = vcmp.eq.s32.totalorder %v488_v11, 1 }
 0x2e7   :  { %v520_v13 = vpop.permute.xlu1 %519 }
 0x2e8   :  { %v4121_v32 = vsel %vm489_vm11, %v520_v13, 0.0 }
 0x2e9   :  { %3448 = vmatmul.mubr.msk.f32.vlgmr.msra.gmra.mrb[2].mxu1 %vm219_vm12, %v4121_v32 }
 0x2ea   :  { %3569 = vmatpush3.bf16.msra.mxu1 %v3972_v9  ;;  %3469 = vmatprep.mubr.msk.f32.mxu1 %vm3884_vm1, %v3885_v6 }
 0x2eb   :  { %3570 = vmatprep.subr.bf16.mxu1 %v3883_v2  ;;  %v546_v52 = vpop.permute.xlu1 %545 }
 0x2ec   :  { %v4138_v55 = vsel %vm489_vm11, %v546_v52, 0.0 }
 0x2ed   :  { %v671_v56 = vrot.slane %v4138_v55, 1  ;;  %v672_v58 = vrot.slane %v4138_v55, 2  ;;  %v673_v14 = vrot.slane %v4138_v55, 3  ;;  %v676_v15 = vrot.slane %v4138_v55, 6 }
 0x2ee   :  { %3572 = vmatpush3.bf16.msra.mxu1 %v3981_v12  ;;  %v674_v20 = vrot.slane %v4138_v55, 4  ;;  %v677_v59 = vrot.slane %v4138_v55, 7  ;;  %v675_v60 = vrot.slane %v4138_v55, 5 }
 0x2ef   :  { %3579 = vmatprep.subr.bf16.mxu1 %v3883_v2 }
 0x3bc   :  { %v626_v16 = vpop.f32.mrb[2].mxu1 }
 0x3bd   :  { %v631_v18 = vrot.slane %v626_v16, 1  ;;  %v632_v19 = vrot.slane %v626_v16, 2  ;;  %v3449_v22 = vpop.f32.mrb[3].mxu1  ;;  %v633_v24 = vrot.slane %v626_v16, 3  ;;  %v646_v25 = vadd.f32 %v626_v16, %v549_v17 }
 0x3be   :  { %v634_v30 = vrot.slane %v626_v16, 4  ;;  %v635_v35 = vrot.slane %v626_v16, 5  ;;  %v636_v38 = vrot.slane %v626_v16, 6  ;;  %v637_v41 = vrot.slane %v626_v16, 7 }
 0x3bf   :  { %v648_v29 = vadd.f32 %v632_v19, %v551_v23  ;;  %v647_v31 = vadd.f32 %v631_v18, %v550_v28  ;;  %3653 = vtanh.f32 %v646_v25  ;;  %v649_v36 = vadd.f32 %v633_v24, %v552_v33 }
 0x3c0   :  { %v650_v39 = vadd.f32 %v634_v30, %v553_v37  ;;  %v651_v42 = vadd.f32 %v635_v35, %v554_v40  ;;  %v652_v44 = vadd.f32 %v636_v38, %v555_v43  ;;  %v653_v47 = vadd.f32 %v637_v41, %v556_v45 }
 0x3c1   :  { %3655 = vtanh.f32 %v648_v29 }
 0x3c2   :  { %3657 = vtanh.f32 %v647_v31 }
 0x3c3   :  { %3659 = vtanh.f32 %v649_v36 }
 0x3c4   :  { %3661 = vtanh.f32 %v650_v39 }
 0x3c5   :  { %3663 = vtanh.f32 %v651_v42 }
 0x3c6   :  { %3665 = vtanh.f32 %v652_v44 }
 0x3c7   :  { %3667 = vtanh.f32 %v653_v47 }
 0x3c9   :  { %v3654_v46 = vpop.eup %3653 }
 0x3ca   :  { %718 = vrot.lane.b32.xlu0 %v3654_v46, %s3886_s0  ;;  %v4158_v61 = vadd.f32 1.0, %v3654_v46 }
 0x3cb   :  { %v3656_v48 = vpop.eup %3655 }
 0x3cc   :  { %722 = vrot.lane.b32.xlu1 %v3656_v48, %s3886_s0  ;;  %v3658_v49 = vpop.eup %3657  ;;  %v4167_v5 = vadd.f32 1.0, %v3656_v48 }
 0x3cd   :  { %v3660_v50 = vpop.eup %3659  ;;  %v4162_v0 = vadd.f32 1.0, %v3658_v49 }
 0x3ce   :  { %720 = vrot.lane.b32.xlu0 %v3658_v49, %s3886_s0  ;;  %v3662_v51 = vpop.eup %3661  ;;  %v4165_v3 = vadd.f32 1.0, %v3660_v50 }
 0x3cf   :  { %v3664_v53 = vpop.eup %3663  ;;  %v4172_v11 = vadd.f32 1.0, %v3662_v51 }
 0x3d0   :  { %724 = vrot.lane.b32.xlu1 %v3660_v50, %s3886_s0  ;;  %v3666_v54 = vpop.eup %3665  ;;  %v4179_v19 = vadd.f32 1.0, %v3664_v53 }
 0x3d1   :  { %v3668_v8 = vpop.eup %3667  ;;  %v4177_v17 = vadd.f32 1.0, %v3666_v54 }
 0x3d2   :  { %726 = vrot.lane.b32.xlu0 %v3662_v51, %s3886_s0  ;;  %v4185_v25 = vadd.f32 1.0, %v3668_v8 }
 0x3d4   :  { %728 = vrot.lane.b32.xlu1 %v3664_v53, %s3886_s0 }
 0x3d6   :  { %730 = vrot.lane.b32.xlu0 %v3666_v54, %s3886_s0 }
 0x3d8   :  { %732 = vrot.lane.b32.xlu1 %v3668_v8, %s3886_s0 }
 0x3da   :  { %680 = vrot.lane.b32.xlu0 %v671_v56, %s3887_s4 }
 0x3dc   :  { %682 = vrot.lane.b32.xlu1 %v672_v58, %s3887_s4 }
 0x3de   :  { %678 = vrot.lane.b32.xlu0 %v4138_v55, %s3887_s4 }
 0x3e0   :  { %684 = vrot.lane.b32.xlu1 %v673_v14, %s3887_s4 }
 0x3e2   :  { %690 = vrot.lane.b32.xlu0 %v676_v15, %s3887_s4 }
 0x3e4   :  { %686 = vrot.lane.b32.xlu1 %v674_v20, %s3887_s4 }
 0x3e6   :  { %692 = vrot.lane.b32.xlu0 %v677_v59, %s3887_s4 }
 0x3e8   :  { %688 = vrot.lane.b32.xlu1 %v675_v60, %s3887_s4 }
 0x43c   :  { %v719_v21 = vpop.permute.xlu0 %718 }
 0x43d   :  { %v742_v62 = vmul.f32 %v719_v21, %v4158_v61 }
 0x43e   :  { %v723_v63 = vpop.permute.xlu1 %722 }
 0x43f   :  { %758 = vrot.lane.b32.xlu0 %v742_v62, %s3887_s4  ;;  %v744_v10 = vmul.f32 %v723_v63, %v4167_v5 }
 0x440   :  { %v721_v1 = vpop.permute.xlu0 %720 }
 0x441   :  { %v743_v26 = vmul.f32 %v721_v1, %v4162_v0 }
 0x442   :  { %v725_v4 = vpop.permute.xlu1 %724 }
 0x443   :  { %v745_v7 = vmul.f32 %v725_v4, %v4165_v3  ;;  %760 = vrot.lane.b32.xlu0 %v743_v26, %s3887_s4 }
 0x444   :  { %v727_v27 = vpop.permute.xlu0 %726 }
 0x445   :  { %764 = vrot.lane.b32.xlu1 %v745_v7, %s3887_s4  ;;  %v746_v16 = vmul.f32 %v727_v27, %v4172_v11 }
 0x446   :  { %v729_v13 = vpop.permute.xlu1 %728 }
 0x447   :  { %762 = vrot.lane.b32.xlu0 %v744_v10, %s3887_s4  ;;  %v747_v23 = vmul.f32 %v729_v13, %v4179_v19 }
 0x448   :  { %v731_v18 = vpop.permute.xlu0 %730 }
 0x449   :  { %v748_v22 = vmul.f32 %v731_v18, %v4177_v17  ;;  %766 = vrot.lane.b32.xlu1 %v746_v16, %s3887_s4 }
 0x44a   :  { %v733_v24 = vpop.permute.xlu1 %732 }
 0x44b   :  { %770 = vrot.lane.b32.xlu0 %v748_v22, %s3887_s4  ;;  %v749_v28 = vmul.f32 %v733_v24, %v4185_v25 }
 0x44c   :  { %v681_v29 = vpop.permute.xlu0 %680 }
 0x44d   :  { %768 = vrot.lane.b32.xlu1 %v747_v23, %s3887_s4  ;;  %v703_v42 = vmul.f32 %v681_v29, %v4162_v0 }
 0x44e   :  { %v683_v30 = vpop.permute.xlu1 %682 }
 0x44f   :  { %v704_v47 = vmul.f32 %v683_v30, %v4167_v5 }
 0x450   :  { %v679_v31 = vpop.permute.xlu0 %678 }
 0x451   :  { %772 = vrot.lane.b32.xlu1 %v749_v28, %s3887_s4  ;;  %v702_v38 = vmul.f32 %v679_v31, %v4158_v61 }
 0x452   :  { %v685_v33 = vpop.permute.xlu1 %684 }
 0x453   :  { %v705_v48 = vmul.f32 %v685_v33, %v4165_v3 }
 0x454   :  { %v691_v35 = vpop.permute.xlu0 %690 }
 0x455   :  { %v708_v8 = vmul.f32 %v691_v35, %v4177_v17 }
 0x456   :  { %v687_v36 = vpop.permute.xlu1 %686 }
 0x457   :  { %v706_v53 = vmul.f32 %v687_v36, %v4172_v11 }
 0x458   :  { %v693_v37 = vpop.permute.xlu0 %692 }
 0x459   :  { %v709_v26 = vmul.f32 %v693_v37, %v4185_v25 }
 0x45a   :  { %v689_v41 = vpop.permute.xlu1 %688 }
 0x45b   :  { %v707_v15 = vmul.f32 %v689_v41, %v4179_v19 }
 0x4b1   :  { %v759_v39 = vpop.permute.xlu0 %758 }
 0x4b2   :  { %v782_v40 = vadd.f32 %v759_v39, %v702_v38  ;;  %v854_v38 = vsel %vm204_vm13, 1, %v3888_v57 }
 0x4b4   :  { %v790_v43 = vmul.f32 0.5, %v782_v40 }
 0x4b5   :  { %v761_v44 = vpop.permute.xlu0 %760 }
 0x4b6   :  { %3669 = vtanh.f32 %v790_v43  ;;  %v783_v45 = vadd.f32 %v761_v44, %v703_v42 }
 0x4b7   :  { %v765_v46 = vpop.permute.xlu1 %764 }
 0x4b8   :  { %v791_v49 = vmul.f32 0.5, %v783_v45  ;;  %v785_v51 = vadd.f32 %v765_v46, %v705_v48  ;;  %v799_v48 = vmul.f32 0.5, %v4162_v0 }
 0x4b9   :  { %v763_v50 = vpop.permute.xlu0 %762 }
 0x4ba   :  { %3671 = vtanh.f32 %v791_v49  ;;  %v784_v52 = vadd.f32 %v763_v50, %v704_v47  ;;  %v793_v20 = vmul.f32 0.5, %v785_v51  ;;  %v893_v16 = vrot.slane %v791_v49, 7 }
 0x4bb   :  { %v767_v54 = vpop.permute.xlu1 %766  ;;  %v800_v50 = vmul.f32 0.5, %v4167_v5  ;;  %v803_v5 = vmul.f32 0.5, %v4179_v19 }
 0x4bc   :  { %v792_v56 = vmul.f32 0.5, %v784_v52  ;;  %v786_v58 = vadd.f32 %v767_v54, %v706_v53  ;;  %v894_v24 = vsel %vm499_vm3, %v893_v16, %v790_v43  ;;  %v897_v30 = vrot.slane %v793_v20, 5 }
 0x4bd   :  { %v771_v14 = vpop.permute.xlu0 %770  ;;  %v798_v53 = vmul.f32 0.5, %v4158_v61  ;;  %v804_v61 = vmul.f32 0.5, %v4177_v17 }
 0x4be   :  { %3673 = vtanh.f32 %v792_v56  ;;  %v788_v59 = vadd.f32 %v771_v14, %v708_v8  ;;  %v794_v60 = vmul.f32 0.5, %v786_v58  ;;  %v895_v22 = vrot.slane %v792_v56, 6 }
 0x4bf   :  { %v769_v21 = vpop.permute.xlu1 %768  ;;  %v801_v56 = vmul.f32 0.5, %v4165_v3  ;;  %v802_v14 = vmul.f32 0.5, %v4172_v11 }
 0x4c0   :  { %v3670_v62 = vpop.eup %3669  ;;  %v787_v63 = vadd.f32 %v769_v21, %v707_v15  ;;  %3675 = vtanh.f32 %v794_v60  ;;  %v796_v1 = vmul.f32 0.5, %v788_v59  ;;  %v896_v29 = vsel %vm502_vm4, %v895_v22, %v894_v24 }
 0x4c1   :  { %822 = vrot.lane.b32.xlu0 %v3670_v62, %s3886_s0  ;;  %3677 = vtanh.f32 %v793_v20  ;;  %v899_v31 = vrot.slane %v794_v60, 4  ;;  %v898_v36 = vsel %vm505_vm5, %v897_v30, %v896_v29  ;;  %v911_v30 = vld [vmem:[#allocation2 + $0x2] sm:$0x1] }
 0x4c2   :  { %v795_v4 = vmul.f32 0.5, %v787_v63  ;;  %3679 = vtanh.f32 %v796_v1  ;;  %v903_v43 = vrot.slane %v796_v1, 2 }
 0x4c3   :  { %v773_v7 = vpop.permute.xlu1 %772  ;;  %v900_v39 = vsel %vm508_vm6, %v899_v31, %v898_v36 }
 0x4c4   :  { %v3672_v27 = vpop.eup %3671  ;;  %v789_v10 = vadd.f32 %v773_v7, %v709_v26  ;;  %3681 = vtanh.f32 %v795_v4  ;;  %v901_v35 = vrot.slane %v795_v4, 3 }
 0x4c5   :  { %824 = vrot.lane.b32.xlu0 %v3672_v27, %s3886_s0  ;;  %v805_v27 = vmul.f32 0.5, %v4185_v25 }
 0x4c6   :  { %v797_v13 = vmul.f32 0.5, %v789_v10  ;;  %v902_v41 = vsel %vm511_vm7, %v901_v35, %v900_v39  ;;  %v913_v35 = vld [vmem:[#allocation2 + $0x12] sm:$0x1] }
 0x4c7   :  { %v904_v44 = vsel %vm514_vm8, %v903_v43, %v902_v41 }
 0x4c8   :  { %v3674_v18 = vpop.eup %3673  ;;  %3683 = vtanh.f32 %v797_v13  ;;  %v905_v40 = vrot.slane %v797_v13, 1 }
 0x4c9   :  { %826 = vrot.lane.b32.xlu1 %v3674_v18, %s3886_s0 }
 0x4ca   :  { %v3676_v23 = vpop.eup %3675  ;;  %v906_v45 = vsel %vm517_vm9, %v905_v40, %v904_v44 }
 0x4cb   :  { %v3678_v28 = vpop.eup %3677  ;;  %830 = vrot.lane.b32.xlu0 %v3676_v23, %s3886_s0 }
 0x4cc   :  { %v3680_v33 = vpop.eup %3679 }
 0x4cd   :  { %828 = vrot.lane.b32.xlu1 %v3678_v28, %s3886_s0 }
 0x4ce   :  { %v3682_v37 = vpop.eup %3681 }
 0x4cf   :  { %834 = vrot.lane.b32.xlu0 %v3680_v33, %s3886_s0 }
 0x4d1   :  { %832 = vrot.lane.b32.xlu1 %v3682_v37, %s3886_s0 }
 0x4d2   :  { %v3684_v42 = vpop.eup %3683 }
 0x4d3   :  { %856 = vperm.xlu0 %3619, %v854_v38   ;;  %v912_v38 = vld [vmem:[#allocation2 + $0xa] sm:$0x1] }
 0x4d5   :  { %836 = vrot.lane.b32.xlu1 %v3684_v42, %s3886_s0  ;;  %v914_v42 = vld [vmem:[#allocation2 + $0x1a] sm:$0x1] }
 0x4d7   :  { %907 = vrot.lane.b32.xlu0 %v906_v45, %s3889_s30  ;;  %v915_v45 = vld [vmem:[#allocation2 + $0x22] sm:$0x1] }
 0x533   :  { %v823_v46 = vpop.permute.xlu0 %822 }
 0x534   :  { %v846_v20 = vmul.f32 %v823_v46, %v798_v53  ;;  %v918_v53 = vld [vmem:[#allocation2 + $0x3a] sm:$0x1] }
 0x537   :  { %v825_v47 = vpop.permute.xlu0 %824 }
 0x538   :  { %v847_v49 = vmul.f32 %v825_v47, %v799_v48  ;;  %v916_v48 = vld [vmem:[#allocation2 + $0x2a] sm:$0x1] }
 0x53a   :  { %v867_v54 = vrot.slane %v847_v49, 7 }
 0x53b   :  { %v827_v51 = vpop.permute.xlu1 %826 }
 0x53c   :  { %v848_v52 = vmul.f32 %v827_v51, %v800_v50  ;;  %v868_v0 = vsel %vm499_vm3, %v867_v54, %v846_v20  ;;  %v917_v51 = vld [vmem:[#allocation2 + $0x32] sm:$0x1] }
 0x53d   :  { %v831_v8 = vpop.permute.xlu0 %830 }
 0x53e   :  { %v869_v58 = vrot.slane %v848_v52, 6  ;;  %v850_v60 = vmul.f32 %v831_v8, %v802_v14 }
 0x53f   :  { %v829_v15 = vpop.permute.xlu1 %828 }
 0x540   :  { %v849_v59 = vmul.f32 %v829_v15, %v801_v56  ;;  %v870_v63 = vsel %vm502_vm4, %v869_v58, %v868_v0  ;;  %v873_v4 = vrot.slane %v850_v60, 4 }
 0x541   :  { %v835_v62 = vpop.permute.xlu0 %834 }
 0x542   :  { %v871_v21 = vrot.slane %v849_v59, 5  ;;  %v852_v11 = vmul.f32 %v835_v62, %v804_v61 }
 0x543   :  { %v833_v1 = vpop.permute.xlu1 %832 }
 0x544   :  { %v872_v3 = vsel %vm505_vm5, %v871_v21, %v870_v63  ;;  %v851_v26 = vmul.f32 %v833_v1, %v803_v5  ;;  %v877_v19 = vrot.slane %v852_v11, 2 }
 0x545   :  { %v874_v13 = vsel %vm508_vm6, %v873_v4, %v872_v3 }
 0x546   :  { %v875_v7 = vrot.slane %v851_v26, 3 }
 0x547   :  { %v837_v10 = vpop.permute.xlu1 %836 }
 0x548   :  { %v853_v16 = vmul.f32 %v837_v10, %v805_v27  ;;  %v876_v18 = vsel %vm511_vm7, %v875_v7, %v874_v13 }
 0x549   :  { %v878_v23 = vsel %vm514_vm8, %v877_v19, %v876_v18 }
 0x54a   :  { %v879_v22 = vrot.slane %v853_v16, 1 }
 0x54c   :  { %v880_v17 = vsel %vm517_vm9, %v879_v22, %v878_v23 }
 0x54d   :  { %881 = vrot.lane.b32.xlu1 %v880_v17, %s3887_s4 }
 0x552   :  { %v857_v24 = vpop.permute.xlu0 %856 }
 0x553   :  { %vm858_vm14 = vcmp.eq.s32.totalorder %v857_v24, 1 }
 0x556   :  { %v908_v20 = vpop.permute.xlu0 %907 }
 0x557   :  { %v4252_v0 = vsel %vm858_vm14, %v908_v20, %v4138_v55 }
 0x558   :  { %v1033_v62 = vrot.slane %v4252_v0, 1  ;;  %v1034_v5 = vrot.slane %v4252_v0, 2  ;;  %v1035_v63 = vrot.slane %v4252_v0, 3  ;;  %v1038_v55 = vrot.slane %v4252_v0, 6 }
 0x559   :  { %v1036_v61 = vrot.slane %v4252_v0, 4  ;;  %v1039_v1 = vrot.slane %v4252_v0, 7  ;;  %v1037_v3 = vrot.slane %v4252_v0, 5 }
 0x5bf   :  { %v882_v28 = vpop.permute.xlu1 %881 }
 0x5c0   :  { %v4234_v25 = vsel %vm858_vm14, %v882_v28, %v4121_v32 }
 0x5c1   :  { %3459 = vmatmul.mubr.msk.f32.vlgmr.msra.gmra.mrb[8].mxu0 %vm219_vm12, %v4234_v25 }
 0x5c2   :  { %3575 = vmatpush3.bf16.msra.mxu0 %v3972_v9  ;;  %3480 = vmatprep.mubr.msk.f32.mxu0 %vm3884_vm1, %v3885_v6 }
 0x5c3   :  { %3576 = vmatprep.subr.bf16.mxu0 %v3883_v2 }
 0x5c6   :  { %3578 = vmatpush3.bf16.msra.mxu0 %v3981_v12 }
 0x5c7   :  { %3585 = vmatprep.subr.bf16.mxu0 %v3883_v2 }
 0x694   :  { %v988_v29 = vpop.f32.mrb[8].mxu0 }
 0x695   :  { %v993_v31 = vrot.slane %v988_v29, 1  ;;  %v994_v33 = vrot.slane %v988_v29, 2  ;;  %v3460_v32 = vpop.f32.mrb[9].mxu0  ;;  %v995_v36 = vrot.slane %v988_v29, 3  ;;  %v1008_v37 = vadd.f32 %v988_v29, %v911_v30 }
 0x696   :  { %v996_v40 = vrot.slane %v988_v29, 4  ;;  %v997_v43 = vrot.slane %v988_v29, 5  ;;  %v998_v46 = vrot.slane %v988_v29, 6  ;;  %v999_v49 = vrot.slane %v988_v29, 7 }
 0x697   :  { %v1010_v39 = vadd.f32 %v994_v33, %v913_v35  ;;  %v1009_v41 = vadd.f32 %v993_v31, %v912_v38  ;;  %3685 = vtanh.f32 %v1008_v37  ;;  %v1011_v44 = vadd.f32 %v995_v36, %v914_v42 }
 0x698   :  { %v1012_v47 = vadd.f32 %v996_v40, %v915_v45  ;;  %v1013_v50 = vadd.f32 %v997_v43, %v916_v48  ;;  %v1014_v52 = vadd.f32 %v998_v46, %v917_v51  ;;  %v1015_v8 = vadd.f32 %v999_v49, %v918_v53 }
 0x699   :  { %3687 = vtanh.f32 %v1010_v39 }
 0x69a   :  { %3689 = vtanh.f32 %v1009_v41 }
 0x69b   :  { %3691 = vtanh.f32 %v1011_v44 }
 0x69c   :  { %3693 = vtanh.f32 %v1012_v47 }
 0x69d   :  { %3695 = vtanh.f32 %v1013_v50 }
 0x69e   :  { %3697 = vtanh.f32 %v1014_v52 }
 0x69f   :  { %3699 = vtanh.f32 %v1015_v8 }
 0x6a1   :  { %v3686_v54 = vpop.eup %3685 }
 0x6a2   :  { %1080 = vrot.lane.b32.xlu1 %v3686_v54, %s3886_s0  ;;  %v4272_v26 = vadd.f32 1.0, %v3686_v54 }
 0x6a3   :  { %v3688_v56 = vpop.eup %3687 }
 0x6a4   :  { %1084 = vrot.lane.b32.xlu0 %v3688_v56, %s3886_s0  ;;  %v3690_v58 = vpop.eup %3689  ;;  %v4281_v19 = vadd.f32 1.0, %v3688_v56 }
 0x6a5   :  { %v3692_v14 = vpop.eup %3691  ;;  %v4276_v27 = vadd.f32 1.0, %v3690_v58 }
 0x6a6   :  { %1082 = vrot.lane.b32.xlu1 %v3690_v58, %s3886_s0  ;;  %v3694_v15 = vpop.eup %3693  ;;  %v4279_v16 = vadd.f32 1.0, %v3692_v14 }
 0x6a7   :  { %v3696_v59 = vpop.eup %3695  ;;  %v4286_v24 = vadd.f32 1.0, %v3694_v15 }
 0x6a8   :  { %1086 = vrot.lane.b32.xlu0 %v3692_v14, %s3886_s0  ;;  %v3698_v60 = vpop.eup %3697  ;;  %v4293_v33 = vadd.f32 1.0, %v3696_v59 }
 0x6a9   :  { %v3700_v21 = vpop.eup %3699  ;;  %v4291_v30 = vadd.f32 1.0, %v3698_v60 }
 0x6aa   :  { %1088 = vrot.lane.b32.xlu1 %v3694_v15, %s3886_s0  ;;  %v4299_v37 = vadd.f32 1.0, %v3700_v21 }
 0x6ac   :  { %1090 = vrot.lane.b32.xlu0 %v3696_v59, %s3886_s0 }
 0x6ae   :  { %1092 = vrot.lane.b32.xlu1 %v3698_v60, %s3886_s0 }
 0x6b0   :  { %1094 = vrot.lane.b32.xlu0 %v3700_v21, %s3886_s0 }
 0x6b2   :  { %1042 = vrot.lane.b32.xlu1 %v1033_v62, %s3887_s4 }
 0x6b4   :  { %1044 = vrot.lane.b32.xlu0 %v1034_v5, %s3887_s4 }
 0x6b6   :  { %1040 = vrot.lane.b32.xlu1 %v4252_v0, %s3887_s4 }
 0x6b8   :  { %1046 = vrot.lane.b32.xlu0 %v1035_v63, %s3887_s4 }
 0x6ba   :  { %1052 = vrot.lane.b32.xlu1 %v1038_v55, %s3887_s4 }
 0x6bc   :  { %1048 = vrot.lane.b32.xlu0 %v1036_v61, %s3887_s4 }
 0x6be   :  { %1054 = vrot.lane.b32.xlu1 %v1039_v1, %s3887_s4 }
 0x6c0   :  { %1050 = vrot.lane.b32.xlu0 %v1037_v3, %s3887_s4 }
 0x714   :  { %v1081_v4 = vpop.permute.xlu1 %1080 }
 0x715   :  { %v1104_v11 = vmul.f32 %v1081_v4, %v4272_v26 }
 0x716   :  { %v1085_v7 = vpop.permute.xlu0 %1084 }
 0x717   :  { %1120 = vrot.lane.b32.xlu1 %v1104_v11, %s3887_s4  ;;  %v1106_v17 = vmul.f32 %v1085_v7, %v4281_v19 }
 0x718   :  { %v1083_v10 = vpop.permute.xlu1 %1082 }
 0x719   :  { %v1105_v13 = vmul.f32 %v1083_v10, %v4276_v27 }
 0x71a   :  { %v1087_v18 = vpop.permute.xlu0 %1086 }
 0x71b   :  { %v1107_v22 = vmul.f32 %v1087_v18, %v4279_v16  ;;  %1122 = vrot.lane.b32.xlu1 %v1105_v13, %s3887_s4 }
 0x71c   :  { %v1089_v23 = vpop.permute.xlu1 %1088 }
 0x71d   :  { %1126 = vrot.lane.b32.xlu0 %v1107_v22, %s3887_s4  ;;  %v1108_v29 = vmul.f32 %v1089_v23, %v4286_v24 }
 0x71e   :  { %v1091_v28 = vpop.permute.xlu0 %1090 }
 0x71f   :  { %1124 = vrot.lane.b32.xlu1 %v1106_v17, %s3887_s4  ;;  %v1109_v35 = vmul.f32 %v1091_v28, %v4293_v33 }
 0x720   :  { %v1093_v31 = vpop.permute.xlu1 %1092 }
 0x721   :  { %v1110_v32 = vmul.f32 %v1093_v31, %v4291_v30  ;;  %1128 = vrot.lane.b32.xlu0 %v1108_v29, %s3887_s4 }
 0x722   :  { %v1095_v36 = vpop.permute.xlu0 %1094 }
 0x723   :  { %1132 = vrot.lane.b32.xlu1 %v1110_v32, %s3887_s4  ;;  %v1111_v38 = vmul.f32 %v1095_v36, %v4299_v37 }
 0x724   :  { %v1043_v39 = vpop.permute.xlu1 %1042 }
 0x725   :  { %1130 = vrot.lane.b32.xlu0 %v1109_v35, %s3887_s4  ;;  %v1065_v50 = vmul.f32 %v1043_v39, %v4276_v27 }
 0x726   :  { %v1045_v40 = vpop.permute.xlu0 %1044 }
 0x727   :  { %v1066_v8 = vmul.f32 %v1045_v40, %v4281_v19 }
 0x728   :  { %v1041_v41 = vpop.permute.xlu1 %1040 }
 0x729   :  { %1134 = vrot.lane.b32.xlu0 %v1111_v38, %s3887_s4  ;;  %v1064_v46 = vmul.f32 %v1041_v41, %v4272_v26 }
 0x72a   :  { %v1047_v42 = vpop.permute.xlu0 %1046 }
 0x72b   :  { %v1067_v56 = vmul.f32 %v1047_v42, %v4279_v16 }
 0x72c   :  { %v1053_v43 = vpop.permute.xlu1 %1052 }
 0x72d   :  { %v1070_v21 = vmul.f32 %v1053_v43, %v4291_v30 }
 0x72e   :  { %v1049_v44 = vpop.permute.xlu0 %1048 }
 0x72f   :  { %v1068_v59 = vmul.f32 %v1049_v44, %v4286_v24 }
 0x730   :  { %v1055_v45 = vpop.permute.xlu1 %1054 }
 0x731   :  { %v1071_v13 = vmul.f32 %v1055_v45, %v4299_v37 }
 0x732   :  { %v1051_v49 = vpop.permute.xlu0 %1050 }
 0x733   :  { %v1069_v55 = vmul.f32 %v1051_v49, %v4293_v33 }
 0x789   :  { %v1121_v47 = vpop.permute.xlu1 %1120 }
 0x78a   :  { %v1144_v48 = vadd.f32 %v1121_v47, %v1064_v46  ;;  %v1216_v46 = vsel %vm205_vm15, 1, %v3888_v57 }
 0x78c   :  { %v1152_v51 = vmul.f32 0.5, %v1144_v48 }
 0x78d   :  { %v1123_v52 = vpop.permute.xlu1 %1122 }
 0x78e   :  { %3701 = vtanh.f32 %v1152_v51  ;;  %v1145_v53 = vadd.f32 %v1123_v52, %v1065_v50 }
 0x78f   :  { %v1127_v54 = vpop.permute.xlu0 %1126 }
 0x790   :  { %v1153_v58 = vmul.f32 0.5, %v1145_v53  ;;  %v1147_v15 = vadd.f32 %v1127_v54, %v1067_v56 }
 0x791   :  { %v1125_v14 = vpop.permute.xlu1 %1124 }
 0x792   :  { %3703 = vtanh.f32 %v1153_v58  ;;  %v1146_v20 = vadd.f32 %v1125_v14, %v1066_v8  ;;  %v1155_v61 = vmul.f32 0.5, %v1147_v15  ;;  %v1255_v29 = vrot.slane %v1153_v58, 7 }
 0x793   :  { %v1129_v60 = vpop.permute.xlu0 %1128  ;;  %v1161_v8 = vmul.f32 0.5, %v4276_v27  ;;  %v1162_v58 = vmul.f32 0.5, %v4281_v19  ;;  %v1165_v19 = vmul.f32 0.5, %v4293_v33 }
 0x794   :  { %v1154_v62 = vmul.f32 0.5, %v1146_v20  ;;  %v1148_v5 = vadd.f32 %v1129_v60, %v1068_v59  ;;  %v1256_v36 = vsel %vm499_vm3, %v1255_v29, %v1152_v51  ;;  %v1259_v40 = vrot.slane %v1155_v61, 5 }
 0x795   :  { %v1133_v63 = vpop.permute.xlu1 %1132  ;;  %v1160_v20 = vmul.f32 0.5, %v4272_v26  ;;  %v1166_v26 = vmul.f32 0.5, %v4291_v30 }
 0x796   :  { %3705 = vtanh.f32 %v1154_v62  ;;  %v1150_v1 = vadd.f32 %v1133_v63, %v1070_v21  ;;  %v1156_v3 = vmul.f32 0.5, %v1148_v5  ;;  %v1257_v32 = vrot.slane %v1154_v62, 6 }
 0x797   :  { %v1131_v4 = vpop.permute.xlu0 %1130  ;;  %v1163_v21 = vmul.f32 0.5, %v4279_v16  ;;  %v1164_v5 = vmul.f32 0.5, %v4286_v24 }
 0x798   :  { %v3702_v11 = vpop.eup %3701  ;;  %v1149_v7 = vadd.f32 %v1131_v4, %v1069_v55  ;;  %3707 = vtanh.f32 %v1156_v3  ;;  %v1158_v10 = vmul.f32 0.5, %v1150_v1  ;;  %v1258_v39 = vsel %vm502_vm4, %v1257_v32, %v1256_v36 }
 0x799   :  { %1184 = vrot.lane.b32.xlu1 %v3702_v11, %s3886_s0  ;;  %3709 = vtanh.f32 %v1155_v61  ;;  %v1261_v41 = vrot.slane %v1156_v3, 4  ;;  %v1260_v44 = vsel %vm505_vm5, %v1259_v40, %v1258_v39  ;;  %v1273_v39 = vld [vmem:[#allocation2 + $0x3] sm:$0x1] }
 0x79a   :  { %v1157_v18 = vmul.f32 0.5, %v1149_v7  ;;  %3711 = vtanh.f32 %v1158_v10  ;;  %v1265_v51 = vrot.slane %v1158_v10, 2 }
 0x79b   :  { %v1135_v22 = vpop.permute.xlu0 %1134  ;;  %v1262_v47 = vsel %vm508_vm6, %v1261_v41, %v1260_v44 }
 0x79c   :  { %v3704_v23 = vpop.eup %3703  ;;  %v1151_v17 = vadd.f32 %v1135_v22, %v1071_v13  ;;  %3713 = vtanh.f32 %v1157_v18  ;;  %v1263_v43 = vrot.slane %v1157_v18, 3  ;;  %v1167_v22 = vmul.f32 0.5, %v4299_v37 }
 0x79d   :  { %1186 = vrot.lane.b32.xlu1 %v3704_v23, %s3886_s0 }
 0x79e   :  { %v1159_v28 = vmul.f32 0.5, %v1151_v17  ;;  %v1264_v49 = vsel %vm511_vm7, %v1263_v43, %v1262_v47 }
 0x79f   :  { %v1266_v34 = vsel %vm514_vm8, %v1265_v51, %v1264_v49  ;;  %v1276_v49 = vld [vmem:[#allocation2 + $0x1b] sm:$0x1] }
 0x7a0   :  { %v3706_v31 = vpop.eup %3705  ;;  %3715 = vtanh.f32 %v1159_v28  ;;  %v1267_v48 = vrot.slane %v1159_v28, 1 }
 0x7a1   :  { %1188 = vrot.lane.b32.xlu0 %v3706_v31, %s3886_s0 }
 0x7a2   :  { %v3708_v35 = vpop.eup %3707  ;;  %v1268_v52 = vsel %vm517_vm9, %v1267_v48, %v1266_v34  ;;  %v1277_v34 = vld [vmem:[#allocation2 + $0x23] sm:$0x1] }
 0x7a3   :  { %v3710_v38 = vpop.eup %3709  ;;  %1192 = vrot.lane.b32.xlu1 %v3708_v35, %s3886_s0 }
 0x7a4   :  { %v3712_v42 = vpop.eup %3711 }
 0x7a5   :  { %1190 = vrot.lane.b32.xlu0 %v3710_v38, %s3886_s0 }
 0x7a6   :  { %v3714_v45 = vpop.eup %3713 }
 0x7a7   :  { %1196 = vrot.lane.b32.xlu1 %v3712_v42, %s3886_s0  ;;  %v1275_v42 = vld [vmem:[#allocation2 + $0x13] sm:$0x1] }
 0x7a9   :  { %1194 = vrot.lane.b32.xlu0 %v3714_v45, %s3886_s0  ;;  %v1274_v45 = vld [vmem:[#allocation2 + $0xb] sm:$0x1] }
 0x7aa   :  { %v3716_v50 = vpop.eup %3715 }
 0x7ab   :  { %1218 = vperm.xlu1 %3620, %v1216_v46  }
 0x7ad   :  { %1198 = vrot.lane.b32.xlu0 %v3716_v50, %s3886_s0 }
 0x7af   :  { %1269 = vrot.lane.b32.xlu1 %v1268_v52, %s3889_s30 }
 0x80b   :  { %v1185_v53 = vpop.permute.xlu1 %1184 }
 0x80c   :  { %v1208_v55 = vmul.f32 %v1185_v53, %v1160_v20 }
 0x80f   :  { %v1187_v54 = vpop.permute.xlu1 %1186 }
 0x810   :  { %v1209_v56 = vmul.f32 %v1187_v54, %v1161_v8  ;;  %v1278_v54 = vld [vmem:[#allocation2 + $0x2b] sm:$0x1] }
 0x812   :  { %v1229_v59 = vrot.slane %v1209_v56, 7 }
 0x813   :  { %v1189_v14 = vpop.permute.xlu0 %1188 }
 0x814   :  { %v1210_v15 = vmul.f32 %v1189_v14, %v1162_v58  ;;  %v1230_v27 = vsel %vm499_vm3, %v1229_v59, %v1208_v55  ;;  %v1279_v58 = vld [vmem:[#allocation2 + $0x33] sm:$0x1] }
 0x815   :  { %v1193_v60 = vpop.permute.xlu1 %1192 }
 0x816   :  { %v1231_v62 = vrot.slane %v1210_v15, 6  ;;  %v1212_v1 = vmul.f32 %v1193_v60, %v1164_v5  ;;  %v1280_v15 = vld [vmem:[#allocation2 + $0x3b] sm:$0x1] }
 0x817   :  { %v1191_v63 = vpop.permute.xlu0 %1190 }
 0x818   :  { %v1211_v61 = vmul.f32 %v1191_v63, %v1163_v21  ;;  %v1232_v11 = vsel %vm502_vm4, %v1231_v62, %v1230_v27  ;;  %v1235_v13 = vrot.slane %v1212_v1, 4 }
 0x819   :  { %v1197_v4 = vpop.permute.xlu1 %1196 }
 0x81a   :  { %v1233_v3 = vrot.slane %v1211_v61, 5  ;;  %v1214_v24 = vmul.f32 %v1197_v4, %v1166_v26 }
 0x81b   :  { %v1195_v7 = vpop.permute.xlu0 %1194 }
 0x81c   :  { %v1234_v16 = vsel %vm505_vm5, %v1233_v3, %v1232_v11  ;;  %v1213_v10 = vmul.f32 %v1195_v7, %v1165_v19  ;;  %v1239_v33 = vrot.slane %v1214_v24, 2 }
 0x81d   :  { %v1236_v17 = vsel %vm508_vm6, %v1235_v13, %v1234_v16 }
 0x81e   :  { %v1237_v18 = vrot.slane %v1213_v10, 3 }
 0x81f   :  { %v1199_v23 = vpop.permute.xlu0 %1198 }
 0x820   :  { %v1215_v28 = vmul.f32 %v1199_v23, %v1167_v22  ;;  %v1238_v29 = vsel %vm511_vm7, %v1237_v18, %v1236_v17 }
 0x821   :  { %v1240_v32 = vsel %vm514_vm8, %v1239_v33, %v1238_v29 }
 0x822   :  { %v1241_v31 = vrot.slane %v1215_v28, 1 }
 0x824   :  { %v1242_v30 = vsel %vm517_vm9, %v1241_v31, %v1240_v32 }
 0x825   :  { %1243 = vrot.lane.b32.xlu0 %v1242_v30, %s3887_s4 }
 0x82a   :  { %v1219_v35 = vpop.permute.xlu1 %1218 }
 0x82b   :  { %vm1220_vm0 = vcmp.eq.s32.totalorder %v1219_v35, 1 }
 0x82e   :  { %v1270_v63 = vpop.permute.xlu1 %1269 }
 0x82f   :  { %v4366_v1 = vsel %vm1220_vm0, %v1270_v63, %v4252_v0 }
 0x830   :  { %v1395_v3 = vrot.slane %v4366_v1, 1  ;;  %v1396_v4 = vrot.slane %v4366_v1, 2  ;;  %v1397_v19 = vrot.slane %v4366_v1, 3  ;;  %v1400_v0 = vrot.slane %v4366_v1, 6 }
 0x831   :  { %v1398_v11 = vrot.slane %v4366_v1, 4  ;;  %v1401_v26 = vrot.slane %v4366_v1, 7  ;;  %v1399_v7 = vrot.slane %v4366_v1, 5 }
 0x897   :  { %v1244_v36 = vpop.permute.xlu0 %1243 }
 0x898   :  { %v4348_v37 = vsel %vm1220_vm0, %v1244_v36, %v4234_v25 }
 0x899   :  { %3470 = vmatmul.mubr.msk.f32.vlgmr.msra.gmra.mrb[4].mxu1 %vm219_vm12, %v4348_v37 }
 0x89a   :  { %3581 = vmatpush3.bf16.msra.mxu1 %v3972_v9  ;;  %3491 = vmatprep.mubr.msk.f32.mxu1 %vm3884_vm1, %v3885_v6 }
 0x89b   :  { %3582 = vmatprep.subr.bf16.mxu1 %v3883_v2 }
 0x89e   :  { %3584 = vmatpush3.bf16.msra.mxu1 %v3981_v12 }
 0x89f   :  { %3591 = vmatprep.subr.bf16.mxu1 %v3883_v2 }
 0x96c   :  { %v1350_v38 = vpop.f32.mrb[4].mxu1 }
 0x96d   :  { %v1355_v40 = vrot.slane %v1350_v38, 1  ;;  %v1356_v41 = vrot.slane %v1350_v38, 2  ;;  %v3471_v25 = vpop.f32.mrb[5].mxu1  ;;  %v1357_v43 = vrot.slane %v1350_v38, 3  ;;  %v1370_v44 = vadd.f32 %v1350_v38, %v1273_v39 }
 0x96e   :  { %v1358_v47 = vrot.slane %v1350_v38, 4  ;;  %v1359_v50 = vrot.slane %v1350_v38, 5  ;;  %v1360_v52 = vrot.slane %v1350_v38, 6  ;;  %v1361_v8 = vrot.slane %v1350_v38, 7 }
 0x96f   :  { %v1372_v46 = vadd.f32 %v1356_v41, %v1275_v42  ;;  %v1371_v48 = vadd.f32 %v1355_v40, %v1274_v45  ;;  %3717 = vtanh.f32 %v1370_v44  ;;  %v1373_v51 = vadd.f32 %v1357_v43, %v1276_v49 }
 0x970   :  { %v1374_v53 = vadd.f32 %v1358_v47, %v1277_v34  ;;  %v1375_v56 = vadd.f32 %v1359_v50, %v1278_v54  ;;  %v1376_v14 = vadd.f32 %v1360_v52, %v1279_v58  ;;  %v1377_v59 = vadd.f32 %v1361_v8, %v1280_v15 }
 0x971   :  { %3719 = vtanh.f32 %v1372_v46 }
 0x972   :  { %3721 = vtanh.f32 %v1371_v48 }
 0x973   :  { %3723 = vtanh.f32 %v1373_v51 }
 0x974   :  { %3725 = vtanh.f32 %v1374_v53 }
 0x975   :  { %3727 = vtanh.f32 %v1375_v56 }
 0x976   :  { %3729 = vtanh.f32 %v1376_v14 }
 0x977   :  { %3731 = vtanh.f32 %v1377_v59 }
 0x979   :  { %v3718_v20 = vpop.eup %3717 }
 0x97a   :  { %1442 = vrot.lane.b32.xlu0 %v3718_v20, %s3886_s0  ;;  %v4386_v16 = vadd.f32 1.0, %v3718_v20 }
 0x97b   :  { %v3720_v60 = vpop.eup %3719 }
 0x97c   :  { %1446 = vrot.lane.b32.xlu1 %v3720_v60, %s3886_s0  ;;  %v3722_v21 = vpop.eup %3721  ;;  %v4395_v29 = vadd.f32 1.0, %v3720_v60 }
 0x97d   :  { %v3724_v62 = vpop.eup %3723  ;;  %v4390_v18 = vadd.f32 1.0, %v3722_v21 }
 0x97e   :  { %1444 = vrot.lane.b32.xlu0 %v3722_v21, %s3886_s0  ;;  %v3726_v5 = vpop.eup %3725  ;;  %v4393_v17 = vadd.f32 1.0, %v3724_v62 }
 0x97f   :  { %v3728_v55 = vpop.eup %3727  ;;  %v4400_v30 = vadd.f32 1.0, %v3726_v5 }
 0x980   :  { %1448 = vrot.lane.b32.xlu1 %v3724_v62, %s3886_s0  ;;  %v3730_v61 = vpop.eup %3729  ;;  %v4407_v40 = vadd.f32 1.0, %v3728_v55 }
 0x981   :  { %v3732_v27 = vpop.eup %3731  ;;  %v4405_v38 = vadd.f32 1.0, %v3730_v61 }
 0x982   :  { %1450 = vrot.lane.b32.xlu0 %v3726_v5, %s3886_s0  ;;  %v4413_v43 = vadd.f32 1.0, %v3732_v27 }
 0x984   :  { %1452 = vrot.lane.b32.xlu1 %v3728_v55, %s3886_s0 }
 0x986   :  { %1454 = vrot.lane.b32.xlu0 %v3730_v61, %s3886_s0 }
 0x988   :  { %1456 = vrot.lane.b32.xlu1 %v3732_v27, %s3886_s0 }
 0x98a   :  { %1404 = vrot.lane.b32.xlu0 %v1395_v3, %s3887_s4 }
 0x98c   :  { %1406 = vrot.lane.b32.xlu1 %v1396_v4, %s3887_s4 }
 0x98e   :  { %1402 = vrot.lane.b32.xlu0 %v4366_v1, %s3887_s4 }
 0x990   :  { %1408 = vrot.lane.b32.xlu1 %v1397_v19, %s3887_s4 }
 0x992   :  { %1414 = vrot.lane.b32.xlu0 %v1400_v0, %s3887_s4 }
 0x994   :  { %1410 = vrot.lane.b32.xlu1 %v1398_v11, %s3887_s4 }
 0x996   :  { %1416 = vrot.lane.b32.xlu0 %v1401_v26, %s3887_s4 }
 0x998   :  { %1412 = vrot.lane.b32.xlu1 %v1399_v7, %s3887_s4 }
 0x9ec   :  { %v1443_v10 = vpop.permute.xlu0 %1442 }
 0x9ed   :  { %v1466_v13 = vmul.f32 %v1443_v10, %v4386_v16 }
 0x9ee   :  { %v1447_v24 = vpop.permute.xlu1 %1446 }
 0x9ef   :  { %1482 = vrot.lane.b32.xlu0 %v1466_v13, %s3887_s4  ;;  %v1468_v32 = vmul.f32 %v1447_v24, %v4395_v29 }
 0x9f0   :  { %v1445_v22 = vpop.permute.xlu0 %1444 }
 0x9f1   :  { %v1467_v23 = vmul.f32 %v1445_v22, %v4390_v18 }
 0x9f2   :  { %v1449_v28 = vpop.permute.xlu1 %1448 }
 0x9f3   :  { %v1469_v33 = vmul.f32 %v1449_v28, %v4393_v17  ;;  %1484 = vrot.lane.b32.xlu0 %v1467_v23, %s3887_s4 }
 0x9f4   :  { %v1451_v31 = vpop.permute.xlu0 %1450 }
 0x9f5   :  { %1488 = vrot.lane.b32.xlu1 %v1469_v33, %s3887_s4  ;;  %v1470_v36 = vmul.f32 %v1451_v31, %v4400_v30 }
 0x9f6   :  { %v1453_v35 = vpop.permute.xlu1 %1452 }
 0x9f7   :  { %1486 = vrot.lane.b32.xlu0 %v1468_v32, %s3887_s4  ;;  %v1471_v25 = vmul.f32 %v1453_v35, %v4407_v40 }
 0x9f8   :  { %v1455_v39 = vpop.permute.xlu0 %1454 }
 0x9f9   :  { %v1472_v41 = vmul.f32 %v1455_v39, %v4405_v38  ;;  %1490 = vrot.lane.b32.xlu1 %v1470_v36, %s3887_s4 }
 0x9fa   :  { %v1457_v42 = vpop.permute.xlu1 %1456 }
 0x9fb   :  { %1494 = vrot.lane.b32.xlu0 %v1472_v41, %s3887_s4  ;;  %v1473_v44 = vmul.f32 %v1457_v42, %v4413_v43 }
 0x9fc   :  { %v1405_v45 = vpop.permute.xlu0 %1404 }
 0x9fd   :  { %1492 = vrot.lane.b32.xlu1 %v1471_v25, %s3887_s4  ;;  %v1427_v8 = vmul.f32 %v1405_v45, %v4390_v18 }
 0x9fe   :  { %v1407_v46 = vpop.permute.xlu1 %1406 }
 0x9ff   :  { %v1428_v20 = vmul.f32 %v1407_v46, %v4395_v29 }
 0xa00   :  { %v1403_v47 = vpop.permute.xlu0 %1402 }
 0xa01   :  { %1496 = vrot.lane.b32.xlu1 %v1473_v44, %s3887_s4  ;;  %v1426_v34 = vmul.f32 %v1403_v47, %v4386_v16  ;;  %v4436_v47 = vld [vmem:[%s4954_s1] sm:$0xff] }
 0xa02   :  { %v1409_v48 = vpop.permute.xlu1 %1408  ;;  %vm206_vm2 = vcmp.gt.s32.totalorder %v4436_v47, 3  ;;  %vm207_vm11 = vcmp.gt.s32.totalorder %v4436_v47, 4  ;;  %vm208_vm14 = vcmp.gt.s32.totalorder %v4436_v47, 5 }
 0xa03   :  { %v1429_v59 = vmul.f32 %v1409_v48, %v4393_v17 }
 0xa04   :  { %v1415_v49 = vpop.permute.xlu0 %1414 }
 0xa05   :  { %v1432_v61 = vmul.f32 %v1415_v49, %v4405_v38 }
 0xa06   :  { %v1411_v50 = vpop.permute.xlu1 %1410 }
 0xa07   :  { %v1430_v63 = vmul.f32 %v1411_v50, %v4400_v30 }
 0xa08   :  { %v1417_v51 = vpop.permute.xlu0 %1416 }
 0xa09   :  { %v1433_v22 = vmul.f32 %v1417_v51, %v4413_v43 }
 0xa0a   :  { %v1413_v54 = vpop.permute.xlu1 %1412 }
 0xa0b   :  { %v1431_v19 = vmul.f32 %v1413_v54, %v4407_v40 }
 0xa61   :  { %v1483_v52 = vpop.permute.xlu0 %1482 }
 0xa62   :  { %v1506_v53 = vadd.f32 %v1483_v52, %v1426_v34  ;;  %v1578_v34 = vsel %vm206_vm2, 1, %v3888_v57 }
 0xa64   :  { %v1514_v56 = vmul.f32 0.5, %v1506_v53 }
 0xa65   :  { %v1485_v58 = vpop.permute.xlu0 %1484 }
 0xa66   :  { %3733 = vtanh.f32 %v1514_v56  ;;  %v1507_v14 = vadd.f32 %v1485_v58, %v1427_v8 }
 0xa67   :  { %v1489_v15 = vpop.permute.xlu1 %1488 }
 0xa68   :  { %v1515_v60 = vmul.f32 0.5, %v1507_v14  ;;  %v1509_v62 = vadd.f32 %v1489_v15, %v1429_v59  ;;  %v1523_v59 = vmul.f32 0.5, %v4390_v18 }
 0xa69   :  { %v1487_v21 = vpop.permute.xlu0 %1486 }
 0xa6a   :  { %3735 = vtanh.f32 %v1515_v60  ;;  %v1508_v5 = vadd.f32 %v1487_v21, %v1428_v20  ;;  %v1517_v0 = vmul.f32 0.5, %v1509_v62  ;;  %v1617_v35 = vrot.slane %v1515_v60, 7 }
 0xa6b   :  { %v1491_v55 = vpop.permute.xlu1 %1490  ;;  %v1524_v21 = vmul.f32 0.5, %v4395_v29  ;;  %v1527_v29 = vmul.f32 0.5, %v4407_v40 }
 0xa6c   :  { %v1516_v27 = vmul.f32 0.5, %v1508_v5  ;;  %v1510_v3 = vadd.f32 %v1491_v55, %v1430_v63  ;;  %v1618_v25 = vsel %vm499_vm3, %v1617_v35, %v1514_v56  ;;  %v1621_v45 = vrot.slane %v1517_v0, 5 }
 0xa6d   :  { %v1495_v4 = vpop.permute.xlu0 %1494  ;;  %v1522_v63 = vmul.f32 0.5, %v4386_v16  ;;  %v1528_v16 = vmul.f32 0.5, %v4405_v38 }
 0xa6e   :  { %3737 = vtanh.f32 %v1516_v27  ;;  %v1512_v11 = vadd.f32 %v1495_v4, %v1432_v61  ;;  %v1518_v26 = vmul.f32 0.5, %v1510_v3  ;;  %v1619_v39 = vrot.slane %v1516_v27, 6 }
 0xa6f   :  { %v1493_v7 = vpop.permute.xlu1 %1492  ;;  %v1525_v27 = vmul.f32 0.5, %v4393_v17  ;;  %v1526_v4 = vmul.f32 0.5, %v4400_v30 }
 0xa70   :  { %v3734_v10 = vpop.eup %3733  ;;  %v1511_v13 = vadd.f32 %v1493_v7, %v1431_v19  ;;  %3739 = vtanh.f32 %v1518_v26  ;;  %v1520_v24 = vmul.f32 0.5, %v1512_v11  ;;  %v1620_v44 = vsel %vm502_vm4, %v1619_v39, %v1618_v25 }
 0xa71   :  { %1546 = vrot.lane.b32.xlu0 %v3734_v10, %s3886_s0  ;;  %3741 = vtanh.f32 %v1517_v0  ;;  %v1623_v46 = vrot.slane %v1518_v26, 4  ;;  %v1622_v49 = vsel %vm505_vm5, %v1621_v45, %v1620_v44  ;;  %v1635_v45 = vld [vmem:[#allocation2 + $0x4] sm:$0x1] }
 0xa72   :  { %v1519_v23 = vmul.f32 0.5, %v1511_v13  ;;  %3743 = vtanh.f32 %v1520_v24  ;;  %v1627_v56 = vrot.slane %v1520_v24, 2 }
 0xa73   :  { %v1497_v28 = vpop.permute.xlu1 %1496  ;;  %v1624_v52 = vsel %vm508_vm6, %v1623_v46, %v1622_v49  ;;  %v1637_v49 = vld [vmem:[#allocation2 + $0x14] sm:$0x1] }
 0xa74   :  { %v3736_v33 = vpop.eup %3735  ;;  %v1513_v31 = vadd.f32 %v1497_v28, %v1433_v22  ;;  %3745 = vtanh.f32 %v1519_v23  ;;  %v1625_v50 = vrot.slane %v1519_v23, 3 }
 0xa75   :  { %1548 = vrot.lane.b32.xlu0 %v3736_v33, %s3886_s0  ;;  %v1529_v33 = vmul.f32 0.5, %v4413_v43 }
 0xa76   :  { %v1521_v32 = vmul.f32 0.5, %v1513_v31  ;;  %v1626_v54 = vsel %vm511_vm7, %v1625_v50, %v1624_v52 }
 0xa77   :  { %v1628_v58 = vsel %vm514_vm8, %v1627_v56, %v1626_v54 }
 0xa78   :  { %v3738_v36 = vpop.eup %3737  ;;  %3747 = vtanh.f32 %v1521_v32  ;;  %v1629_v53 = vrot.slane %v1521_v32, 1 }
 0xa79   :  { %1550 = vrot.lane.b32.xlu1 %v3738_v36, %s3886_s0 }
 0xa7a   :  { %v3740_v41 = vpop.eup %3739  ;;  %v1630_v14 = vsel %vm517_vm9, %v1629_v53, %v1628_v58 }
 0xa7b   :  { %v3742_v42 = vpop.eup %3741  ;;  %1554 = vrot.lane.b32.xlu0 %v3740_v41, %s3886_s0 }
 0xa7c   :  { %v3744_v48 = vpop.eup %3743 }
 0xa7d   :  { %1552 = vrot.lane.b32.xlu1 %v3742_v42, %s3886_s0 }
 0xa7e   :  { %v3746_v51 = vpop.eup %3745 }
 0xa7f   :  { %1558 = vrot.lane.b32.xlu0 %v3744_v48, %s3886_s0 }
 0xa81   :  { %1556 = vrot.lane.b32.xlu1 %v3746_v51, %s3886_s0 }
 0xa82   :  { %v3748_v8 = vpop.eup %3747 }
 0xa83   :  { %1580 = vperm.xlu0 %3619, %v1578_v34   ;;  %v1636_v34 = vld [vmem:[#allocation2 + $0xc] sm:$0x1] }
 0xa85   :  { %1560 = vrot.lane.b32.xlu1 %v3748_v8, %s3886_s0  ;;  %v1638_v8 = vld [vmem:[#allocation2 + $0x1c] sm:$0x1] }
 0xa87   :  { %1631 = vrot.lane.b32.xlu0 %v1630_v14, %s3889_s30  ;;  %v1639_v14 = vld [vmem:[#allocation2 + $0x24] sm:$0x1] }
 0xae3   :  { %v1547_v15 = vpop.permute.xlu0 %1546 }
 0xae4   :  { %v1570_v0 = vmul.f32 %v1547_v15, %v1522_v63  ;;  %v1642_v63 = vld [vmem:[#allocation2 + $0x3c] sm:$0x1] }
 0xae7   :  { %v1549_v20 = vpop.permute.xlu0 %1548 }
 0xae8   :  { %v1571_v60 = vmul.f32 %v1549_v20, %v1523_v59  ;;  %v1640_v59 = vld [vmem:[#allocation2 + $0x2c] sm:$0x1] }
 0xaea   :  { %v1591_v55 = vrot.slane %v1571_v60, 7 }
 0xaeb   :  { %v1551_v62 = vpop.permute.xlu1 %1550 }
 0xaec   :  { %v1572_v5 = vmul.f32 %v1551_v62, %v1524_v21  ;;  %v1592_v18 = vsel %vm499_vm3, %v1591_v55, %v1570_v0  ;;  %v1641_v62 = vld [vmem:[#allocation2 + $0x34] sm:$0x1] }
 0xaed   :  { %v1555_v61 = vpop.permute.xlu0 %1554 }
 0xaee   :  { %v1593_v3 = vrot.slane %v1572_v5, 6  ;;  %v1574_v26 = vmul.f32 %v1555_v61, %v1526_v4 }
 0xaef   :  { %v1553_v19 = vpop.permute.xlu1 %1552 }
 0xaf0   :  { %v1573_v11 = vmul.f32 %v1553_v19, %v1525_v27  ;;  %v1594_v13 = vsel %vm502_vm4, %v1593_v3, %v1592_v18  ;;  %v1597_v23 = vrot.slane %v1574_v26, 4 }
 0xaf1   :  { %v1559_v10 = vpop.permute.xlu0 %1558 }
 0xaf2   :  { %v1595_v7 = vrot.slane %v1573_v11, 5  ;;  %v1576_v30 = vmul.f32 %v1559_v10, %v1528_v16 }
 0xaf3   :  { %v1557_v24 = vpop.permute.xlu1 %1556 }
 0xaf4   :  { %v1596_v17 = vsel %vm505_vm5, %v1595_v7, %v1594_v13  ;;  %v1575_v22 = vmul.f32 %v1557_v24, %v1527_v29  ;;  %v1601_v40 = vrot.slane %v1576_v30, 2 }
 0xaf5   :  { %v1598_v31 = vsel %vm508_vm6, %v1597_v23, %v1596_v17 }
 0xaf6   :  { %v1599_v28 = vrot.slane %v1575_v22, 3 }
 0xaf7   :  { %v1561_v32 = vpop.permute.xlu1 %1560 }
 0xaf8   :  { %v1600_v35 = vsel %vm511_vm7, %v1599_v28, %v1598_v31  ;;  %v1577_v36 = vmul.f32 %v1561_v32, %v1529_v33 }
 0xaf9   :  { %v1602_v41 = vsel %vm514_vm8, %v1601_v40, %v1600_v35 }
 0xafa   :  { %v1603_v39 = vrot.slane %v1577_v36, 1 }
 0xafc   :  { %v1604_v38 = vsel %vm517_vm9, %v1603_v39, %v1602_v41 }
 0xafd   :  { %1605 = vrot.lane.b32.xlu1 %v1604_v38, %s3887_s4 }
 0xb02   :  { %v1581_v25 = vpop.permute.xlu0 %1580 }
 0xb03   :  { %vm1582_vm10 = vcmp.eq.s32.totalorder %v1581_v25, 1 }
 0xb06   :  { %v1632_v0 = vpop.permute.xlu0 %1631 }
 0xb07   :  { %v4485_v18 = vsel %vm1582_vm10, %v1632_v0, %v4366_v1 }
 0xb08   :  { %v1757_v10 = vrot.slane %v4485_v18, 1  ;;  %v1758_v29 = vrot.slane %v4485_v18, 2  ;;  %v1759_v13 = vrot.slane %v4485_v18, 3  ;;  %v1762_v1 = vrot.slane %v4485_v18, 6 }
 0xb09   :  { %v1760_v16 = vrot.slane %v4485_v18, 4  ;;  %v1763_v24 = vrot.slane %v4485_v18, 7  ;;  %v1761_v17 = vrot.slane %v4485_v18, 5 }
 0xb6f   :  { %v1606_v42 = vpop.permute.xlu1 %1605 }
 0xb70   :  { %v4467_v43 = vsel %vm1582_vm10, %v1606_v42, %v4348_v37 }
 0xb71   :  { %3481 = vmatmul.mubr.msk.f32.vlgmr.msra.gmra.mrb[10].mxu0 %vm219_vm12, %v4467_v43 }
 0xb72   :  { %3587 = vmatpush3.bf16.msra.mxu0 %v3972_v9  ;;  %3502 = vmatprep.mubr.msk.f32.mxu0 %vm3884_vm1, %v3885_v6 }
 0xb73   :  { %3588 = vmatprep.subr.bf16.mxu0 %v3883_v2 }
 0xb76   :  { %3590 = vmatpush3.bf16.msra.mxu0 %v3981_v12 }
 0xb77   :  { %3597 = vmatprep.subr.bf16.mxu0 %v3883_v2 }
 0xc44   :  { %v1712_v44 = vpop.f32.mrb[10].mxu0 }
 0xc45   :  { %v1717_v46 = vrot.slane %v1712_v44, 1  ;;  %v1718_v48 = vrot.slane %v1712_v44, 2  ;;  %v3482_v37 = vpop.f32.mrb[11].mxu0  ;;  %v1719_v50 = vrot.slane %v1712_v44, 3  ;;  %v1732_v51 = vadd.f32 %v1712_v44, %v1635_v45 }
 0xc46   :  { %v1720_v53 = vrot.slane %v1712_v44, 4  ;;  %v1721_v56 = vrot.slane %v1712_v44, 5  ;;  %v1722_v15 = vrot.slane %v1712_v44, 6  ;;  %v1723_v60 = vrot.slane %v1712_v44, 7 }
 0xc47   :  { %v1734_v52 = vadd.f32 %v1718_v48, %v1637_v49  ;;  %v1733_v54 = vadd.f32 %v1717_v46, %v1636_v34  ;;  %3749 = vtanh.f32 %v1732_v51  ;;  %v1735_v58 = vadd.f32 %v1719_v50, %v1638_v8 }
 0xc48   :  { %v1736_v20 = vadd.f32 %v1720_v53, %v1639_v14  ;;  %v1737_v21 = vadd.f32 %v1721_v56, %v1640_v59  ;;  %v1738_v5 = vadd.f32 %v1722_v15, %v1641_v62  ;;  %v1739_v61 = vadd.f32 %v1723_v60, %v1642_v63 }
 0xc49   :  { %3751 = vtanh.f32 %v1734_v52 }
 0xc4a   :  { %3753 = vtanh.f32 %v1733_v54 }
 0xc4b   :  { %3755 = vtanh.f32 %v1735_v58 }
 0xc4c   :  { %3757 = vtanh.f32 %v1736_v20 }
 0xc4d   :  { %3759 = vtanh.f32 %v1737_v21 }
 0xc4e   :  { %3761 = vtanh.f32 %v1738_v5 }
 0xc4f   :  { %3763 = vtanh.f32 %v1739_v61 }
 0xc51   :  { %v3750_v55 = vpop.eup %3749 }
 0xc52   :  { %1804 = vrot.lane.b32.xlu1 %v3750_v55, %s3886_s0  ;;  %v4505_v22 = vadd.f32 1.0, %v3750_v55 }
 0xc53   :  { %v3752_v27 = vpop.eup %3751 }
 0xc54   :  { %1808 = vrot.lane.b32.xlu0 %v3752_v27, %s3886_s0  ;;  %v3754_v3 = vpop.eup %3753  ;;  %v4514_v40 = vadd.f32 1.0, %v3752_v27 }
 0xc55   :  { %v3756_v4 = vpop.eup %3755  ;;  %v4509_v33 = vadd.f32 1.0, %v3754_v3 }
 0xc56   :  { %1806 = vrot.lane.b32.xlu1 %v3754_v3, %s3886_s0  ;;  %v3758_v19 = vpop.eup %3757  ;;  %v4512_v35 = vadd.f32 1.0, %v3756_v4 }
 0xc57   :  { %v3760_v11 = vpop.eup %3759  ;;  %v4519_v25 = vadd.f32 1.0, %v3758_v19 }
 0xc58   :  { %1810 = vrot.lane.b32.xlu0 %v3756_v4, %s3886_s0  ;;  %v3762_v26 = vpop.eup %3761  ;;  %v4526_v48 = vadd.f32 1.0, %v3760_v11 }
 0xc59   :  { %v3764_v7 = vpop.eup %3763  ;;  %v4524_v45 = vadd.f32 1.0, %v3762_v26 }
 0xc5a   :  { %1812 = vrot.lane.b32.xlu1 %v3758_v19, %s3886_s0  ;;  %v4532_v51 = vadd.f32 1.0, %v3764_v7 }
 0xc5c   :  { %1814 = vrot.lane.b32.xlu0 %v3760_v11, %s3886_s0 }
 0xc5e   :  { %1816 = vrot.lane.b32.xlu1 %v3762_v26, %s3886_s0 }
 0xc60   :  { %1818 = vrot.lane.b32.xlu0 %v3764_v7, %s3886_s0 }
 0xc62   :  { %1766 = vrot.lane.b32.xlu1 %v1757_v10, %s3887_s4 }
 0xc64   :  { %1768 = vrot.lane.b32.xlu0 %v1758_v29, %s3887_s4 }
 0xc66   :  { %1764 = vrot.lane.b32.xlu1 %v4485_v18, %s3887_s4 }
 0xc68   :  { %1770 = vrot.lane.b32.xlu0 %v1759_v13, %s3887_s4 }
 0xc6a   :  { %1776 = vrot.lane.b32.xlu1 %v1762_v1, %s3887_s4 }
 0xc6c   :  { %1772 = vrot.lane.b32.xlu0 %v1760_v16, %s3887_s4 }
 0xc6e   :  { %1778 = vrot.lane.b32.xlu1 %v1763_v24, %s3887_s4 }
 0xc70   :  { %1774 = vrot.lane.b32.xlu0 %v1761_v17, %s3887_s4 }
 0xcc4   :  { %v1805_v23 = vpop.permute.xlu1 %1804 }
 0xcc5   :  { %v1828_v30 = vmul.f32 %v1805_v23, %v4505_v22 }
 0xcc6   :  { %v1809_v28 = vpop.permute.xlu0 %1808 }
 0xcc7   :  { %1844 = vrot.lane.b32.xlu1 %v1828_v30, %s3887_s4  ;;  %v1830_v38 = vmul.f32 %v1809_v28, %v4514_v40 }
 0xcc8   :  { %v1807_v31 = vpop.permute.xlu1 %1806 }
 0xcc9   :  { %v1829_v32 = vmul.f32 %v1807_v31, %v4509_v33 }
 0xcca   :  { %v1811_v36 = vpop.permute.xlu0 %1810 }
 0xccb   :  { %v1831_v39 = vmul.f32 %v1811_v36, %v4512_v35  ;;  %1846 = vrot.lane.b32.xlu1 %v1829_v32, %s3887_s4 }
 0xccc   :  { %v1813_v41 = vpop.permute.xlu1 %1812 }
 0xccd   :  { %1850 = vrot.lane.b32.xlu0 %v1831_v39, %s3887_s4  ;;  %v1832_v44 = vmul.f32 %v1813_v41, %v4519_v25 }
 0xcce   :  { %v1815_v42 = vpop.permute.xlu0 %1814 }
 0xccf   :  { %1848 = vrot.lane.b32.xlu1 %v1830_v38, %s3887_s4  ;;  %v1833_v49 = vmul.f32 %v1815_v42, %v4526_v48 }
 0xcd0   :  { %v1817_v46 = vpop.permute.xlu1 %1816 }
 0xcd1   :  { %v1834_v37 = vmul.f32 %v1817_v46, %v4524_v45  ;;  %1852 = vrot.lane.b32.xlu0 %v1832_v44, %s3887_s4 }
 0xcd2   :  { %v1819_v50 = vpop.permute.xlu0 %1818 }
 0xcd3   :  { %1856 = vrot.lane.b32.xlu1 %v1834_v37, %s3887_s4  ;;  %v1835_v34 = vmul.f32 %v1819_v50, %v4532_v51 }
 0xcd4   :  { %v1767_v52 = vpop.permute.xlu1 %1766 }
 0xcd5   :  { %1854 = vrot.lane.b32.xlu0 %v1833_v49, %s3887_s4  ;;  %v1789_v21 = vmul.f32 %v1767_v52, %v4509_v33 }
 0xcd6   :  { %v1769_v53 = vpop.permute.xlu0 %1768 }
 0xcd7   :  { %v1790_v61 = vmul.f32 %v1769_v53, %v4514_v40 }
 0xcd8   :  { %v1765_v54 = vpop.permute.xlu1 %1764 }
 0xcd9   :  { %1858 = vrot.lane.b32.xlu0 %v1835_v34, %s3887_s4  ;;  %v1788_v15 = vmul.f32 %v1765_v54, %v4505_v22 }
 0xcda   :  { %v1771_v8 = vpop.permute.xlu0 %1770 }
 0xcdb   :  { %v1791_v27 = vmul.f32 %v1771_v8, %v4512_v35 }
 0xcdc   :  { %v1777_v56 = vpop.permute.xlu1 %1776 }
 0xcdd   :  { %v1794_v7 = vmul.f32 %v1777_v56, %v4524_v45 }
 0xcde   :  { %v1773_v58 = vpop.permute.xlu0 %1772 }
 0xcdf   :  { %v1792_v11 = vmul.f32 %v1773_v58, %v4519_v25 }
 0xce0   :  { %v1779_v14 = vpop.permute.xlu1 %1778 }
 0xce1   :  { %v1795_v32 = vmul.f32 %v1779_v14, %v4532_v51 }
 0xce2   :  { %v1775_v60 = vpop.permute.xlu0 %1774 }
 0xce3   :  { %v1793_v1 = vmul.f32 %v1775_v60, %v4526_v48 }
 0xd39   :  { %v1845_v20 = vpop.permute.xlu1 %1844 }
 0xd3a   :  { %v1868_v59 = vadd.f32 %v1845_v20, %v1788_v15  ;;  %v1940_v15 = vsel %vm207_vm11, 1, %v3888_v57 }
 0xd3c   :  { %v1876_v62 = vmul.f32 0.5, %v1868_v59 }
 0xd3d   :  { %v1847_v5 = vpop.permute.xlu1 %1846 }
 0xd3e   :  { %3765 = vtanh.f32 %v1876_v62  ;;  %v1869_v63 = vadd.f32 %v1847_v5, %v1789_v21 }
 0xd3f   :  { %v1851_v55 = vpop.permute.xlu0 %1850 }
 0xd40   :  { %v1877_v3 = vmul.f32 0.5, %v1869_v63  ;;  %v1871_v19 = vadd.f32 %v1851_v55, %v1791_v27  ;;  %v1885_v27 = vmul.f32 0.5, %v4509_v33 }
 0xd41   :  { %v1849_v4 = vpop.permute.xlu1 %1848 }
 0xd42   :  { %3767 = vtanh.f32 %v1877_v3  ;;  %v1870_v0 = vadd.f32 %v1849_v4, %v1790_v61  ;;  %v1879_v16 = vmul.f32 0.5, %v1871_v19  ;;  %v1979_v44 = vrot.slane %v1877_v3, 7 }
 0xd43   :  { %v1853_v26 = vpop.permute.xlu0 %1852  ;;  %v1886_v4 = vmul.f32 0.5, %v4514_v40  ;;  %v1889_v40 = vmul.f32 0.5, %v4526_v48 }
 0xd44   :  { %v1878_v10 = vmul.f32 0.5, %v1870_v0  ;;  %v1872_v29 = vadd.f32 %v1853_v26, %v1792_v11  ;;  %v1980_v50 = vsel %vm499_vm3, %v1979_v44, %v1876_v62  ;;  %v1983_v53 = vrot.slane %v1879_v16, 5 }
 0xd45   :  { %v1857_v13 = vpop.permute.xlu1 %1856  ;;  %v1884_v11 = vmul.f32 0.5, %v4505_v22  ;;  %v1890_v22 = vmul.f32 0.5, %v4524_v45 }
 0xd46   :  { %3769 = vtanh.f32 %v1878_v10  ;;  %v1874_v24 = vadd.f32 %v1857_v13, %v1794_v7  ;;  %v1880_v17 = vmul.f32 0.5, %v1872_v29  ;;  %v1981_v37 = vrot.slane %v1878_v10, 6 }
 0xd47   :  { %v1855_v23 = vpop.permute.xlu0 %1854  ;;  %v1887_v10 = vmul.f32 0.5, %v4512_v35  ;;  %v1888_v13 = vmul.f32 0.5, %v4519_v25 }
 0xd48   :  { %v3766_v30 = vpop.eup %3765  ;;  %v1873_v28 = vadd.f32 %v1855_v23, %v1793_v1  ;;  %3771 = vtanh.f32 %v1880_v17  ;;  %v1882_v31 = vmul.f32 0.5, %v1874_v24  ;;  %v1982_v52 = vsel %vm502_vm4, %v1981_v37, %v1980_v50 }
 0xd49   :  { %1908 = vrot.lane.b32.xlu1 %v3766_v30, %s3886_s0  ;;  %3773 = vtanh.f32 %v1879_v16  ;;  %v1985_v54 = vrot.slane %v1880_v17, 4  ;;  %v1984_v56 = vsel %vm505_vm5, %v1983_v53, %v1982_v52  ;;  %v1997_v53 = vld [vmem:[#allocation2 + $0x5] sm:$0x1] }
 0xd4a   :  { %v1881_v36 = vmul.f32 0.5, %v1873_v28  ;;  %3775 = vtanh.f32 %v1882_v31  ;;  %v1989_v62 = vrot.slane %v1882_v31, 2 }
 0xd4b   :  { %v1859_v39 = vpop.permute.xlu0 %1858  ;;  %v1986_v20 = vsel %vm508_vm6, %v1985_v54, %v1984_v56  ;;  %v1999_v56 = vld [vmem:[#allocation2 + $0x15] sm:$0x1] }
 0xd4c   :  { %v3768_v41 = vpop.eup %3767  ;;  %v1875_v38 = vadd.f32 %v1859_v39, %v1795_v32  ;;  %3777 = vtanh.f32 %v1881_v36  ;;  %v1987_v58 = vrot.slane %v1881_v36, 3 }
 0xd4d   :  { %1910 = vrot.lane.b32.xlu1 %v3768_v41, %s3886_s0  ;;  %v1891_v41 = vmul.f32 0.5, %v4532_v51 }
 0xd4e   :  { %v1883_v42 = vmul.f32 0.5, %v1875_v38  ;;  %v1988_v60 = vsel %vm511_vm7, %v1987_v58, %v1986_v20 }
 0xd4f   :  { %v1990_v5 = vsel %vm514_vm8, %v1989_v62, %v1988_v60  ;;  %v2000_v60 = vld [vmem:[#allocation2 + $0x1d] sm:$0x1] }
 0xd50   :  { %v3770_v46 = vpop.eup %3769  ;;  %3779 = vtanh.f32 %v1883_v42  ;;  %v1991_v59 = vrot.slane %v1883_v42, 1 }
 0xd51   :  { %1912 = vrot.lane.b32.xlu0 %v3770_v46, %s3886_s0 }
 0xd52   :  { %v3772_v49 = vpop.eup %3771  ;;  %v1992_v63 = vsel %vm517_vm9, %v1991_v59, %v1990_v5 }
 0xd53   :  { %v3774_v34 = vpop.eup %3773  ;;  %1916 = vrot.lane.b32.xlu1 %v3772_v49, %s3886_s0 }
 0xd54   :  { %v3776_v8 = vpop.eup %3775 }
 0xd55   :  { %1914 = vrot.lane.b32.xlu0 %v3774_v34, %s3886_s0 }
 0xd56   :  { %v3778_v14 = vpop.eup %3777 }
 0xd57   :  { %1920 = vrot.lane.b32.xlu1 %v3776_v8, %s3886_s0 }
 0xd59   :  { %1918 = vrot.lane.b32.xlu0 %v3778_v14, %s3886_s0 }
 0xd5a   :  { %v3780_v21 = vpop.eup %3779 }
 0xd5b   :  { %1942 = vperm.xlu1 %3620, %v1940_v15   ;;  %v1998_v15 = vld [vmem:[#allocation2 + $0xd] sm:$0x1] }
 0xd5d   :  { %1922 = vrot.lane.b32.xlu0 %v3780_v21, %s3886_s0 }
 0xd5f   :  { %1993 = vrot.lane.b32.xlu1 %v1992_v63, %s3889_s30 }
 0xdbb   :  { %v1909_v55 = vpop.permute.xlu1 %1908 }
 0xdbc   :  { %v1932_v16 = vmul.f32 %v1909_v55, %v1884_v11  ;;  %v2002_v55 = vld [vmem:[#allocation2 + $0x2d] sm:$0x1] }
 0xdbf   :  { %v1911_v61 = vpop.permute.xlu1 %1910 }
 0xdc0   :  { %v1933_v3 = vmul.f32 %v1911_v61, %v1885_v27 }
 0xdc2   :  { %v1953_v26 = vrot.slane %v1933_v3, 7  ;;  %v2003_v3 = vld [vmem:[#allocation2 + $0x35] sm:$0x1] }
 0xdc3   :  { %v1913_v19 = vpop.permute.xlu0 %1912 }
 0xdc4   :  { %v1934_v0 = vmul.f32 %v1913_v19, %v1886_v4  ;;  %v1954_v33 = vsel %vm499_vm3, %v1953_v26, %v1932_v16  ;;  %v2004_v19 = vld [vmem:[#allocation2 + $0x3d] sm:$0x1] }
 0xdc5   :  { %v1917_v7 = vpop.permute.xlu1 %1916 }
 0xdc6   :  { %v1955_v29 = vrot.slane %v1934_v0, 6  ;;  %v1936_v17 = vmul.f32 %v1917_v7, %v1888_v13 }
 0xdc7   :  { %v1915_v1 = vpop.permute.xlu0 %1914 }
 0xdc8   :  { %v1935_v24 = vmul.f32 %v1915_v1, %v1887_v10  ;;  %v1956_v28 = vsel %vm502_vm4, %v1955_v29, %v1954_v33  ;;  %v1959_v36 = vrot.slane %v1936_v17, 4 }
 0xdc9   :  { %v1921_v30 = vpop.permute.xlu1 %1920 }
 0xdca   :  { %v1957_v23 = vrot.slane %v1935_v24, 5  ;;  %v1938_v25 = vmul.f32 %v1921_v30, %v1890_v22 }
 0xdcb   :  { %v1919_v31 = vpop.permute.xlu0 %1918 }
 0xdcc   :  { %v1958_v35 = vsel %vm505_vm5, %v1957_v23, %v1956_v28  ;;  %v1937_v32 = vmul.f32 %v1919_v31, %v1889_v40  ;;  %v1963_v48 = vrot.slane %v1938_v25, 2 }
 0xdcd   :  { %v1960_v38 = vsel %vm508_vm6, %v1959_v36, %v1958_v35 }
 0xdce   :  { %v1961_v39 = vrot.slane %v1937_v32, 3 }
 0xdcf   :  { %v1923_v42 = vpop.permute.xlu0 %1922 }
 0xdd0   :  { %v1962_v44 = vsel %vm511_vm7, %v1961_v39, %v1960_v38  ;;  %v1939_v46 = vmul.f32 %v1923_v42, %v1891_v41 }
 0xdd1   :  { %v1964_v49 = vsel %vm514_vm8, %v1963_v48, %v1962_v44 }
 0xdd2   :  { %v1965_v37 = vrot.slane %v1939_v46, 1 }
 0xdd4   :  { %v1966_v45 = vsel %vm517_vm9, %v1965_v37, %v1964_v49 }
 0xdd5   :  { %1967 = vrot.lane.b32.xlu0 %v1966_v45, %s3887_s4 }
 0xdda   :  { %v1943_v50 = vpop.permute.xlu1 %1942 }
 0xddb   :  { %vm1944_vm13 = vcmp.eq.s32.totalorder %v1943_v50, 1 }
 0xdde   :  { %v1994_v13 = vpop.permute.xlu1 %1993 }
 0xddf   :  { %v4599_v24 = vsel %vm1944_vm13, %v1994_v13, %v4485_v18 }
 0xde0   :  { %v2119_v33 = vrot.slane %v4599_v24, 1  ;;  %v2120_v23 = vrot.slane %v4599_v24, 2  ;;  %v2121_v30 = vrot.slane %v4599_v24, 3  ;;  %v2124_v18 = vrot.slane %v4599_v24, 6 }
 0xde1   :  { %v2122_v40 = vrot.slane %v4599_v24, 4  ;;  %v2125_v28 = vrot.slane %v4599_v24, 7  ;;  %v2123_v22 = vrot.slane %v4599_v24, 5 }
 0xe47   :  { %v1968_v34 = vpop.permute.xlu0 %1967 }
 0xe48   :  { %v4581_v51 = vsel %vm1944_vm13, %v1968_v34, %v4467_v43 }
 0xe49   :  { %3492 = vmatmul.mubr.msk.f32.vlgmr.msra.gmra.mrb[6].mxu1 %vm219_vm12, %v4581_v51 }
 0xe4a   :  { %3593 = vmatpush3.bf16.msra.mxu1 %v3972_v9  ;;  %3513 = vmatprep.mubr.msk.f32.mxu1 %vm3884_vm1, %v3885_v6 }
 0xe4b   :  { %3594 = vmatprep.subr.bf16.mxu1 %v3883_v2 }
 0xe4e   :  { %3596 = vmatpush3.bf16.msra.mxu1 %v3981_v12  ;;  %v2001_v12 = vld [vmem:[#allocation2 + $0x25] sm:$0x1] }
 0xe4f   :  { %3603 = vmatprep.subr.bf16.mxu1 %v3883_v2 }
 0xf1c   :  { %v2074_v52 = vpop.f32.mrb[6].mxu1 }
 0xf1d   :  { %v2079_v54 = vrot.slane %v2074_v52, 1  ;;  %v2080_v8 = vrot.slane %v2074_v52, 2  ;;  %v3493_v43 = vpop.f32.mrb[7].mxu1  ;;  %v2081_v58 = vrot.slane %v2074_v52, 3  ;;  %v2094_v14 = vadd.f32 %v2074_v52, %v1997_v53 }
 0xf1e   :  { %v2082_v9 = vrot.slane %v2074_v52, 4  ;;  %v2083_v21 = vrot.slane %v2074_v52, 5  ;;  %v2084_v5 = vrot.slane %v2074_v52, 6  ;;  %v2085_v61 = vrot.slane %v2074_v52, 7 }
 0xf1f   :  { %v2096_v20 = vadd.f32 %v2080_v8, %v1999_v56  ;;  %v2095_v59 = vadd.f32 %v2079_v54, %v1998_v15  ;;  %3781 = vtanh.f32 %v2094_v14  ;;  %v2097_v62 = vadd.f32 %v2081_v58, %v2000_v60 }
 0xf20   :  { %v2098_v63 = vadd.f32 %v2082_v9, %v2001_v12  ;;  %v2099_v27 = vadd.f32 %v2083_v21, %v2002_v55  ;;  %v2100_v4 = vadd.f32 %v2084_v5, %v2003_v3  ;;  %v2101_v11 = vadd.f32 %v2085_v61, %v2004_v19 }
 0xf21   :  { %3783 = vtanh.f32 %v2096_v20 }
 0xf22   :  { %3785 = vtanh.f32 %v2095_v59 }
 0xf23   :  { %3787 = vtanh.f32 %v2097_v62 }
 0xf24   :  { %3789 = vtanh.f32 %v2098_v63 }
 0xf25   :  { %3791 = vtanh.f32 %v2099_v27 }
 0xf26   :  { %3793 = vtanh.f32 %v2100_v4 }
 0xf27   :  { %3795 = vtanh.f32 %v2101_v11 }
 0xf29   :  { %v3782_v0 = vpop.eup %3781 }
 0xf2a   :  { %2166 = vrot.lane.b32.xlu0 %v3782_v0, %s3886_s0  ;;  %v4619_v31 = vadd.f32 1.0, %v3782_v0 }
 0xf2b   :  { %v3784_v26 = vpop.eup %3783 }
 0xf2c   :  { %2170 = vrot.lane.b32.xlu1 %v3784_v26, %s3886_s0  ;;  %v3786_v7 = vpop.eup %3785  ;;  %v4628_v44 = vadd.f32 1.0, %v3784_v26 }
 0xf2d   :  { %v3788_v10 = vpop.eup %3787  ;;  %v4623_v25 = vadd.f32 1.0, %v3786_v7 }
 0xf2e   :  { %2168 = vrot.lane.b32.xlu0 %v3786_v7, %s3886_s0  ;;  %v3790_v29 = vpop.eup %3789  ;;  %v4626_v38 = vadd.f32 1.0, %v3788_v10 }
 0xf2f   :  { %v3792_v1 = vpop.eup %3791  ;;  %v4633_v49 = vadd.f32 1.0, %v3790_v29 }
 0xf30   :  { %2172 = vrot.lane.b32.xlu1 %v3788_v10, %s3886_s0  ;;  %v3794_v16 = vpop.eup %3793  ;;  %v4640_v53 = vadd.f32 1.0, %v3792_v1 }
 0xf31   :  { %v3796_v17 = vpop.eup %3795  ;;  %v4638_v34 = vadd.f32 1.0, %v3794_v16 }
 0xf32   :  { %2174 = vrot.lane.b32.xlu0 %v3790_v29, %s3886_s0  ;;  %v4646_v56 = vadd.f32 1.0, %v3796_v17 }
 0xf34   :  { %2176 = vrot.lane.b32.xlu1 %v3792_v1, %s3886_s0 }
 0xf36   :  { %2178 = vrot.lane.b32.xlu0 %v3794_v16, %s3886_s0 }
 0xf38   :  { %2180 = vrot.lane.b32.xlu1 %v3796_v17, %s3886_s0 }
 0xf3a   :  { %2128 = vrot.lane.b32.xlu0 %v2119_v33, %s3887_s4 }
 0xf3c   :  { %2130 = vrot.lane.b32.xlu1 %v2120_v23, %s3887_s4 }
 0xf3e   :  { %2126 = vrot.lane.b32.xlu0 %v4599_v24, %s3887_s4 }
 0xf40   :  { %2132 = vrot.lane.b32.xlu1 %v2121_v30, %s3887_s4 }
 0xf42   :  { %2138 = vrot.lane.b32.xlu0 %v2124_v18, %s3887_s4 }
 0xf44   :  { %2134 = vrot.lane.b32.xlu1 %v2122_v40, %s3887_s4 }
 0xf46   :  { %2140 = vrot.lane.b32.xlu0 %v2125_v28, %s3887_s4 }
 0xf48   :  { %2136 = vrot.lane.b32.xlu1 %v2123_v22, %s3887_s4 }
 0xf9c   :  { %v2167_v35 = vpop.permute.xlu0 %2166 }
 0xf9d   :  { %v2190_v32 = vmul.f32 %v2167_v35, %v4619_v31 }
 0xf9e   :  { %v2171_v36 = vpop.permute.xlu1 %2170 }
 0xf9f   :  { %2206 = vrot.lane.b32.xlu0 %v2190_v32, %s3887_s4  ;;  %v2192_v37 = vmul.f32 %v2171_v36, %v4628_v44 }
 0xfa0   :  { %v2169_v39 = vpop.permute.xlu0 %2168 }
 0xfa1   :  { %v2191_v41 = vmul.f32 %v2169_v39, %v4623_v25 }
 0xfa2   :  { %v2173_v42 = vpop.permute.xlu1 %2172 }
 0xfa3   :  { %v2193_v46 = vmul.f32 %v2173_v42, %v4626_v38  ;;  %2208 = vrot.lane.b32.xlu0 %v2191_v41, %s3887_s4 }
 0xfa4   :  { %v2175_v48 = vpop.permute.xlu0 %2174 }
 0xfa5   :  { %2212 = vrot.lane.b32.xlu1 %v2193_v46, %s3887_s4  ;;  %v2194_v50 = vmul.f32 %v2175_v48, %v4633_v49 }
 0xfa6   :  { %v2177_v45 = vpop.permute.xlu1 %2176 }
 0xfa7   :  { %2210 = vrot.lane.b32.xlu0 %v2192_v37, %s3887_s4  ;;  %v2195_v8 = vmul.f32 %v2177_v45, %v4640_v53 }
 0xfa8   :  { %v2179_v52 = vpop.permute.xlu0 %2178 }
 0xfa9   :  { %v2196_v54 = vmul.f32 %v2179_v52, %v4638_v34  ;;  %2214 = vrot.lane.b32.xlu1 %v2194_v50, %s3887_s4 }
 0xfaa   :  { %v2181_v43 = vpop.permute.xlu1 %2180 }
 0xfab   :  { %2218 = vrot.lane.b32.xlu0 %v2196_v54, %s3887_s4  ;;  %v2197_v58 = vmul.f32 %v2181_v43, %v4646_v56 }
 0xfac   :  { %v2129_v14 = vpop.permute.xlu0 %2128 }
 0xfad   :  { %2216 = vrot.lane.b32.xlu1 %v2195_v8, %s3887_s4  ;;  %v2151_v55 = vmul.f32 %v2129_v14, %v4623_v25 }
 0xfae   :  { %v2131_v15 = vpop.permute.xlu1 %2130 }
 0xfaf   :  { %v2152_v19 = vmul.f32 %v2131_v15, %v4628_v44 }
 0xfb0   :  { %v2127_v20 = vpop.permute.xlu0 %2126 }
 0xfb1   :  { %2220 = vrot.lane.b32.xlu1 %v2197_v58, %s3887_s4  ;;  %v2150_v62 = vmul.f32 %v2127_v20, %v4619_v31 }
 0xfb2   :  { %v2133_v9 = vpop.permute.xlu1 %2132 }
 0xfb3   :  { %v2153_v0 = vmul.f32 %v2133_v9, %v4626_v38 }
 0xfb4   :  { %v2139_v59 = vpop.permute.xlu0 %2138 }
 0xfb5   :  { %v2156_v1 = vmul.f32 %v2139_v59, %v4638_v34 }
 0xfb6   :  { %v2135_v60 = vpop.permute.xlu1 %2134 }
 0xfb7   :  { %v2154_v29 = vmul.f32 %v2135_v60, %v4633_v49  ;;  %v2302_v60 = vsel %vm208_vm14, 1, %v3888_v57 }
 0xfb8   :  { %v2141_v21 = vpop.permute.xlu0 %2140 }
 0xfb9   :  { %v2157_v36 = vmul.f32 %v2141_v21, %v4646_v56 }
 0xfba   :  { %v2137_v63 = vpop.permute.xlu1 %2136 }
 0xfbb   :  { %v2155_v23 = vmul.f32 %v2137_v63, %v4640_v53 }
0x1011   :  { %v2207_v12 = vpop.permute.xlu0 %2206 }
0x1012   :  { %v2230_v5 = vadd.f32 %v2207_v12, %v2150_v62 }
0x1014   :  { %v2238_v61 = vmul.f32 0.5, %v2230_v5 }
0x1015   :  { %v2209_v27 = vpop.permute.xlu0 %2208 }
0x1016   :  { %3797 = vtanh.f32 %v2238_v61  ;;  %v2231_v3 = vadd.f32 %v2209_v27, %v2151_v55 }
0x1017   :  { %v2213_v4 = vpop.permute.xlu1 %2212 }
0x1018   :  { %v2239_v11 = vmul.f32 0.5, %v2231_v3  ;;  %v2233_v7 = vadd.f32 %v2213_v4, %v2153_v0  ;;  %v2247_v3 = vmul.f32 0.5, %v4623_v25 }
0x1019   :  { %v2211_v26 = vpop.permute.xlu0 %2210 }
0x101a   :  { %3799 = vtanh.f32 %v2239_v11  ;;  %v2232_v10 = vadd.f32 %v2211_v26, %v2152_v19  ;;  %v2241_v30 = vmul.f32 0.5, %v2233_v7  ;;  %v2341_v37 = vrot.slane %v2239_v11, 7 }
0x101b   :  { %v2215_v13 = vpop.permute.xlu1 %2214  ;;  %v2248_v19 = vmul.f32 0.5, %v4628_v44  ;;  %v2246_v26 = vmul.f32 0.5, %v4619_v31  ;;  %v2251_v44 = vmul.f32 0.5, %v4640_v53  ;;  %v2252_v31 = vmul.f32 0.5, %v4638_v34 }
0x101c   :  { %v2240_v16 = vmul.f32 0.5, %v2232_v10  ;;  %v2234_v17 = vadd.f32 %v2215_v13, %v2154_v29  ;;  %v2342_v54 = vsel %vm499_vm3, %v2341_v37, %v2238_v61  ;;  %v2345_v58 = vrot.slane %v2241_v30, 5 }
0x101d   :  { %v2219_v33 = vpop.permute.xlu0 %2218  ;;  %v2249_v29 = vmul.f32 0.5, %v4626_v38 }
0x101e   :  { %3801 = vtanh.f32 %v2240_v16  ;;  %v2236_v18 = vadd.f32 %v2219_v33, %v2156_v1  ;;  %v2242_v40 = vmul.f32 0.5, %v2234_v17  ;;  %v2343_v50 = vrot.slane %v2240_v16, 6 }
0x101f   :  { %v2217_v28 = vpop.permute.xlu1 %2216  ;;  %v2250_v1 = vmul.f32 0.5, %v4633_v49 }
0x1020   :  { %v3798_v22 = vpop.eup %3797  ;;  %v2235_v35 = vadd.f32 %v2217_v28, %v2155_v23  ;;  %3803 = vtanh.f32 %v2242_v40  ;;  %v2244_v32 = vmul.f32 0.5, %v2236_v18  ;;  %v2344_v43 = vsel %vm502_vm4, %v2343_v50, %v2342_v54  ;;  %v2359_v54 = vld [vmem:[#allocation2 + $0x6] sm:$0x1] }
0x1021   :  { %2270 = vrot.lane.b32.xlu0 %v3798_v22, %s3886_s0  ;;  %3805 = vtanh.f32 %v2241_v30  ;;  %v2347_v14 = vrot.slane %v2242_v40, 4  ;;  %v2346_v20 = vsel %vm505_vm5, %v2345_v58, %v2344_v43 }
0x1022   :  { %v2243_v39 = vmul.f32 0.5, %v2235_v35  ;;  %3807 = vtanh.f32 %v2244_v32  ;;  %v2351_v63 = vrot.slane %v2244_v32, 2 }
0x1023   :  { %v2221_v41 = vpop.permute.xlu1 %2220  ;;  %v2348_v21 = vsel %vm508_vm6, %v2347_v14, %v2346_v20  ;;  %v2361_v14 = vld [vmem:[#allocation2 + $0x16] sm:$0x1] }
0x1024   :  { %v3800_v42 = vpop.eup %3799  ;;  %v2237_v46 = vadd.f32 %v2221_v41, %v2157_v36  ;;  %3809 = vtanh.f32 %v2243_v39  ;;  %v2349_v9 = vrot.slane %v2243_v39, 3  ;;  %v2253_v36 = vmul.f32 0.5, %v4646_v56 }
0x1025   :  { %2272 = vrot.lane.b32.xlu0 %v3800_v42, %s3886_s0 }
0x1026   :  { %v2245_v48 = vmul.f32 0.5, %v2237_v46  ;;  %v2350_v62 = vsel %vm511_vm7, %v2349_v9, %v2348_v21  ;;  %v2360_v9 = vld [vmem:[#allocation2 + $0xe] sm:$0x1] }
0x1027   :  { %v2352_v47 = vsel %vm514_vm8, %v2351_v63, %v2350_v62 }
0x1028   :  { %v3802_v45 = vpop.eup %3801  ;;  %3811 = vtanh.f32 %v2245_v48  ;;  %v2353_v12 = vrot.slane %v2245_v48, 1 }
0x1029   :  { %2274 = vrot.lane.b32.xlu1 %v3802_v45, %s3886_s0 }
0x102a   :  { %v3804_v52 = vpop.eup %3803  ;;  %v2354_v55 = vsel %vm517_vm9, %v2353_v12, %v2352_v47 }
0x102b   :  { %v3806_v8 = vpop.eup %3805  ;;  %2278 = vrot.lane.b32.xlu0 %v3804_v52, %s3886_s0 }
0x102c   :  { %v3808_v15 = vpop.eup %3807 }
0x102d   :  { %2276 = vrot.lane.b32.xlu1 %v3806_v8, %s3886_s0 }
0x102e   :  { %v3810_v59 = vpop.eup %3809 }
0x102f   :  { %2282 = vrot.lane.b32.xlu0 %v3808_v15, %s3886_s0 }
0x1031   :  { %2280 = vrot.lane.b32.xlu1 %v3810_v59, %s3886_s0 }
0x1032   :  { %v3812_v5 = vpop.eup %3811 }
0x1033   :  { %2304 = vperm.xlu0 %3619, %v2302_v60  }
0x1035   :  { %2284 = vrot.lane.b32.xlu1 %v3812_v5, %s3886_s0  ;;  %v2363_v5 = vld [vmem:[#allocation2 + $0x26] sm:$0x1] }
0x1037   :  { %2355 = vrot.lane.b32.xlu0 %v2354_v55, %s3889_s30  ;;  %v2364_v55 = vld [vmem:[#allocation2 + $0x2e] sm:$0x1] }
0x1093   :  { %v2271_v61 = vpop.permute.xlu0 %2270 }
0x1094   :  { %v2294_v17 = vmul.f32 %v2271_v61, %v2246_v26 }
0x1097   :  { %v2273_v27 = vpop.permute.xlu0 %2272 }
0x1098   :  { %v2295_v4 = vmul.f32 %v2273_v27, %v2247_v3  ;;  %v2365_v3 = vld [vmem:[#allocation2 + $0x36] sm:$0x1] }
0x109a   :  { %v2315_v7 = vrot.slane %v2295_v4, 7 }
0x109b   :  { %v2275_v0 = vpop.permute.xlu1 %2274 }
0x109c   :  { %v2296_v11 = vmul.f32 %v2275_v0, %v2248_v19  ;;  %v2316_v25 = vsel %vm499_vm3, %v2315_v7, %v2294_v17  ;;  %v2366_v19 = vld [vmem:[#allocation2 + $0x3e] sm:$0x1] }
0x109d   :  { %v2279_v10 = vpop.permute.xlu0 %2278 }
0x109e   :  { %v2317_v13 = vrot.slane %v2296_v11, 6  ;;  %v2298_v23 = vmul.f32 %v2279_v10, %v2250_v1 }
0x109f   :  { %v2277_v16 = vpop.permute.xlu1 %2276 }
0x10a0   :  { %v2297_v33 = vmul.f32 %v2277_v16, %v2249_v29  ;;  %v2318_v40 = vsel %vm502_vm4, %v2317_v13, %v2316_v25  ;;  %v2321_v35 = vrot.slane %v2298_v23, 4 }
0x10a1   :  { %v2283_v18 = vpop.permute.xlu0 %2282 }
0x10a2   :  { %v2319_v30 = vrot.slane %v2297_v33, 5  ;;  %v2300_v49 = vmul.f32 %v2283_v18, %v2252_v31 }
0x10a3   :  { %v2281_v28 = vpop.permute.xlu1 %2280 }
0x10a4   :  { %v2320_v38 = vsel %vm505_vm5, %v2319_v30, %v2318_v40  ;;  %v2299_v22 = vmul.f32 %v2281_v28, %v2251_v44  ;;  %v2325_v53 = vrot.slane %v2300_v49, 2 }
0x10a5   :  { %v2322_v39 = vsel %vm508_vm6, %v2321_v35, %v2320_v38 }
0x10a6   :  { %v2323_v32 = vrot.slane %v2299_v22, 3 }
0x10a7   :  { %v2285_v41 = vpop.permute.xlu1 %2284 }
0x10a8   :  { %v2324_v42 = vsel %vm511_vm7, %v2323_v32, %v2322_v39  ;;  %v2301_v46 = vmul.f32 %v2285_v41, %v2253_v36 }
0x10a9   :  { %v2326_v37 = vsel %vm514_vm8, %v2325_v53, %v2324_v42 }
0x10aa   :  { %v2327_v48 = vrot.slane %v2301_v46, 1 }
0x10ac   :  { %v2328_v34 = vsel %vm517_vm9, %v2327_v48, %v2326_v37 }
0x10ad   :  { %2329 = vrot.lane.b32.xlu1 %v2328_v34, %s3887_s4 }
0x10b2   :  { %v2305_v45 = vpop.permute.xlu0 %2304 }
0x10b3   :  { %vm2306_vm15 = vcmp.eq.s32.totalorder %v2305_v45, 1 }
0x10b6   :  { %v2356_v13 = vpop.permute.xlu0 %2355 }
0x10b7   :  { %v4709_v17 = vsel %vm2306_vm15, %v2356_v13, %v4599_v24 }
0x10b8   :  { %v2481_v23 = vrot.slane %v4709_v17, 1  ;;  %v2482_v25 = vrot.slane %v4709_v17, 2  ;;  %v2483_v30 = vrot.slane %v4709_v17, 3  ;;  %v2486_v24 = vrot.slane %v4709_v17, 6 }
0x10b9   :  { %v2484_v18 = vrot.slane %v4709_v17, 4  ;;  %v2487_v44 = vrot.slane %v4709_v17, 7  ;;  %v2485_v40 = vrot.slane %v4709_v17, 5 }
0x111f   :  { %v2330_v50 = vpop.permute.xlu1 %2329 }
0x1120   :  { %v4695_v56 = vsel %vm2306_vm15, %v2330_v50, %v4581_v51  ;;  %v2362_v51 = vld [vmem:[#allocation2 + $0x1e] sm:$0x1] }
0x1121   :  { %3503 = vmatmul.mubr.msk.f32.vlgmr.msra.gmra.mrb[12].mxu0 %vm219_vm12, %v4695_v56 }
0x1122   :  { %3524 = vmatprep.mubr.msk.f32.mxu0 %vm3884_vm1, %v3885_v6 }
0x11f4   :  { %v2436_v52 = vpop.f32.mrb[12].mxu0 }
0x11f5   :  { %v2441_v8 = vrot.slane %v2436_v52, 1  ;;  %v2442_v43 = vrot.slane %v2436_v52, 2  ;;  %v3504_v58 = vpop.f32.mrb[13].mxu0  ;;  %v2443_v15 = vrot.slane %v2436_v52, 3  ;;  %v2456_v20 = vadd.f32 %v2436_v52, %v2359_v54 }
0x11f6   :  { %v2444_v60 = vrot.slane %v2436_v52, 4  ;;  %v2445_v62 = vrot.slane %v2436_v52, 5  ;;  %v2446_v63 = vrot.slane %v2436_v52, 6  ;;  %v2447_v61 = vrot.slane %v2436_v52, 7 }
0x11f7   :  { %v2458_v59 = vadd.f32 %v2442_v43, %v2361_v14  ;;  %v2457_v21 = vadd.f32 %v2441_v8, %v2360_v9  ;;  %3813 = vtanh.f32 %v2456_v20  ;;  %v2459_v12 = vadd.f32 %v2443_v15, %v2362_v51 }
0x11f8   :  { %v2460_v47 = vadd.f32 %v2444_v60, %v2363_v5  ;;  %v2461_v27 = vadd.f32 %v2445_v62, %v2364_v55  ;;  %v2462_v4 = vadd.f32 %v2446_v63, %v2365_v3  ;;  %v2463_v11 = vadd.f32 %v2447_v61, %v2366_v19 }
0x11f9   :  { %3815 = vtanh.f32 %v2458_v59 }
0x11fa   :  { %3817 = vtanh.f32 %v2457_v21 }
0x11fb   :  { %3819 = vtanh.f32 %v2459_v12 }
0x11fc   :  { %3821 = vtanh.f32 %v2460_v47 }
0x11fd   :  { %3823 = vtanh.f32 %v2461_v27 }
0x11fe   :  { %3825 = vtanh.f32 %v2462_v4 }
0x11ff   :  { %3827 = vtanh.f32 %v2463_v11 }
0x1201   :  { %v3814_v0 = vpop.eup %3813 }
0x1202   :  { %2528 = vrot.lane.b32.xlu1 %v3814_v0, %s3886_s0  ;;  %v4729_v31 = vadd.f32 1.0, %v3814_v0 }
0x1203   :  { %v3816_v26 = vpop.eup %3815 }
0x1204   :  { %2532 = vrot.lane.b32.xlu0 %v3816_v26, %s3886_s0  ;;  %v3818_v7 = vpop.eup %3817  ;;  %v4738_v41 = vadd.f32 1.0, %v3816_v26 }
0x1205   :  { %v3820_v10 = vpop.eup %3819  ;;  %v4733_v35 = vadd.f32 1.0, %v3818_v7 }
0x1206   :  { %2530 = vrot.lane.b32.xlu1 %v3818_v7, %s3886_s0  ;;  %v3822_v29 = vpop.eup %3821  ;;  %v4736_v36 = vadd.f32 1.0, %v3820_v10 }
0x1207   :  { %v3824_v1 = vpop.eup %3823  ;;  %v4743_v48 = vadd.f32 1.0, %v3822_v29 }
0x1208   :  { %2534 = vrot.lane.b32.xlu0 %v3820_v10, %s3886_s0  ;;  %v3826_v16 = vpop.eup %3825  ;;  %v4750_v52 = vadd.f32 1.0, %v3824_v1 }
0x1209   :  { %v3828_v33 = vpop.eup %3827  ;;  %v4748_v45 = vadd.f32 1.0, %v3826_v16 }
0x120a   :  { %2536 = vrot.lane.b32.xlu1 %v3822_v29, %s3886_s0  ;;  %v4756_v58 = vadd.f32 1.0, %v3828_v33 }
0x120c   :  { %2538 = vrot.lane.b32.xlu0 %v3824_v1, %s3886_s0 }
0x120e   :  { %2540 = vrot.lane.b32.xlu1 %v3826_v16, %s3886_s0 }
0x1210   :  { %2542 = vrot.lane.b32.xlu0 %v3828_v33, %s3886_s0 }
0x1212   :  { %2490 = vrot.lane.b32.xlu1 %v2481_v23, %s3887_s4 }
0x1214   :  { %2492 = vrot.lane.b32.xlu0 %v2482_v25, %s3887_s4 }
0x1216   :  { %2488 = vrot.lane.b32.xlu1 %v4709_v17, %s3887_s4 }
0x1218   :  { %2494 = vrot.lane.b32.xlu0 %v2483_v30, %s3887_s4 }
0x121a   :  { %2500 = vrot.lane.b32.xlu1 %v2486_v24, %s3887_s4 }
0x121c   :  { %2496 = vrot.lane.b32.xlu0 %v2484_v18, %s3887_s4 }
0x121e   :  { %2502 = vrot.lane.b32.xlu1 %v2487_v44, %s3887_s4 }
0x1220   :  { %2498 = vrot.lane.b32.xlu0 %v2485_v40, %s3887_s4 }
0x1274   :  { %v2529_v28 = vpop.permute.xlu1 %2528 }
0x1275   :  { %v2552_v38 = vmul.f32 %v2529_v28, %v4729_v31 }
0x1276   :  { %v2533_v22 = vpop.permute.xlu0 %2532 }
0x1277   :  { %2568 = vrot.lane.b32.xlu1 %v2552_v38, %s3887_s4  ;;  %v2554_v53 = vmul.f32 %v2533_v22, %v4738_v41 }
0x1278   :  { %v2531_v49 = vpop.permute.xlu1 %2530 }
0x1279   :  { %v2553_v32 = vmul.f32 %v2531_v49, %v4733_v35 }
0x127a   :  { %v2535_v39 = vpop.permute.xlu0 %2534 }
0x127b   :  { %v2555_v42 = vmul.f32 %v2535_v39, %v4736_v36  ;;  %2570 = vrot.lane.b32.xlu1 %v2553_v32, %s3887_s4 }
0x127c   :  { %v2537_v46 = vpop.permute.xlu1 %2536 }
0x127d   :  { %2574 = vrot.lane.b32.xlu0 %v2555_v42, %s3887_s4  ;;  %v2556_v34 = vmul.f32 %v2537_v46, %v4743_v48 }
0x127e   :  { %v2539_v37 = vpop.permute.xlu0 %2538 }
0x127f   :  { %2572 = vrot.lane.b32.xlu1 %v2554_v53, %s3887_s4  ;;  %v2557_v8 = vmul.f32 %v2539_v37, %v4750_v52 }
0x1280   :  { %v2541_v50 = vpop.permute.xlu1 %2540 }
0x1281   :  { %v2558_v54 = vmul.f32 %v2541_v50, %v4748_v45  ;;  %2576 = vrot.lane.b32.xlu0 %v2556_v34, %s3887_s4 }
0x1282   :  { %v2543_v43 = vpop.permute.xlu0 %2542 }
0x1283   :  { %2580 = vrot.lane.b32.xlu1 %v2558_v54, %s3887_s4  ;;  %v2559_v14 = vmul.f32 %v2543_v43, %v4756_v58 }
0x1284   :  { %v2491_v15 = vpop.permute.xlu1 %2490 }
0x1285   :  { %2578 = vrot.lane.b32.xlu0 %v2557_v8, %s3887_s4  ;;  %v2513_v47 = vmul.f32 %v2491_v15, %v4733_v35  ;;  %v4779_v15 = vld [vmem:[%s4954_s1] sm:$0xff] }
0x1286   :  { %v2493_v20 = vpop.permute.xlu0 %2492  ;;  %vm209_vm0 = vcmp.gt.s32.totalorder %v4779_v15, 6  ;;  %vm210_vm10 = vcmp.gt.s32.totalorder %v4779_v15, 7  ;;  %v3059_v15 = vld [vmem:[%s4955_s5 + $0x10] sm:$0xff] }
0x1287   :  { %v2514_v4 = vmul.f32 %v2493_v20, %v4738_v41 }
0x1288   :  { %v2489_v9 = vpop.permute.xlu1 %2488 }
0x1289   :  { %2582 = vrot.lane.b32.xlu0 %v2559_v14, %s3887_s4  ;;  %v2512_v62 = vmul.f32 %v2489_v9, %v4729_v31 }
0x128a   :  { %v2495_v59 = vpop.permute.xlu0 %2494 }
0x128b   :  { %v2515_v19 = vmul.f32 %v2495_v59, %v4736_v36 }
0x128c   :  { %v2501_v60 = vpop.permute.xlu1 %2500 }
0x128d   :  { %v2518_v13 = vmul.f32 %v2501_v60, %v4748_v45 }
0x128e   :  { %v2497_v21 = vpop.permute.xlu0 %2496 }
0x128f   :  { %v2516_v10 = vmul.f32 %v2497_v21, %v4743_v48  ;;  %v2664_v21 = vsel %vm209_vm0, 1, %v3888_v57 }
0x1290   :  { %v2503_v51 = vpop.permute.xlu1 %2502 }
0x1291   :  { %v2519_v38 = vmul.f32 %v2503_v51, %v4756_v58 }
0x1292   :  { %v2499_v63 = vpop.permute.xlu0 %2498 }
0x1293   :  { %v2517_v23 = vmul.f32 %v2499_v63, %v4750_v52 }
0x12e9   :  { %v2569_v12 = vpop.permute.xlu1 %2568 }
0x12ea   :  { %v2592_v5 = vadd.f32 %v2569_v12, %v2512_v62 }
0x12ec   :  { %v2600_v55 = vmul.f32 0.5, %v2592_v5 }
0x12ed   :  { %v2571_v61 = vpop.permute.xlu1 %2570 }
0x12ee   :  { %3829 = vtanh.f32 %v2600_v55  ;;  %v2593_v27 = vadd.f32 %v2571_v61, %v2513_v47 }
0x12ef   :  { %v2575_v3 = vpop.permute.xlu0 %2574 }
0x12f0   :  { %v2601_v0 = vmul.f32 0.5, %v2593_v27  ;;  %v2595_v26 = vadd.f32 %v2575_v3, %v2515_v19  ;;  %v2609_v3 = vmul.f32 0.5, %v4733_v35  ;;  %v2610_v19 = vmul.f32 0.5, %v4738_v41 }
0x12f1   :  { %v2573_v11 = vpop.permute.xlu1 %2572  ;;  %v2613_v41 = vmul.f32 0.5, %v4750_v52 }
0x12f2   :  { %3831 = vtanh.f32 %v2601_v0  ;;  %v2594_v7 = vadd.f32 %v2573_v11, %v2514_v4  ;;  %v2603_v25 = vmul.f32 0.5, %v2595_v26  ;;  %v2703_v46 = vrot.slane %v2601_v0, 7 }
0x12f3   :  { %v2577_v29 = vpop.permute.xlu0 %2576  ;;  %v2608_v26 = vmul.f32 0.5, %v4729_v31  ;;  %v2614_v31 = vmul.f32 0.5, %v4748_v45 }
0x12f4   :  { %v2602_v1 = vmul.f32 0.5, %v2594_v7  ;;  %v2596_v16 = vadd.f32 %v2577_v29, %v2516_v10  ;;  %v2704_v50 = vsel %vm499_vm3, %v2703_v46, %v2600_v55  ;;  %v2707_v43 = vrot.slane %v2603_v25, 5 }
0x12f5   :  { %v2581_v33 = vpop.permute.xlu1 %2580  ;;  %v2611_v29 = vmul.f32 0.5, %v4736_v36 }
0x12f6   :  { %3833 = vtanh.f32 %v2602_v1  ;;  %v2598_v30 = vadd.f32 %v2581_v33, %v2518_v13  ;;  %v2604_v24 = vmul.f32 0.5, %v2596_v16  ;;  %v2705_v37 = vrot.slane %v2602_v1, 6 }
0x12f7   :  { %v2579_v18 = vpop.permute.xlu0 %2578  ;;  %v2612_v1 = vmul.f32 0.5, %v4743_v48 }
0x12f8   :  { %v3830_v44 = vpop.eup %3829  ;;  %v2597_v40 = vadd.f32 %v2579_v18, %v2517_v23  ;;  %3835 = vtanh.f32 %v2604_v24  ;;  %v2606_v28 = vmul.f32 0.5, %v2598_v30  ;;  %v2706_v8 = vsel %vm502_vm4, %v2705_v37, %v2704_v50 }
0x12f9   :  { %2632 = vrot.lane.b32.xlu1 %v3830_v44, %s3886_s0  ;;  %3837 = vtanh.f32 %v2603_v25  ;;  %v2709_v14 = vrot.slane %v2604_v24, 4  ;;  %v2708_v9 = vsel %vm505_vm5, %v2707_v43, %v2706_v8 }
0x12fa   :  { %v2605_v22 = vmul.f32 0.5, %v2597_v40  ;;  %3839 = vtanh.f32 %v2606_v28  ;;  %v2713_v63 = vrot.slane %v2606_v28, 2 }
0x12fb   :  { %v2583_v49 = vpop.permute.xlu0 %2582  ;;  %v2710_v51 = vsel %vm508_vm6, %v2709_v14, %v2708_v9 }
0x12fc   :  { %v3832_v32 = vpop.eup %3831  ;;  %v2599_v39 = vadd.f32 %v2583_v49, %v2519_v38  ;;  %3841 = vtanh.f32 %v2605_v22  ;;  %v2711_v59 = vrot.slane %v2605_v22, 3  ;;  %v2615_v22 = vmul.f32 0.5, %v4756_v58 }
0x12fd   :  { %2634 = vrot.lane.b32.xlu1 %v3832_v32, %s3886_s0 }
0x12fe   :  { %v2607_v42 = vmul.f32 0.5, %v2599_v39  ;;  %v2712_v62 = vsel %vm511_vm7, %v2711_v59, %v2710_v51 }
0x12ff   :  { %v2714_v47 = vsel %vm514_vm8, %v2713_v63, %v2712_v62  ;;  %v2725_v63 = vld [vmem:[#allocation2 + $0x27] sm:$0x1] }
0x1300   :  { %v3834_v53 = vpop.eup %3833  ;;  %3843 = vtanh.f32 %v2607_v42  ;;  %v2715_v12 = vrot.slane %v2607_v42, 1 }
0x1301   :  { %2636 = vrot.lane.b32.xlu0 %v3834_v53, %s3886_s0 }
0x1302   :  { %v3836_v34 = vpop.eup %3835  ;;  %v2716_v55 = vsel %vm517_vm9, %v2715_v12, %v2714_v47 }
0x1303   :  { %v3838_v54 = vpop.eup %3837  ;;  %2640 = vrot.lane.b32.xlu1 %v3836_v34, %s3886_s0 }
0x1304   :  { %v3840_v20 = vpop.eup %3839 }
0x1305   :  { %2638 = vrot.lane.b32.xlu0 %v3838_v54, %s3886_s0  ;;  %v2721_v54 = vld [vmem:[#allocation2 + $0x7] sm:$0x1] }
0x1306   :  { %v3842_v60 = vpop.eup %3841 }
0x1307   :  { %2644 = vrot.lane.b32.xlu1 %v3840_v20, %s3886_s0  ;;  %v2723_v20 = vld [vmem:[#allocation2 + $0x17] sm:$0x1] }
0x1309   :  { %2642 = vrot.lane.b32.xlu0 %v3842_v60, %s3886_s0  ;;  %v2722_v60 = vld [vmem:[#allocation2 + $0xf] sm:$0x1] }
0x130a   :  { %v3844_v5 = vpop.eup %3843 }
0x130b   :  { %2666 = vperm.xlu1 %3620, %v2664_v21  }
0x130d   :  { %2646 = vrot.lane.b32.xlu0 %v3844_v5, %s3886_s0 }
0x130f   :  { %2717 = vrot.lane.b32.xlu1 %v2716_v55, %s3889_s30 }
0x136b   :  { %v2633_v61 = vpop.permute.xlu1 %2632 }
0x136c   :  { %v2656_v33 = vmul.f32 %v2633_v61, %v2608_v26  ;;  %v2726_v61 = vld [vmem:[#allocation2 + $0x2f] sm:$0x1] }
0x136f   :  { %v2635_v27 = vpop.permute.xlu1 %2634 }
0x1370   :  { %v2657_v4 = vmul.f32 %v2635_v27, %v2609_v3 }
0x1372   :  { %v2677_v7 = vrot.slane %v2657_v4, 7  ;;  %v2727_v4 = vld [vmem:[#allocation2 + $0x37] sm:$0x1] }
0x1373   :  { %v2637_v0 = vpop.permute.xlu0 %2636 }
0x1374   :  { %v2658_v11 = vmul.f32 %v2637_v0, %v2610_v19  ;;  %v2678_v35 = vsel %vm499_vm3, %v2677_v7, %v2656_v33  ;;  %v2728_v0 = vld [vmem:[#allocation2 + $0x3f] sm:$0x1] }
0x1375   :  { %v2641_v10 = vpop.permute.xlu1 %2640 }
0x1376   :  { %v2679_v13 = vrot.slane %v2658_v11, 6  ;;  %v2660_v25 = vmul.f32 %v2641_v10, %v2612_v1 }
0x1377   :  { %v2639_v16 = vpop.permute.xlu0 %2638 }
0x1378   :  { %v2659_v23 = vmul.f32 %v2639_v16, %v2611_v29  ;;  %v2680_v18 = vsel %vm502_vm4, %v2679_v13, %v2678_v35  ;;  %v2683_v28 = vrot.slane %v2660_v25, 4 }
0x1379   :  { %v2645_v24 = vpop.permute.xlu1 %2644 }
0x137a   :  { %v2681_v30 = vrot.slane %v2659_v23, 5  ;;  %v2662_v48 = vmul.f32 %v2645_v24, %v2614_v31 }
0x137b   :  { %v2643_v44 = vpop.permute.xlu0 %2642 }
0x137c   :  { %v2682_v36 = vsel %vm505_vm5, %v2681_v30, %v2680_v18  ;;  %v2661_v40 = vmul.f32 %v2643_v44, %v2613_v41  ;;  %v2687_v52 = vrot.slane %v2662_v48, 2 }
0x137d   :  { %v2684_v49 = vsel %vm508_vm6, %v2683_v28, %v2682_v36 }
0x137e   :  { %v2685_v38 = vrot.slane %v2661_v40, 3 }
0x137f   :  { %v2647_v32 = vpop.permute.xlu0 %2646 }
0x1380   :  { %v2686_v39 = vsel %vm511_vm7, %v2685_v38, %v2684_v49  ;;  %v2663_v42 = vmul.f32 %v2647_v32, %v2615_v22 }
0x1381   :  { %v2688_v53 = vsel %vm514_vm8, %v2687_v52, %v2686_v39 }
0x1382   :  { %v2689_v46 = vrot.slane %v2663_v42, 1 }
0x1384   :  { %v2690_v45 = vsel %vm517_vm9, %v2689_v46, %v2688_v53 }
0x1385   :  { %2691 = vrot.lane.b32.xlu0 %v2690_v45, %s3887_s4 }
0x138a   :  { %v2667_v37 = vpop.permute.xlu1 %2666 }
0x138b   :  { %vm2668_vm2 = vcmp.eq.s32.totalorder %v2667_v37, 1 }
0x138e   :  { %v2718_v1 = vpop.permute.xlu1 %2717 }
0x138f   :  { %v2720_v23 = vsel %vm2668_vm2, %v2718_v1, %v4709_v17 }
0x1390   :  { %v2843_v35 = vrot.slane %v2720_v23, 1  ;;  %v2844_v30 = vrot.slane %v2720_v23, 2  ;;  %v2845_v24 = vrot.slane %v2720_v23, 3  ;;  %v2848_v41 = vrot.slane %v2720_v23, 6 }
0x1391   :  { %v2846_v17 = vrot.slane %v2720_v23, 4  ;;  %v2849_v18 = vrot.slane %v2720_v23, 7  ;;  %v2847_v31 = vrot.slane %v2720_v23, 5 }
0x13f7   :  { %v2692_v34 = vpop.permute.xlu0 %2691 }
0x13f8   :  { %v4810_v58 = vsel %vm2668_vm2, %v2692_v34, %v4695_v56  ;;  %v2724_v56 = vld [vmem:[#allocation2 + $0x1f] sm:$0x1] }
0x13f9   :  { %3514 = vmatmul.mubr.msk.f32.vlgmr.msra.gmra.mrb[8].mxu1 %vm219_vm12, %v4810_v58 }
0x13fa   :  { %3535 = vmatprep.mubr.msk.f32.mxu1 %vm3884_vm1, %v3885_v6 }
0x14cc   :  { %v2798_v50 = vpop.f32.mrb[8].mxu1 }
0x14cd   :  { %v2803_v8 = vrot.slane %v2798_v50, 1  ;;  %v2804_v43 = vrot.slane %v2798_v50, 2  ;;  %v3515_v14 = vpop.f32.mrb[9].mxu1  ;;  %v2805_v9 = vrot.slane %v2798_v50, 3  ;;  %v2818_v59 = vadd.f32 %v2798_v50, %v2721_v54 }
0x14ce   :  { %v2806_v51 = vrot.slane %v2798_v50, 4  ;;  %v2807_v12 = vrot.slane %v2798_v50, 5  ;;  %v2808_v47 = vrot.slane %v2798_v50, 6  ;;  %v2809_v27 = vrot.slane %v2798_v50, 7 }
0x14cf   :  { %v2820_v21 = vadd.f32 %v2804_v43, %v2723_v20  ;;  %v2819_v62 = vadd.f32 %v2803_v8, %v2722_v60  ;;  %3845 = vtanh.f32 %v2818_v59  ;;  %v2821_v5 = vadd.f32 %v2805_v9, %v2724_v56 }
0x14d0   :  { %v2822_v55 = vadd.f32 %v2806_v51, %v2725_v63  ;;  %v2823_v3 = vadd.f32 %v2807_v12, %v2726_v61  ;;  %v2824_v19 = vadd.f32 %v2808_v47, %v2727_v4  ;;  %v2825_v26 = vadd.f32 %v2809_v27, %v2728_v0 }
0x14d1   :  { %3847 = vtanh.f32 %v2820_v21 }
0x14d2   :  { %3849 = vtanh.f32 %v2819_v62 }
0x14d3   :  { %3851 = vtanh.f32 %v2821_v5 }
0x14d4   :  { %3853 = vtanh.f32 %v2822_v55 }
0x14d5   :  { %3855 = vtanh.f32 %v2823_v3 }
0x14d6   :  { %3857 = vtanh.f32 %v2824_v19 }
0x14d7   :  { %3859 = vtanh.f32 %v2825_v26 }
0x14d9   :  { %v3846_v11 = vpop.eup %3845 }
0x14da   :  { %2890 = vrot.lane.b32.xlu0 %v3846_v11, %s3886_s0  ;;  %v4834_v44 = vadd.f32 1.0, %v3846_v11 }
0x14db   :  { %v3848_v7 = vpop.eup %3847 }
0x14dc   :  { %2894 = vrot.lane.b32.xlu1 %v3848_v7, %s3886_s0  ;;  %v3850_v10 = vpop.eup %3849  ;;  %v4843_v39 = vadd.f32 1.0, %v3848_v7 }
0x14dd   :  { %v3852_v29 = vpop.eup %3851  ;;  %v4838_v48 = vadd.f32 1.0, %v3850_v10 }
0x14de   :  { %2892 = vrot.lane.b32.xlu0 %v3850_v10, %s3886_s0  ;;  %v3854_v13 = vpop.eup %3853  ;;  %v4841_v49 = vadd.f32 1.0, %v3852_v29 }
0x14df   :  { %v3856_v16 = vpop.eup %3855  ;;  %v4848_v53 = vadd.f32 1.0, %v3854_v13 }
0x14e0   :  { %2896 = vrot.lane.b32.xlu1 %v3852_v29, %s3886_s0  ;;  %v3858_v33 = vpop.eup %3857  ;;  %v4855_v54 = vadd.f32 1.0, %v3856_v16 }
0x14e1   :  { %v3860_v25 = vpop.eup %3859  ;;  %v4853_v34 = vadd.f32 1.0, %v3858_v33 }
0x14e2   :  { %2898 = vrot.lane.b32.xlu0 %v3854_v13, %s3886_s0  ;;  %v4861_v20 = vadd.f32 1.0, %v3860_v25 }
0x14e4   :  { %2900 = vrot.lane.b32.xlu1 %v3856_v16, %s3886_s0 }
0x14e6   :  { %2902 = vrot.lane.b32.xlu0 %v3858_v33, %s3886_s0 }
0x14e8   :  { %2904 = vrot.lane.b32.xlu1 %v3860_v25, %s3886_s0 }
0x14ea   :  { %2852 = vrot.lane.b32.xlu0 %v2843_v35, %s3887_s4 }
0x14ec   :  { %2854 = vrot.lane.b32.xlu1 %v2844_v30, %s3887_s4 }
0x14ee   :  { %2850 = vrot.lane.b32.xlu0 %v2720_v23, %s3887_s4 }
0x14f0   :  { %2856 = vrot.lane.b32.xlu1 %v2845_v24, %s3887_s4 }
0x14f2   :  { %2862 = vrot.lane.b32.xlu0 %v2848_v41, %s3887_s4 }
0x14f4   :  { %2858 = vrot.lane.b32.xlu1 %v2846_v17, %s3887_s4 }
0x14f6   :  { %2864 = vrot.lane.b32.xlu0 %v2849_v18, %s3887_s4 }
0x14f8   :  { %2860 = vrot.lane.b32.xlu1 %v2847_v31, %s3887_s4 }
0x154c   :  { %v2891_v36 = vpop.permute.xlu0 %2890 }
0x154d   :  { %v2914_v40 = vmul.f32 %v2891_v36, %v4834_v44 }
0x154e   :  { %v2895_v28 = vpop.permute.xlu1 %2894 }
0x154f   :  { %2930 = vrot.lane.b32.xlu0 %v2914_v40, %s3887_s4  ;;  %v2916_v46 = vmul.f32 %v2895_v28, %v4843_v39 }
0x1550   :  { %v2893_v38 = vpop.permute.xlu0 %2892 }
0x1551   :  { %v2915_v22 = vmul.f32 %v2893_v38, %v4838_v48 }
0x1552   :  { %v2897_v32 = vpop.permute.xlu1 %2896 }
0x1553   :  { %v2917_v42 = vmul.f32 %v2897_v32, %v4841_v49  ;;  %2932 = vrot.lane.b32.xlu0 %v2915_v22, %s3887_s4 }
0x1554   :  { %v2899_v52 = vpop.permute.xlu0 %2898 }
0x1555   :  { %2936 = vrot.lane.b32.xlu1 %v2917_v42, %s3887_s4  ;;  %v2918_v37 = vmul.f32 %v2899_v52, %v4848_v53 }
0x1556   :  { %v2901_v45 = vpop.permute.xlu1 %2900 }
0x1557   :  { %2934 = vrot.lane.b32.xlu0 %v2916_v46, %s3887_s4  ;;  %v2919_v43 = vmul.f32 %v2901_v45, %v4855_v54 }
0x1558   :  { %v2903_v50 = vpop.permute.xlu0 %2902 }
0x1559   :  { %v2920_v8 = vmul.f32 %v2903_v50, %v4853_v34  ;;  %2938 = vrot.lane.b32.xlu1 %v2918_v37, %s3887_s4 }
0x155a   :  { %v2905_v14 = vpop.permute.xlu1 %2904 }
0x155b   :  { %2942 = vrot.lane.b32.xlu0 %v2920_v8, %s3887_s4  ;;  %v2921_v9 = vmul.f32 %v2905_v14, %v4861_v20  ;;  %v3026_v8 = vsel %vm210_vm10, 1, %v3888_v57  ;;  %v3057_v14 = vld [vmem:[%s4955_s5] sm:$0xff]  ;;  %v3060_v57 = vld [vmem:[%s4955_s5 + $0x18] sm:$0xff] }
0x155c   :  { %v2853_v59 = vpop.permute.xlu0 %2852 }
0x155d   :  { %2940 = vrot.lane.b32.xlu1 %v2919_v43, %s3887_s4  ;;  %v2875_v61 = vmul.f32 %v2853_v59, %v4838_v48 }
0x155e   :  { %v2855_v60 = vpop.permute.xlu1 %2854 }
0x155f   :  { %v2876_v0 = vmul.f32 %v2855_v60, %v4843_v39  ;;  %v3601_v60 = vpack.c.bf16 %v3060_v57, %v3059_v15  ;;  %v3343_v15 = vld [vmem:[%s4960_s10] ss:$0 sm:$0xff] }
0x1560   :  { %v2851_v21 = vpop.permute.xlu0 %2850 }
0x1561   :  { %2944 = vrot.lane.b32.xlu1 %v2921_v9, %s3887_s4  ;;  %v2874_v5 = vmul.f32 %v2851_v21, %v4834_v44  ;;  %v3058_v9 = vld [vmem:[%s4955_s5 + $0x8] sm:$0xff] }
0x1562   :  { %v2857_v51 = vpop.permute.xlu1 %2856  ;;  %v3598_v59 = vpack.c.bf16 %v3058_v9, %v3057_v14 }
0x1563   :  { %v2877_v11 = vmul.f32 %v2857_v51, %v4841_v49 }
0x1564   :  { %v2863_v62 = vpop.permute.xlu0 %2862  ;;  %3599 = vmatpush3.bf16.msra.mxu0 %v3598_v59 }
0x1565   :  { %v2880_v16 = vmul.f32 %v2863_v62, %v4853_v34  ;;  %3600 = vmatprep.subr.bf16.mxu0 %v3883_v2  ;;  %v2971_v62 = vmul.f32 0.5, %v4838_v48 }
0x1566   :  { %v2859_v56 = vpop.permute.xlu1 %2858 }
0x1567   :  { %v2878_v10 = vmul.f32 %v2859_v56, %v4848_v53 }
0x1568   :  { %v2865_v12 = vpop.permute.xlu0 %2864  ;;  %3602 = vmatpush3.bf16.msra.mxu0 %v3601_v60 }
0x1569   :  { %v2881_v40 = vmul.f32 %v2865_v12, %v4861_v20  ;;  %3609 = vmatprep.subr.bf16.mxu0 %v3883_v2  ;;  %v2972_v12 = vmul.f32 0.5, %v4843_v39  ;;  %v2975_v39 = vmul.f32 0.5, %v4855_v54 }
0x156a   :  { %v2861_v55 = vpop.permute.xlu1 %2860 }
0x156b   :  { %v2879_v25 = vmul.f32 %v2861_v55, %v4855_v54  ;;  %v2970_v55 = vmul.f32 0.5, %v4834_v44  ;;  %v3142_v44 = vld [vmem:[%s4956_s7] sm:$0xff] }
0x15c1   :  { %v2931_v63 = vpop.permute.xlu0 %2930 }
0x15c2   :  { %v2954_v47 = vadd.f32 %v2931_v63, %v2874_v5 }
0x15c4   :  { %v2962_v27 = vmul.f32 0.5, %v2954_v47 }
0x15c5   :  { %v2933_v3 = vpop.permute.xlu0 %2932 }
0x15c6   :  { %3861 = vtanh.f32 %v2962_v27  ;;  %v2955_v4 = vadd.f32 %v2933_v3, %v2875_v61  ;;  %v2973_v27 = vmul.f32 0.5, %v4841_v49  ;;  %v3143_v49 = vld [vmem:[%s4956_s7 + $0x8] sm:$0xff] }
0x15c7   :  { %v2937_v19 = vpop.permute.xlu1 %2936 }
0x15c8   :  { %v2963_v26 = vmul.f32 0.5, %v2955_v4  ;;  %v2957_v29 = vadd.f32 %v2937_v19, %v2877_v11  ;;  %v2974_v4 = vmul.f32 0.5, %v4848_v53 }
0x15c9   :  { %v2935_v7 = vpop.permute.xlu0 %2934 }
0x15ca   :  { %3863 = vtanh.f32 %v2963_v26  ;;  %v2956_v13 = vadd.f32 %v2935_v7, %v2876_v0  ;;  %v2965_v30 = vmul.f32 0.5, %v2957_v29  ;;  %v2976_v29 = vmul.f32 0.5, %v4853_v34 }
0x15cb   :  { %v2939_v1 = vpop.permute.xlu1 %2938 }
0x15cc   :  { %v2964_v33 = vmul.f32 0.5, %v2956_v13  ;;  %v2958_v23 = vadd.f32 %v2939_v1, %v2878_v10  ;;  %v3604_v1 = vpack.c.bf16 %v3143_v49, %v3142_v44 }
0x15cd   :  { %v2943_v35 = vpop.permute.xlu0 %2942 }
0x15ce   :  { %3865 = vtanh.f32 %v2964_v33  ;;  %v2966_v24 = vmul.f32 0.5, %v2958_v23  ;;  %v2960_v41 = vadd.f32 %v2943_v35, %v2880_v16  ;;  %3605 = vmatpush3.bf16.msra.mxu1 %v3604_v1  ;;  %v2977_v35 = vmul.f32 0.5, %v4861_v20 }
0x15cf   :  { %v2941_v17 = vpop.permute.xlu1 %2940  ;;  %3606 = vmatprep.subr.bf16.mxu1 %v3883_v2  ;;  %v3144_v2 = vld [vmem:[%s4956_s7 + $0x10] sm:$0xff] }
0x15d0   :  { %v3862_v18 = vpop.eup %3861  ;;  %3867 = vtanh.f32 %v2966_v24  ;;  %v2968_v31 = vmul.f32 0.5, %v2960_v41  ;;  %v2959_v36 = vadd.f32 %v2941_v17, %v2879_v25 }
0x15d1   :  { %2994 = vrot.lane.b32.xlu0 %v3862_v18, %s3886_s0  ;;  %3869 = vtanh.f32 %v2965_v30 }
0x15d2   :  { %v2967_v28 = vmul.f32 0.5, %v2959_v36  ;;  %3871 = vtanh.f32 %v2968_v31 }
0x15d3   :  { %v2945_v38 = vpop.permute.xlu1 %2944 }
0x15d4   :  { %v3864_v22 = vpop.eup %3863  ;;  %v2961_v32 = vadd.f32 %v2945_v38, %v2881_v40  ;;  %3873 = vtanh.f32 %v2967_v28  ;;  %v3145_v38 = vld [vmem:[%s4956_s7 + $0x18] sm:$0xff] }
0x15d5   :  { %2996 = vrot.lane.b32.xlu0 %v3864_v22, %s3886_s0  ;;  %v3607_v22 = vpack.c.bf16 %v3145_v38, %v3144_v2 }
0x15d6   :  { %v2969_v42 = vmul.f32 0.5, %v2961_v32  ;;  %v3339_v32 = vld [vmem:[%s4957_s6] ss:$0 sm:$0xff] }
0x15d7   :  { %3608 = vmatpush3.bf16.msra.mxu1 %v3607_v22 }
0x15d8   :  { %v3866_v52 = vpop.eup %3865  ;;  %3875 = vtanh.f32 %v2969_v42 }
0x15d9   :  { %2998 = vrot.lane.b32.xlu1 %v3866_v52, %s3886_s0 }
0x15da   :  { %v3868_v46 = vpop.eup %3867 }
0x15db   :  { %3002 = vrot.lane.b32.xlu0 %v3868_v46, %s3886_s0  ;;  %v3870_v45 = vpop.eup %3869 }
0x15dc   :  { %v3872_v37 = vpop.eup %3871 }
0x15dd   :  { %3000 = vrot.lane.b32.xlu1 %v3870_v45, %s3886_s0  ;;  %v3228_v45 = vld [vmem:[%s4958_s9 + $0x8] sm:$0xff] }
0x15de   :  { %v3874_v50 = vpop.eup %3873 }
0x15df   :  { %3006 = vrot.lane.b32.xlu0 %v3872_v37, %s3886_s0 }
0x15e1   :  { %3004 = vrot.lane.b32.xlu1 %v3874_v50, %s3886_s0  ;;  %v3341_v50 = vld [vmem:[%s4959_s8] ss:$0 sm:$0xff] }
0x15e2   :  { %v3876_v43 = vpop.eup %3875 }
0x15e3   :  { %3028 = vperm.xlu0 %3619, %v3026_v8  }
0x15e5   :  { %3008 = vrot.lane.b32.xlu1 %v3876_v43, %s3886_s0 }
0x1643   :  { %v2995_v21 = vpop.permute.xlu0 %2994 }
0x1644   :  { %v3018_v0 = vmul.f32 %v2995_v21, %v2970_v55 }
0x1647   :  { %v2997_v51 = vpop.permute.xlu0 %2996 }
0x1648   :  { %v3019_v56 = vmul.f32 %v2997_v51, %v2971_v62 }
0x164a   :  { %v3039_v61 = vrot.slane %v3019_v56, 7 }
0x164b   :  { %v2999_v5 = vpop.permute.xlu1 %2998 }
0x164c   :  { %v3020_v63 = vmul.f32 %v2999_v5, %v2972_v12  ;;  %v3040_v48 = vsel %vm499_vm3, %v3039_v61, %v3018_v0 }
0x164d   :  { %v3003_v47 = vpop.permute.xlu0 %3002 }
0x164e   :  { %v3041_v3 = vrot.slane %v3020_v63, 6  ;;  %v3022_v26 = vmul.f32 %v3003_v47, %v2974_v4 }
0x164f   :  { %v3001_v19 = vpop.permute.xlu1 %3000 }
0x1650   :  { %v3021_v11 = vmul.f32 %v3001_v19, %v2973_v27  ;;  %v3042_v53 = vsel %vm502_vm4, %v3041_v3, %v3040_v48  ;;  %v3045_v23 = vrot.slane %v3022_v26, 4  ;;  %vm3316_vm4 = vcmask 23552  }
0x1651   :  { %v3007_v10 = vpop.permute.xlu0 %3006 }
0x1652   :  { %v3043_v7 = vrot.slane %v3021_v11, 5  ;;  %v3024_v25 = vmul.f32 %v3007_v10, %v2976_v29 }
0x1653   :  { %v3005_v13 = vpop.permute.xlu1 %3004 }
0x1654   :  { %v3044_v16 = vsel %vm505_vm5, %v3043_v7, %v3042_v53  ;;  %v3023_v33 = vmul.f32 %v3005_v13, %v2975_v39  ;;  %v3049_v34 = vrot.slane %v3024_v25, 2 }
0x1655   :  { %v3046_v30 = vsel %vm508_vm6, %v3045_v23, %v3044_v16 }
0x1656   :  { %v3047_v54 = vrot.slane %v3023_v33, 3 }
0x1657   :  { %v3009_v24 = vpop.permute.xlu1 %3008 }
0x1658   :  { %v3048_v41 = vsel %vm511_vm7, %v3047_v54, %v3046_v30  ;;  %v3025_v17 = vmul.f32 %v3009_v24, %v2977_v35 }
0x1659   :  { %v3050_v31 = vsel %vm514_vm8, %v3049_v34, %v3048_v41 }
0x165a   :  { %v3051_v18 = vrot.slane %v3025_v17, 1 }
0x165c   :  { %v3052_v36 = vsel %vm517_vm9, %v3051_v18, %v3050_v31 }
0x165d   :  { %3053 = vrot.lane.b32.xlu1 %v3052_v36, %s3887_s4 }
0x1662   :  { %v3029_v40 = vpop.permute.xlu0 %3028 }
0x1663   :  { %vm3030_vm3 = vcmp.eq.s32.totalorder %v3029_v40, 1 }
0x16cf   :  { %v3054_v28 = vpop.permute.xlu1 %3053 }
0x16d0   :  { %v3056_v20 = vsel %vm3030_vm3, %v3054_v28, %v4810_v58 }
0x16d1   :  { %3525 = vmatmul.mubr.msk.f32.vlgmr.msra.gmra.mrb[14].mxu0 %vm219_vm12, %v3056_v20 }
0x16d2   :  { %3542 = vmatprep.mubr.msk.f32.mxu0 %vm3884_vm1, %v3885_v6  ;;  %v3227_v6 = vld [vmem:[%s4958_s9] sm:$0xff]  ;;  %vm3236_vm1 = vcmask 130048  }
0x16d3   :  { %v3610_v37 = vpack.c.bf16 %v3228_v45, %v3227_v6 }
0x16d5   :  { %3611 = vmatpush3.bf16.msra.mxu0 %v3610_v37 }
0x17a4   :  { %v3137_v58 = vpop.f32.mrb[14].mxu0 }
0x17a5   :  { %v3138_v42 = vadd.f32 %v3339_v32, %v3137_v58  ;;  %v3526_v52 = vpop.f32.mrb[15].mxu0 }
0x17a7   :  { %v3141_v46 = vmax.f32 %v3138_v42, 0.0 }
0x17a9   :  { %3536 = vmatmul.mubr.msk.f32.vlgmr.msra.gmra.mrb[10].mxu1 %vm219_vm12, %v3141_v46 }
0x187c   :  { %v3222_v8 = vpop.f32.mrb[10].mxu1 }
0x187d   :  { %v3223_v43 = vadd.f32 %v3341_v50, %v3222_v8  ;;  %v3537_v14 = vpop.f32.mrb[11].mxu1 }
0x187f   :  { %v3226_v9 = vmax.f32 %v3223_v43, 0.0 }
0x1881   :  { %3543 = vmatmul.mubr.msk.f32.vlgmr.msra.gmra.mrb[16].mxu0 %vm3236_vm1, %v3226_v9 }
0x1954   :  { %v3306_v59 = vpop.f32.mrb[16].mxu0 }
0x1955   :  { %v3307_v57 = vadd.f32 %v3343_v15, %v3306_v59  ;;  %v3544_v60 = vpop.f32.mrb[17].mxu0 }
0x1957   :  { %v3345_v21 = vmul.f32 -1.442695, %v3307_v57 }
0x1959   :  { %3877 = vpow2.f32 %v3345_v21 }
0x1963   :  { %v3878_v51 = vpop.eup %3877 }
0x1964   :  { %v3313_v62 = vadd.f32 1.0, %v3878_v51 }
0x1966   :  { %3879 = vrcp.f32 %v3313_v62 }
0x1970   :  { %v3880_v56 = vpop.eup %3879 }
0x1971   :  { %3317 = vst.msk [vmem:[%s4961_s11] sm:$0xff] %vm3316_vm4, %v3880_v56 }

</bundles_post_ra>
